<compile_context>
chip_gen: v5e
topology: v5e:2x2
jax: 0.10.0
libtpu: 0.0.40
codegen_flags: <defaults>
</compile_context>

<pallas_src>
import jax
import jax.numpy as jnp
from jax.experimental import pallas as pl
from jax.experimental.pallas import tpu as pltpu

EPS = 1e-5          # torch.nn.BatchNorm2d default eps
NEG_SLOPE = 0.2     # LeakyReLU slope
KSIZE = 5
PAD = 2
C_OUT = 64
W_OFF = 8           # sublane-aligned offset of the real data inside the padded h1 scratch


# ----------------------------- Pallas kernel --------------------------------

def _discriminator_kernel(xce_ref, xco_ref, w1_ref, b1_ref, g1_ref, be1_ref,
                          w2_ref, b2_ref, g2_ref, be2_ref, wl_ref, bl_ref,
                          out_ref, h1e_ref, h1o_ref):
    """Fused conv1+BN+LReLU -> conv2+BN+LReLU -> Linear+Sigmoid.

    xce_ref/xco_ref: (B*H2*W, 25) bf16   im2col of conv1, even / odd output rows
    w1_ref:          (25, 64)     bf16
    w2_ref:          (25, 64, 64) bf16   per-tap (cin, cout) slices of conv2 weight
    b*/g*/be*:       (1, 64)      f32    conv biases / BN gamma / BN beta
    wl_ref:          (H2*W, 64)   f32    Linear weight in (h, w, c) row order (NOT tiled over B)
    bl_ref:          (1, 1)       f32
    out_ref:         (B, 1)       f32
    h1e_ref/h1o_ref: zero-padded VMEM staging of h1 even/odd rows (f32)
    """
    batch = out_ref.shape[0]
    h2 = h1e_ref.shape[1] - 2                     # conv2 output height
    w = h1e_ref.shape[2] - (W_OFF + PAD)          # width
    r_half = xce_ref.shape[0]                     # rows per parity half = B*H2*W
    r2 = batch * h2 * w                           # conv2 output rows (== r_half)

    # ---- conv1 (even / odd output-row halves): bf16 MXU matmul, f32 accumulate ----
    a_e = jnp.dot(xce_ref[...], w1_ref[...],
                  preferred_element_type=jnp.float32) + b1_ref[...]
    a_o = jnp.dot(xco_ref[...], w1_ref[...],
                  preferred_element_type=jnp.float32) + b1_ref[...]

    # ---- BatchNorm #1 (training-mode biased batch stats over all rows) + LeakyReLU ----
    n1 = float(2 * r_half)
    mean1 = (jnp.sum(a_e, axis=0, keepdims=True)
             + jnp.sum(a_o, axis=0, keepdims=True)) / n1
    c_e = a_e - mean1
    c_o = a_o - mean1
    var1 = (jnp.sum(c_e * c_e, axis=0, keepdims=True)
            + jnp.sum(c_o * c_o, axis=0, keepdims=True)) / n1
    scale1 = g1_ref[...] * jax.lax.rsqrt(var1 + EPS)
    h_e = c_e * scale1 + be1_ref[...]
    h_o = c_o * scale1 + be1_ref[...]
    h_e = jnp.where(h_e > 0, h_e, NEG_SLOPE * h_e)
    h_o = jnp.where(h_o > 0, h_o, NEG_SLOPE * h_o)

    # ---- stage h1 into zero-padded even/odd-row VMEM scratch. The stride-2 / pad-2
    #      conv2 taps then become plain contiguous slices of these buffers. Data is
    #      stored at a sublane-aligned width offset (W_OFF) for cheap stores. ----
    h1e_ref[...] = jnp.zeros_like(h1e_ref)
    h1o_ref[...] = jnp.zeros_like(h1o_ref)
    h1e_ref[:, 1:1 + h2, W_OFF:W_OFF + w, :] = h_e.reshape(batch, h2, w, C_OUT)
    h1o_ref[:, 1:1 + h2, W_OFF:W_OFF + w, :] = h_o.reshape(batch, h2, w, C_OUT)

    # ---- conv2 as 25 accumulated per-tap (R2,64)x(64,64) matmuls (no im2col slab) ----
    acc = jnp.zeros((r2, C_OUT), jnp.float32)
    for kh in range(KSIZE):
        if kh % 2 == 0:
            src, hoff = h1e_ref, kh // 2
        else:
            src, hoff = h1o_ref, (kh - 1) // 2
        for kw in range(KSIZE):
            c0 = kw + W_OFF - PAD
            win = src[:, hoff:hoff + h2, c0:c0 + w, :].reshape(r2, C_OUT)
            acc = acc + jnp.dot(win.astype(jnp.bfloat16),
                                w2_ref[kh * KSIZE + kw],
                                preferred_element_type=jnp.float32)
    acc = acc + b2_ref[...]

    # ---- BatchNorm #2 + LeakyReLU (centered value reused once, f32) ----
    mean2 = jnp.sum(acc, axis=0, keepdims=True) / float(r2)
    c2 = acc - mean2
    var2 = jnp.sum(c2 * c2, axis=0, keepdims=True) / float(r2)
    scale2 = g2_ref[...] * jax.lax.rsqrt(var2 + EPS)
    h2act = c2 * scale2 + be2_ref[...]
    h2act = jnp.where(h2act > 0, h2act, NEG_SLOPE * h2act)

    # ---- Linear(D, 1) + Sigmoid: per-batch reduce of h2 * wl (no tiled weight / seg matmul) ----
    prod = h2act.reshape(batch, h2 * w, C_OUT) * wl_ref[...][None, :, :]
    per_b = jnp.sum(prod, axis=1)                                   # (B, 64)
    logits = jnp.sum(per_b, axis=1, keepdims=True) + bl_ref[...]    # (B, 1)
    out_ref[...] = jax.nn.sigmoid(logits)


# ------------------------------ JAX glue -------------------------------------

def _conv1_im2col_split(x):
    """im2col for conv1 (k=5, pad=2, stride=(2,1)); rows split by output-row parity.

    x: (B, S, F) -> (even (B*H2*F, 25), odd (B*H2*F, 25)).  Column index = kh*5 + kw.
    """
    b, s, f = x.shape
    assert s % 4 == 0, "samples must be divisible by 4 (two stride-2 convs)"
    h1, h2 = s // 2, s // 4
    xp = jnp.pad(x, ((0, 0), (PAD, PAD), (PAD, PAD)))
    cols = []
    for kh in range(KSIZE):
        for kw in range(KSIZE):
            cols.append(xp[:, kh:kh + 2 * h1:2, kw:kw + f])         # (B, H1, F)
    arr = jnp.stack(cols, axis=-1)                                  # (B, H1, F, 25)
    even = arr[:, 0::2].reshape(b * h2 * f, KSIZE * KSIZE)
    odd = arr[:, 1::2].reshape(b * h2 * f, KSIZE * KSIZE)
    return even, odd, h2


def make_params(samples, features, key):
    """Deterministic synthetic parameters, shaped exactly like the PyTorch module."""
    d = int(C_OUT * samples * features / 4)
    ks = jax.random.split(key, 9)
    return dict(
        w1=0.10 * jax.random.normal(ks[0], (C_OUT, 1, KSIZE, KSIZE), jnp.float32),
        b1=0.05 * jax.random.normal(ks[1], (C_OUT,), jnp.float32),
        g1=1.0 + 0.10 * jax.random.normal(ks[2], (C_OUT,), jnp.float32),
        be1=0.05 * jax.random.normal(ks[3], (C_OUT,), jnp.float32),
        w2=0.05 * jax.random.normal(ks[4], (C_OUT, C_OUT, KSIZE, KSIZE), jnp.float32),
        b2=0.05 * jax.random.normal(ks[5], (C_OUT,), jnp.float32),
        g2=1.0 + 0.10 * jax.random.normal(ks[6], (C_OUT,), jnp.float32),
        be2=0.05 * jax.random.normal(ks[7], (C_OUT,), jnp.float32),
        wl=0.02 * jax.random.normal(ks[8], (1, d), jnp.float32),
        bl=jnp.array([[0.1]], jnp.float32),
    )


def discriminator_forward(x, params):
    """x: (B, samples, features) float32 -> (B, 1) float32."""
    b, s, f = x.shape
    h2 = s // 4
    vmem = pl.BlockSpec(memory_space=pltpu.MemorySpace.VMEM)

    xce, xco, _ = _conv1_im2col_split(x)
    xce = xce.astype(jnp.bfloat16)                                  # MXU operands in bf16,
    xco = xco.astype(jnp.bfloat16)                                  # f32 accumulation in-kernel

    # Conv weights permuted for the kernel's NHWC row layout, cast to bf16.
    w1k = jnp.transpose(params["w1"], (2, 3, 1, 0)).reshape(KSIZE * KSIZE, C_OUT)
    w1k = w1k.astype(jnp.bfloat16)                                  # (25, 64)
    w2k = jnp.transpose(params["w2"], (2, 3, 1, 0)).astype(jnp.bfloat16)
    w2k = w2k.reshape(KSIZE * KSIZE, C_OUT, C_OUT)                  # (25, 64, 64) = [tap, cin, cout]

    # Linear weight: PyTorch flattens (c, h, w); reorder once to (h, w, c) rows. Passed
    # once (NOT tiled over batch) -- the kernel reduces per-batch row blocks itself.
    wl_hwc = jnp.transpose(params["wl"].reshape(C_OUT, h2, f), (1, 2, 0)).reshape(h2 * f, C_OUT)

    out = pl.pallas_call(
        _discriminator_kernel,
        out_shape=jax.ShapeDtypeStruct((b, 1), jnp.float32),
        in_specs=[vmem] * 12,
        out_specs=vmem,
        scratch_shapes=[
            pltpu.VMEM((b, h2 + 2, f + W_OFF + PAD, C_OUT), jnp.float32),  # even h1 rows, zero-padded
            pltpu.VMEM((b, h2 + 1, f + W_OFF + PAD, C_OUT), jnp.float32),  # odd  h1 rows, zero-padded
        ],
    )(xce, xco, w1k,
      params["b1"].reshape(1, C_OUT), params["g1"].reshape(1, C_OUT),
      params["be1"].reshape(1, C_OUT),
      w2k,
      params["b2"].reshape(1, C_OUT), params["g2"].reshape(1, C_OUT),
      params["be2"].reshape(1, C_OUT),
      wl_hwc, params["bl"])
    return out


# --------------------------- pure-JAX reference ------------------------------
# Matches the kernel's numerics (bf16 conv operands, f32 accumulation, f32 BN/LReLU/Linear).

def _ref_forward(x, p):
    def bn_lrelu(y, g, be):
        mean = y.mean(axis=(0, 2, 3), keepdims=True)
        var = ((y - mean) ** 2).mean(axis=(0, 2, 3), keepdims=True)
        y = (y - mean) / jnp.sqrt(var + EPS) * g[None, :, None, None] + be[None, :, None, None]
        return jnp.where(y > 0, y, NEG_SLOPE * y)

    def conv(y, wgt, bias, stride):
        y = jax.lax.conv_general_dilated(
            y.astype(jnp.bfloat16), wgt.astype(jnp.bfloat16),
            window_strides=stride, padding=((PAD, PAD), (PAD, PAD)),
            dimension_numbers=("NCHW", "OIHW", "NCHW"),
            preferred_element_type=jnp.float32)
        return y + bias[None, :, None, None]

    y = x[:, None]                                   # NCHW, C=1
    y = bn_lrelu(conv(y, p["w1"], p["b1"], (2, 1)), p["g1"], p["be1"])
    y = bn_lrelu(conv(y, p["w2"], p["b2"], (2, 1)), p["g2"], p["be2"])
    flat = y.reshape(y.shape[0], -1)                 # NCHW flatten -> (B, 64*H2*W)
    logits = jnp.sum(flat * p["wl"], axis=-1, keepdims=True) + p["bl"][0]
    return jax.nn.sigmoid(logits)


# --------------------------------- main ---------------------------------------

if __name__ == "__main__":
    SAMPLES, FEATURES, BATCH = 16, 8, 2

    key = jax.random.PRNGKey(0)
    kx, kp = jax.random.split(key)
    x = jax.random.normal(kx, (BATCH, SAMPLES, FEATURES), jnp.float32)
    params = make_params(SAMPLES, FEATURES, kp)

    out = jax.block_until_ready(jax.jit(discriminator_forward)(x, params))
    ref = jax.block_until_ready(_ref_forward(x, params))

    assert out.shape == (BATCH, 1), out.shape
    assert jnp.allclose(out, ref, atol=1e-3, rtol=1e-3), (out, ref)

    print("KERNEL_OK")
</pallas_src>

<mosaic_0001>
module attributes {stable_mosaic.version = 11 : i64} {
  func.func @_discriminator_kernel(%arg0: memref<64x25xbf16, #tpu.memory_space<vmem>>, %arg1: memref<64x25xbf16, #tpu.memory_space<vmem>>, %arg2: memref<25x64xbf16, #tpu.memory_space<vmem>>, %arg3: memref<1x64xf32, #tpu.memory_space<vmem>>, %arg4: memref<1x64xf32, #tpu.memory_space<vmem>>, %arg5: memref<1x64xf32, #tpu.memory_space<vmem>>, %arg6: memref<25x64x64xbf16, #tpu.memory_space<vmem>>, %arg7: memref<1x64xf32, #tpu.memory_space<vmem>>, %arg8: memref<1x64xf32, #tpu.memory_space<vmem>>, %arg9: memref<1x64xf32, #tpu.memory_space<vmem>>, %arg10: memref<32x64xf32, #tpu.memory_space<vmem>>, %arg11: memref<1x1xf32, #tpu.memory_space<vmem>>, %arg12: memref<2x1xf32, #tpu.memory_space<vmem>>, %arg13: memref<2x6x18x64xf32, #tpu.memory_space<vmem>>, %arg14: memref<2x5x18x64xf32, #tpu.memory_space<vmem>>) attributes {dimension_semantics = [], scalar_prefetch = 0 : i64, scratch_operands = 2 : i64, tpu.core_type = #tpu.core_type<tc>} {
    %c0 = arith.constant 0 : index
    %c0_0 = arith.constant 0 : index
    %0 = vector.load %arg0[%c0, %c0_0] : memref<64x25xbf16, #tpu.memory_space<vmem>>, vector<64x25xbf16>
    %c0_1 = arith.constant 0 : index
    %c0_2 = arith.constant 0 : index
    %1 = vector.load %arg2[%c0_1, %c0_2] : memref<25x64xbf16, #tpu.memory_space<vmem>>, vector<25x64xbf16>
    %cst = arith.constant dense<0.000000e+00> : vector<64x64xf32>
    %2 = tpu.matmul %0, %1, %cst {dimension_numbers = #tpu.dot_dimension_numbers<[1], [0], [0], [1], [0, 0, 1, 1], [], []>} : vector<64x25xbf16>, vector<25x64xbf16>, vector<64x64xf32> -> vector<64x64xf32>
    %c0_3 = arith.constant 0 : index
    %c0_4 = arith.constant 0 : index
    %3 = vector.load %arg3[%c0_3, %c0_4] : memref<1x64xf32, #tpu.memory_space<vmem>>, vector<1x64xf32>
    %4 = vector.broadcast %3 : vector<1x64xf32> to vector<64x64xf32>
    %5 = arith.addf %2, %4 : vector<64x64xf32>
    %c0_5 = arith.constant 0 : index
    %c0_6 = arith.constant 0 : index
    %6 = vector.load %arg1[%c0_5, %c0_6] : memref<64x25xbf16, #tpu.memory_space<vmem>>, vector<64x25xbf16>
    %c0_7 = arith.constant 0 : index
    %c0_8 = arith.constant 0 : index
    %7 = vector.load %arg2[%c0_7, %c0_8] : memref<25x64xbf16, #tpu.memory_space<vmem>>, vector<25x64xbf16>
    %cst_9 = arith.constant dense<0.000000e+00> : vector<64x64xf32>
    %8 = tpu.matmul %6, %7, %cst_9 {dimension_numbers = #tpu.dot_dimension_numbers<[1], [0], [0], [1], [0, 0, 1, 1], [], []>} : vector<64x25xbf16>, vector<25x64xbf16>, vector<64x64xf32> -> vector<64x64xf32>
    %c0_10 = arith.constant 0 : index
    %c0_11 = arith.constant 0 : index
    %9 = vector.load %arg3[%c0_10, %c0_11] : memref<1x64xf32, #tpu.memory_space<vmem>>, vector<1x64xf32>
    %10 = vector.broadcast %9 : vector<1x64xf32> to vector<64x64xf32>
    %11 = arith.addf %8, %10 : vector<64x64xf32>
    %cst_12 = arith.constant dense<0.000000e+00> : vector<64xf32>
    %12 = vector.multi_reduction <add>, %5, %cst_12 [0] : vector<64x64xf32> to vector<64xf32>
    %13 = vector.shape_cast %12 : vector<64xf32> to vector<1x64xf32>
    %cst_13 = arith.constant dense<0.000000e+00> : vector<64xf32>
    %14 = vector.multi_reduction <add>, %11, %cst_13 [0] : vector<64x64xf32> to vector<64xf32>
    %15 = vector.shape_cast %14 : vector<64xf32> to vector<1x64xf32>
    %16 = arith.addf %13, %15 : vector<1x64xf32>
    %cst_14 = arith.constant 1.280000e+02 : f32
    %17 = vector.broadcast %cst_14 : f32 to vector<1x64xf32>
    %18 = arith.divf %16, %17 : vector<1x64xf32>
    %19 = vector.broadcast %18 : vector<1x64xf32> to vector<64x64xf32>
    %20 = arith.subf %5, %19 : vector<64x64xf32>
    %21 = vector.broadcast %18 : vector<1x64xf32> to vector<64x64xf32>
    %22 = arith.subf %11, %21 : vector<64x64xf32>
    %23 = arith.mulf %20, %20 : vector<64x64xf32>
    %cst_15 = arith.constant dense<0.000000e+00> : vector<64xf32>
    %24 = vector.multi_reduction <add>, %23, %cst_15 [0] : vector<64x64xf32> to vector<64xf32>
    %25 = vector.shape_cast %24 : vector<64xf32> to vector<1x64xf32>
    %26 = arith.mulf %22, %22 : vector<64x64xf32>
    %cst_16 = arith.constant dense<0.000000e+00> : vector<64xf32>
    %27 = vector.multi_reduction <add>, %26, %cst_16 [0] : vector<64x64xf32> to vector<64xf32>
    %28 = vector.shape_cast %27 : vector<64xf32> to vector<1x64xf32>
    %29 = arith.addf %25, %28 : vector<1x64xf32>
    %cst_17 = arith.constant 1.280000e+02 : f32
    %30 = vector.broadcast %cst_17 : f32 to vector<1x64xf32>
    %31 = arith.divf %29, %30 : vector<1x64xf32>
    %c0_18 = arith.constant 0 : index
    %c0_19 = arith.constant 0 : index
    %32 = vector.load %arg4[%c0_18, %c0_19] : memref<1x64xf32, #tpu.memory_space<vmem>>, vector<1x64xf32>
    %cst_20 = arith.constant 9.99999974E-6 : f32
    %33 = vector.broadcast %cst_20 : f32 to vector<1x64xf32>
    %34 = arith.addf %31, %33 : vector<1x64xf32>
    %35 = math.rsqrt %34 : vector<1x64xf32>
    %36 = arith.mulf %32, %35 : vector<1x64xf32>
    %37 = vector.broadcast %36 : vector<1x64xf32> to vector<64x64xf32>
    %38 = arith.mulf %20, %37 : vector<64x64xf32>
    %c0_21 = arith.constant 0 : index
    %c0_22 = arith.constant 0 : index
    %39 = vector.load %arg5[%c0_21, %c0_22] : memref<1x64xf32, #tpu.memory_space<vmem>>, vector<1x64xf32>
    %40 = vector.broadcast %39 : vector<1x64xf32> to vector<64x64xf32>
    %41 = arith.addf %38, %40 : vector<64x64xf32>
    %42 = vector.broadcast %36 : vector<1x64xf32> to vector<64x64xf32>
    %43 = arith.mulf %22, %42 : vector<64x64xf32>
    %c0_23 = arith.constant 0 : index
    %c0_24 = arith.constant 0 : index
    %44 = vector.load %arg5[%c0_23, %c0_24] : memref<1x64xf32, #tpu.memory_space<vmem>>, vector<1x64xf32>
    %45 = vector.broadcast %44 : vector<1x64xf32> to vector<64x64xf32>
    %46 = arith.addf %43, %45 : vector<64x64xf32>
    %cst_25 = arith.constant 0.000000e+00 : f32
    %47 = vector.broadcast %cst_25 : f32 to vector<64x64xf32>
    %48 = arith.cmpf ogt, %41, %47 : vector<64x64xf32>
    %cst_26 = arith.constant 2.000000e-01 : f32
    %49 = vector.broadcast %cst_26 : f32 to vector<64x64xf32>
    %50 = arith.mulf %49, %41 : vector<64x64xf32>
    %51 = arith.select %48, %41, %50 : vector<64x64xi1>, vector<64x64xf32>
    %cst_27 = arith.constant 0.000000e+00 : f32
    %52 = vector.broadcast %cst_27 : f32 to vector<64x64xf32>
    %53 = arith.cmpf ogt, %46, %52 : vector<64x64xf32>
    %cst_28 = arith.constant 2.000000e-01 : f32
    %54 = vector.broadcast %cst_28 : f32 to vector<64x64xf32>
    %55 = arith.mulf %54, %46 : vector<64x64xf32>
    %56 = arith.select %53, %46, %55 : vector<64x64xi1>, vector<64x64xf32>
    %cst_29 = arith.constant 0.000000e+00 : f32
    %57 = vector.broadcast %cst_29 : f32 to vector<2x6x18x64xf32>
    %c0_30 = arith.constant 0 : index
    %c0_31 = arith.constant 0 : index
    %c0_32 = arith.constant 0 : index
    %c0_33 = arith.constant 0 : index
    %58 = vector.load %arg13[%c0_30, %c0_31, %c0_32, %c0_33] : memref<2x6x18x64xf32, #tpu.memory_space<vmem>>, vector<2x6x18x64xf32>
    tpu.vector_store %arg13[%c0_30, %c0_31, %c0_32, %c0_33], %57 {strides = array<i32>} : memref<2x6x18x64xf32, #tpu.memory_space<vmem>>, vector<2x6x18x64xf32>,
    %cst_34 = arith.constant 0.000000e+00 : f32
    %59 = vector.broadcast %cst_34 : f32 to vector<2x5x18x64xf32>
    %c0_35 = arith.constant 0 : index
    %c0_36 = arith.constant 0 : index
    %c0_37 = arith.constant 0 : index
    %c0_38 = arith.constant 0 : index
    %60 = vector.load %arg14[%c0_35, %c0_36, %c0_37, %c0_38] : memref<2x5x18x64xf32, #tpu.memory_space<vmem>>, vector<2x5x18x64xf32>
    tpu.vector_store %arg14[%c0_35, %c0_36, %c0_37, %c0_38], %59 {strides = array<i32>} : memref<2x5x18x64xf32, #tpu.memory_space<vmem>>, vector<2x5x18x64xf32>,
    %61 = vector.shape_cast %51 : vector<64x64xf32> to vector<2x4x8x64xf32>
    %c0_39 = arith.constant 0 : index
    %c1 = arith.constant 1 : index
    %c8 = arith.constant 8 : index
    %c0_40 = arith.constant 0 : index
    %62 = vector.load %arg13[%c0_39, %c1, %c8, %c0_40] : memref<2x6x18x64xf32, #tpu.memory_space<vmem>>, vector<2x4x8x64xf32>
    tpu.vector_store %arg13[%c0_39, %c1, %c8, %c0_40], %61 {strides = array<i32>} : memref<2x6x18x64xf32, #tpu.memory_space<vmem>>, vector<2x4x8x64xf32>,
    %63 = vector.shape_cast %56 : vector<64x64xf32> to vector<2x4x8x64xf32>
    %c0_41 = arith.constant 0 : index
    %c1_42 = arith.constant 1 : index
    %c8_43 = arith.constant 8 : index
    %c0_44 = arith.constant 0 : index
    %64 = vector.load %arg14[%c0_41, %c1_42, %c8_43, %c0_44] : memref<2x5x18x64xf32, #tpu.memory_space<vmem>>, vector<2x4x8x64xf32>
    tpu.vector_store %arg14[%c0_41, %c1_42, %c8_43, %c0_44], %63 {strides = array<i32>} : memref<2x5x18x64xf32, #tpu.memory_space<vmem>>, vector<2x4x8x64xf32>,
    %cst_45 = arith.constant 0.000000e+00 : f32
    %65 = vector.broadcast %cst_45 : f32 to vector<64x64xf32>
    %c0_46 = arith.constant 0 : index
    %c0_47 = arith.constant 0 : index
    %c6 = arith.constant 6 : index
    %c0_48 = arith.constant 0 : index
    %66 = vector.load %arg13[%c0_46, %c0_47, %c6, %c0_48] : memref<2x6x18x64xf32, #tpu.memory_space<vmem>>, vector<2x4x8x64xf32>
    %67 = vector.shape_cast %66 : vector<2x4x8x64xf32> to vector<64x64xf32>
    %68 = arith.truncf %67 : vector<64x64xf32> to vector<64x64xbf16>
    %c0_49 = arith.constant 0 : index
    %c0_50 = arith.constant 0 : index
    %c0_51 = arith.constant 0 : index
    %69 = vector.load %arg6[%c0_49, %c0_50, %c0_51] : memref<25x64x64xbf16, #tpu.memory_space<vmem>>, vector<1x64x64xbf16>
    %70 = vector.shape_cast %69 : vector<1x64x64xbf16> to vector<64x64xbf16>
    %cst_52 = arith.constant dense<0.000000e+00> : vector<64x64xf32>
    %71 = tpu.matmul %68, %70, %cst_52 {dimension_numbers = #tpu.dot_dimension_numbers<[1], [0], [0], [1], [0, 0, 1, 1], [], []>} : vector<64x64xbf16>, vector<64x64xbf16>, vector<64x64xf32> -> vector<64x64xf32>
    %72 = arith.addf %65, %71 : vector<64x64xf32>
    %c0_53 = arith.constant 0 : index
    %c0_54 = arith.constant 0 : index
    %c7 = arith.constant 7 : index
    %c0_55 = arith.constant 0 : index
    %73 = vector.load %arg13[%c0_53, %c0_54, %c7, %c0_55] : memref<2x6x18x64xf32, #tpu.memory_space<vmem>>, vector<2x4x8x64xf32>
    %74 = vector.shape_cast %73 : vector<2x4x8x64xf32> to vector<64x64xf32>
    %75 = arith.truncf %74 : vector<64x64xf32> to vector<64x64xbf16>
    %c1_56 = arith.constant 1 : index
    %c0_57 = arith.constant 0 : index
    %c0_58 = arith.constant 0 : index
    %76 = vector.load %arg6[%c1_56, %c0_57, %c0_58] : memref<25x64x64xbf16, #tpu.memory_space<vmem>>, vector<1x64x64xbf16>
    %77 = vector.shape_cast %76 : vector<1x64x64xbf16> to vector<64x64xbf16>
    %cst_59 = arith.constant dense<0.000000e+00> : vector<64x64xf32>
    %78 = tpu.matmul %75, %77, %cst_59 {dimension_numbers = #tpu.dot_dimension_numbers<[1], [0], [0], [1], [0, 0, 1, 1], [], []>} : vector<64x64xbf16>, vector<64x64xbf16>, vector<64x64xf32> -> vector<64x64xf32>
    %79 = arith.addf %72, %78 : vector<64x64xf32>
    %c0_60 = arith.constant 0 : index
    %c0_61 = arith.constant 0 : index
    %c8_62 = arith.constant 8 : index
    %c0_63 = arith.constant 0 : index
    %80 = vector.load %arg13[%c0_60, %c0_61, %c8_62, %c0_63] : memref<2x6x18x64xf32, #tpu.memory_space<vmem>>, vector<2x4x8x64xf32>
    %81 = vector.shape_cast %80 : vector<2x4x8x64xf32> to vector<64x64xf32>
    %82 = arith.truncf %81 : vector<64x64xf32> to vector<64x64xbf16>
    %c2 = arith.constant 2 : index
    %c0_64 = arith.constant 0 : index
    %c0_65 = arith.constant 0 : index
    %83 = vector.load %arg6[%c2, %c0_64, %c0_65] : memref<25x64x64xbf16, #tpu.memory_space<vmem>>, vector<1x64x64xbf16>
    %84 = vector.shape_cast %83 : vector<1x64x64xbf16> to vector<64x64xbf16>
    %cst_66 = arith.constant dense<0.000000e+00> : vector<64x64xf32>
    %85 = tpu.matmul %82, %84, %cst_66 {dimension_numbers = #tpu.dot_dimension_numbers<[1], [0], [0], [1], [0, 0, 1, 1], [], []>} : vector<64x64xbf16>, vector<64x64xbf16>, vector<64x64xf32> -> vector<64x64xf32>
    %86 = arith.addf %79, %85 : vector<64x64xf32>
    %c0_67 = arith.constant 0 : index
    %c0_68 = arith.constant 0 : index
    %c9 = arith.constant 9 : index
    %c0_69 = arith.constant 0 : index
    %87 = vector.load %arg13[%c0_67, %c0_68, %c9, %c0_69] : memref<2x6x18x64xf32, #tpu.memory_space<vmem>>, vector<2x4x8x64xf32>
    %88 = vector.shape_cast %87 : vector<2x4x8x64xf32> to vector<64x64xf32>
    %89 = arith.truncf %88 : vector<64x64xf32> to vector<64x64xbf16>
    %c3 = arith.constant 3 : index
    %c0_70 = arith.constant 0 : index
    %c0_71 = arith.constant 0 : index
    %90 = vector.load %arg6[%c3, %c0_70, %c0_71] : memref<25x64x64xbf16, #tpu.memory_space<vmem>>, vector<1x64x64xbf16>
    %91 = vector.shape_cast %90 : vector<1x64x64xbf16> to vector<64x64xbf16>
    %cst_72 = arith.constant dense<0.000000e+00> : vector<64x64xf32>
    %92 = tpu.matmul %89, %91, %cst_72 {dimension_numbers = #tpu.dot_dimension_numbers<[1], [0], [0], [1], [0, 0, 1, 1], [], []>} : vector<64x64xbf16>, vector<64x64xbf16>, vector<64x64xf32> -> vector<64x64xf32>
    %93 = arith.addf %86, %92 : vector<64x64xf32>
    %c0_73 = arith.constant 0 : index
    %c0_74 = arith.constant 0 : index
    %c10 = arith.constant 10 : index
    %c0_75 = arith.constant 0 : index
    %94 = vector.load %arg13[%c0_73, %c0_74, %c10, %c0_75] : memref<2x6x18x64xf32, #tpu.memory_space<vmem>>, vector<2x4x8x64xf32>
    %95 = vector.shape_cast %94 : vector<2x4x8x64xf32> to vector<64x64xf32>
    %96 = arith.truncf %95 : vector<64x64xf32> to vector<64x64xbf16>
    %c4 = arith.constant 4 : index
    %c0_76 = arith.constant 0 : index
    %c0_77 = arith.constant 0 : index
    %97 = vector.load %arg6[%c4, %c0_76, %c0_77] : memref<25x64x64xbf16, #tpu.memory_space<vmem>>, vector<1x64x64xbf16>
    %98 = vector.shape_cast %97 : vector<1x64x64xbf16> to vector<64x64xbf16>
    %cst_78 = arith.constant dense<0.000000e+00> : vector<64x64xf32>
    %99 = tpu.matmul %96, %98, %cst_78 {dimension_numbers = #tpu.dot_dimension_numbers<[1], [0], [0], [1], [0, 0, 1, 1], [], []>} : vector<64x64xbf16>, vector<64x64xbf16>, vector<64x64xf32> -> vector<64x64xf32>
    %100 = arith.addf %93, %99 : vector<64x64xf32>
    %c0_79 = arith.constant 0 : index
    %c0_80 = arith.constant 0 : index
    %c6_81 = arith.constant 6 : index
    %c0_82 = arith.constant 0 : index
    %101 = vector.load %arg14[%c0_79, %c0_80, %c6_81, %c0_82] : memref<2x5x18x64xf32, #tpu.memory_space<vmem>>, vector<2x4x8x64xf32>
    %102 = vector.shape_cast %101 : vector<2x4x8x64xf32> to vector<64x64xf32>
    %103 = arith.truncf %102 : vector<64x64xf32> to vector<64x64xbf16>
    %c5 = arith.constant 5 : index
    %c0_83 = arith.constant 0 : index
    %c0_84 = arith.constant 0 : index
    %104 = vector.load %arg6[%c5, %c0_83, %c0_84] : memref<25x64x64xbf16, #tpu.memory_space<vmem>>, vector<1x64x64xbf16>
    %105 = vector.shape_cast %104 : vector<1x64x64xbf16> to vector<64x64xbf16>
    %cst_85 = arith.constant dense<0.000000e+00> : vector<64x64xf32>
    %106 = tpu.matmul %103, %105, %cst_85 {dimension_numbers = #tpu.dot_dimension_numbers<[1], [0], [0], [1], [0, 0, 1, 1], [], []>} : vector<64x64xbf16>, vector<64x64xbf16>, vector<64x64xf32> -> vector<64x64xf32>
    %107 = arith.addf %100, %106 : vector<64x64xf32>
    %c0_86 = arith.constant 0 : index
    %c0_87 = arith.constant 0 : index
    %c7_88 = arith.constant 7 : index
    %c0_89 = arith.constant 0 : index
    %108 = vector.load %arg14[%c0_86, %c0_87, %c7_88, %c0_89] : memref<2x5x18x64xf32, #tpu.memory_space<vmem>>, vector<2x4x8x64xf32>
    %109 = vector.shape_cast %108 : vector<2x4x8x64xf32> to vector<64x64xf32>
    %110 = arith.truncf %109 : vector<64x64xf32> to vector<64x64xbf16>
    %c6_90 = arith.constant 6 : index
    %c0_91 = arith.constant 0 : index
    %c0_92 = arith.constant 0 : index
    %111 = vector.load %arg6[%c6_90, %c0_91, %c0_92] : memref<25x64x64xbf16, #tpu.memory_space<vmem>>, vector<1x64x64xbf16>
    %112 = vector.shape_cast %111 : vector<1x64x64xbf16> to vector<64x64xbf16>
    %cst_93 = arith.constant dense<0.000000e+00> : vector<64x64xf32>
    %113 = tpu.matmul %110, %112, %cst_93 {dimension_numbers = #tpu.dot_dimension_numbers<[1], [0], [0], [1], [0, 0, 1, 1], [], []>} : vector<64x64xbf16>, vector<64x64xbf16>, vector<64x64xf32> -> vector<64x64xf32>
    %114 = arith.addf %107, %113 : vector<64x64xf32>
    %c0_94 = arith.constant 0 : index
    %c0_95 = arith.constant 0 : index
    %c8_96 = arith.constant 8 : index
    %c0_97 = arith.constant 0 : index
    %115 = vector.load %arg14[%c0_94, %c0_95, %c8_96, %c0_97] : memref<2x5x18x64xf32, #tpu.memory_space<vmem>>, vector<2x4x8x64xf32>
    %116 = vector.shape_cast %115 : vector<2x4x8x64xf32> to vector<64x64xf32>
    %117 = arith.truncf %116 : vector<64x64xf32> to vector<64x64xbf16>
    %c7_98 = arith.constant 7 : index
    %c0_99 = arith.constant 0 : index
    %c0_100 = arith.constant 0 : index
    %118 = vector.load %arg6[%c7_98, %c0_99, %c0_100] : memref<25x64x64xbf16, #tpu.memory_space<vmem>>, vector<1x64x64xbf16>
    %119 = vector.shape_cast %118 : vector<1x64x64xbf16> to vector<64x64xbf16>
    %cst_101 = arith.constant dense<0.000000e+00> : vector<64x64xf32>
    %120 = tpu.matmul %117, %119, %cst_101 {dimension_numbers = #tpu.dot_dimension_numbers<[1], [0], [0], [1], [0, 0, 1, 1], [], []>} : vector<64x64xbf16>, vector<64x64xbf16>, vector<64x64xf32> -> vector<64x64xf32>
    %121 = arith.addf %114, %120 : vector<64x64xf32>
    %c0_102 = arith.constant 0 : index
    %c0_103 = arith.constant 0 : index
    %c9_104 = arith.constant 9 : index
    %c0_105 = arith.constant 0 : index
    %122 = vector.load %arg14[%c0_102, %c0_103, %c9_104, %c0_105] : memref<2x5x18x64xf32, #tpu.memory_space<vmem>>, vector<2x4x8x64xf32>
    %123 = vector.shape_cast %122 : vector<2x4x8x64xf32> to vector<64x64xf32>
    %124 = arith.truncf %123 : vector<64x64xf32> to vector<64x64xbf16>
    %c8_106 = arith.constant 8 : index
    %c0_107 = arith.constant 0 : index
    %c0_108 = arith.constant 0 : index
    %125 = vector.load %arg6[%c8_106, %c0_107, %c0_108] : memref<25x64x64xbf16, #tpu.memory_space<vmem>>, vector<1x64x64xbf16>
    %126 = vector.shape_cast %125 : vector<1x64x64xbf16> to vector<64x64xbf16>
    %cst_109 = arith.constant dense<0.000000e+00> : vector<64x64xf32>
    %127 = tpu.matmul %124, %126, %cst_109 {dimension_numbers = #tpu.dot_dimension_numbers<[1], [0], [0], [1], [0, 0, 1, 1], [], []>} : vector<64x64xbf16>, vector<64x64xbf16>, vector<64x64xf32> -> vector<64x64xf32>
    %128 = arith.addf %121, %127 : vector<64x64xf32>
    %c0_110 = arith.constant 0 : index
    %c0_111 = arith.constant 0 : index
    %c10_112 = arith.constant 10 : index
    %c0_113 = arith.constant 0 : index
    %129 = vector.load %arg14[%c0_110, %c0_111, %c10_112, %c0_113] : memref<2x5x18x64xf32, #tpu.memory_space<vmem>>, vector<2x4x8x64xf32>
    %130 = vector.shape_cast %129 : vector<2x4x8x64xf32> to vector<64x64xf32>
    %131 = arith.truncf %130 : vector<64x64xf32> to vector<64x64xbf16>
    %c9_114 = arith.constant 9 : index
    %c0_115 = arith.constant 0 : index
    %c0_116 = arith.constant 0 : index
    %132 = vector.load %arg6[%c9_114, %c0_115, %c0_116] : memref<25x64x64xbf16, #tpu.memory_space<vmem>>, vector<1x64x64xbf16>
    %133 = vector.shape_cast %132 : vector<1x64x64xbf16> to vector<64x64xbf16>
    %cst_117 = arith.constant dense<0.000000e+00> : vector<64x64xf32>
    %134 = tpu.matmul %131, %133, %cst_117 {dimension_numbers = #tpu.dot_dimension_numbers<[1], [0], [0], [1], [0, 0, 1, 1], [], []>} : vector<64x64xbf16>, vector<64x64xbf16>, vector<64x64xf32> -> vector<64x64xf32>
    %135 = arith.addf %128, %134 : vector<64x64xf32>
    %c0_118 = arith.constant 0 : index
    %c1_119 = arith.constant 1 : index
    %c6_120 = arith.constant 6 : index
    %c0_121 = arith.constant 0 : index
    %136 = vector.load %arg13[%c0_118, %c1_119, %c6_120, %c0_121] : memref<2x6x18x64xf32, #tpu.memory_space<vmem>>, vector<2x4x8x64xf32>
    %137 = vector.shape_cast %136 : vector<2x4x8x64xf32> to vector<64x64xf32>
    %138 = arith.truncf %137 : vector<64x64xf32> to vector<64x64xbf16>
    %c10_122 = arith.constant 10 : index
    %c0_123 = arith.constant 0 : index
    %c0_124 = arith.constant 0 : index
    %139 = vector.load %arg6[%c10_122, %c0_123, %c0_124] : memref<25x64x64xbf16, #tpu.memory_space<vmem>>, vector<1x64x64xbf16>
    %140 = vector.shape_cast %139 : vector<1x64x64xbf16> to vector<64x64xbf16>
    %cst_125 = arith.constant dense<0.000000e+00> : vector<64x64xf32>
    %141 = tpu.matmul %138, %140, %cst_125 {dimension_numbers = #tpu.dot_dimension_numbers<[1], [0], [0], [1], [0, 0, 1, 1], [], []>} : vector<64x64xbf16>, vector<64x64xbf16>, vector<64x64xf32> -> vector<64x64xf32>
    %142 = arith.addf %135, %141 : vector<64x64xf32>
    %c0_126 = arith.constant 0 : index
    %c1_127 = arith.constant 1 : index
    %c7_128 = arith.constant 7 : index
    %c0_129 = arith.constant 0 : index
    %143 = vector.load %arg13[%c0_126, %c1_127, %c7_128, %c0_129] : memref<2x6x18x64xf32, #tpu.memory_space<vmem>>, vector<2x4x8x64xf32>
    %144 = vector.shape_cast %143 : vector<2x4x8x64xf32> to vector<64x64xf32>
    %145 = arith.truncf %144 : vector<64x64xf32> to vector<64x64xbf16>
    %c11 = arith.constant 11 : index
    %c0_130 = arith.constant 0 : index
    %c0_131 = arith.constant 0 : index
    %146 = vector.load %arg6[%c11, %c0_130, %c0_131] : memref<25x64x64xbf16, #tpu.memory_space<vmem>>, vector<1x64x64xbf16>
    %147 = vector.shape_cast %146 : vector<1x64x64xbf16> to vector<64x64xbf16>
    %cst_132 = arith.constant dense<0.000000e+00> : vector<64x64xf32>
    %148 = tpu.matmul %145, %147, %cst_132 {dimension_numbers = #tpu.dot_dimension_numbers<[1], [0], [0], [1], [0, 0, 1, 1], [], []>} : vector<64x64xbf16>, vector<64x64xbf16>, vector<64x64xf32> -> vector<64x64xf32>
    %149 = arith.addf %142, %148 : vector<64x64xf32>
    %c0_133 = arith.constant 0 : index
    %c1_134 = arith.constant 1 : index
    %c8_135 = arith.constant 8 : index
    %c0_136 = arith.constant 0 : index
    %150 = vector.load %arg13[%c0_133, %c1_134, %c8_135, %c0_136] : memref<2x6x18x64xf32, #tpu.memory_space<vmem>>, vector<2x4x8x64xf32>
    %151 = vector.shape_cast %150 : vector<2x4x8x64xf32> to vector<64x64xf32>
    %152 = arith.truncf %151 : vector<64x64xf32> to vector<64x64xbf16>
    %c12 = arith.constant 12 : index
    %c0_137 = arith.constant 0 : index
    %c0_138 = arith.constant 0 : index
    %153 = vector.load %arg6[%c12, %c0_137, %c0_138] : memref<25x64x64xbf16, #tpu.memory_space<vmem>>, vector<1x64x64xbf16>
    %154 = vector.shape_cast %153 : vector<1x64x64xbf16> to vector<64x64xbf16>
    %cst_139 = arith.constant dense<0.000000e+00> : vector<64x64xf32>
    %155 = tpu.matmul %152, %154, %cst_139 {dimension_numbers = #tpu.dot_dimension_numbers<[1], [0], [0], [1], [0, 0, 1, 1], [], []>} : vector<64x64xbf16>, vector<64x64xbf16>, vector<64x64xf32> -> vector<64x64xf32>
    %156 = arith.addf %149, %155 : vector<64x64xf32>
    %c0_140 = arith.constant 0 : index
    %c1_141 = arith.constant 1 : index
    %c9_142 = arith.constant 9 : index
    %c0_143 = arith.constant 0 : index
    %157 = vector.load %arg13[%c0_140, %c1_141, %c9_142, %c0_143] : memref<2x6x18x64xf32, #tpu.memory_space<vmem>>, vector<2x4x8x64xf32>
    %158 = vector.shape_cast %157 : vector<2x4x8x64xf32> to vector<64x64xf32>
    %159 = arith.truncf %158 : vector<64x64xf32> to vector<64x64xbf16>
    %c13 = arith.constant 13 : index
    %c0_144 = arith.constant 0 : index
    %c0_145 = arith.constant 0 : index
    %160 = vector.load %arg6[%c13, %c0_144, %c0_145] : memref<25x64x64xbf16, #tpu.memory_space<vmem>>, vector<1x64x64xbf16>
    %161 = vector.shape_cast %160 : vector<1x64x64xbf16> to vector<64x64xbf16>
    %cst_146 = arith.constant dense<0.000000e+00> : vector<64x64xf32>
    %162 = tpu.matmul %159, %161, %cst_146 {dimension_numbers = #tpu.dot_dimension_numbers<[1], [0], [0], [1], [0, 0, 1, 1], [], []>} : vector<64x64xbf16>, vector<64x64xbf16>, vector<64x64xf32> -> vector<64x64xf32>
    %163 = arith.addf %156, %162 : vector<64x64xf32>
    %c0_147 = arith.constant 0 : index
    %c1_148 = arith.constant 1 : index
    %c10_149 = arith.constant 10 : index
    %c0_150 = arith.constant 0 : index
    %164 = vector.load %arg13[%c0_147, %c1_148, %c10_149, %c0_150] : memref<2x6x18x64xf32, #tpu.memory_space<vmem>>, vector<2x4x8x64xf32>
    %165 = vector.shape_cast %164 : vector<2x4x8x64xf32> to vector<64x64xf32>
    %166 = arith.truncf %165 : vector<64x64xf32> to vector<64x64xbf16>
    %c14 = arith.constant 14 : index
    %c0_151 = arith.constant 0 : index
    %c0_152 = arith.constant 0 : index
    %167 = vector.load %arg6[%c14, %c0_151, %c0_152] : memref<25x64x64xbf16, #tpu.memory_space<vmem>>, vector<1x64x64xbf16>
    %168 = vector.shape_cast %167 : vector<1x64x64xbf16> to vector<64x64xbf16>
    %cst_153 = arith.constant dense<0.000000e+00> : vector<64x64xf32>
    %169 = tpu.matmul %166, %168, %cst_153 {dimension_numbers = #tpu.dot_dimension_numbers<[1], [0], [0], [1], [0, 0, 1, 1], [], []>} : vector<64x64xbf16>, vector<64x64xbf16>, vector<64x64xf32> -> vector<64x64xf32>
    %170 = arith.addf %163, %169 : vector<64x64xf32>
    %c0_154 = arith.constant 0 : index
    %c1_155 = arith.constant 1 : index
    %c6_156 = arith.constant 6 : index
    %c0_157 = arith.constant 0 : index
    %171 = vector.load %arg14[%c0_154, %c1_155, %c6_156, %c0_157] : memref<2x5x18x64xf32, #tpu.memory_space<vmem>>, vector<2x4x8x64xf32>
    %172 = vector.shape_cast %171 : vector<2x4x8x64xf32> to vector<64x64xf32>
    %173 = arith.truncf %172 : vector<64x64xf32> to vector<64x64xbf16>
    %c15 = arith.constant 15 : index
    %c0_158 = arith.constant 0 : index
    %c0_159 = arith.constant 0 : index
    %174 = vector.load %arg6[%c15, %c0_158, %c0_159] : memref<25x64x64xbf16, #tpu.memory_space<vmem>>, vector<1x64x64xbf16>
    %175 = vector.shape_cast %174 : vector<1x64x64xbf16> to vector<64x64xbf16>
    %cst_160 = arith.constant dense<0.000000e+00> : vector<64x64xf32>
    %176 = tpu.matmul %173, %175, %cst_160 {dimension_numbers = #tpu.dot_dimension_numbers<[1], [0], [0], [1], [0, 0, 1, 1], [], []>} : vector<64x64xbf16>, vector<64x64xbf16>, vector<64x64xf32> -> vector<64x64xf32>
    %177 = arith.addf %170, %176 : vector<64x64xf32>
    %c0_161 = arith.constant 0 : index
    %c1_162 = arith.constant 1 : index
    %c7_163 = arith.constant 7 : index
    %c0_164 = arith.constant 0 : index
    %178 = vector.load %arg14[%c0_161, %c1_162, %c7_163, %c0_164] : memref<2x5x18x64xf32, #tpu.memory_space<vmem>>, vector<2x4x8x64xf32>
    %179 = vector.shape_cast %178 : vector<2x4x8x64xf32> to vector<64x64xf32>
    %180 = arith.truncf %179 : vector<64x64xf32> to vector<64x64xbf16>
    %c16 = arith.constant 16 : index
    %c0_165 = arith.constant 0 : index
    %c0_166 = arith.constant 0 : index
    %181 = vector.load %arg6[%c16, %c0_165, %c0_166] : memref<25x64x64xbf16, #tpu.memory_space<vmem>>, vector<1x64x64xbf16>
    %182 = vector.shape_cast %181 : vector<1x64x64xbf16> to vector<64x64xbf16>
    %cst_167 = arith.constant dense<0.000000e+00> : vector<64x64xf32>
    %183 = tpu.matmul %180, %182, %cst_167 {dimension_numbers = #tpu.dot_dimension_numbers<[1], [0], [0], [1], [0, 0, 1, 1], [], []>} : vector<64x64xbf16>, vector<64x64xbf16>, vector<64x64xf32> -> vector<64x64xf32>
    %184 = arith.addf %177, %183 : vector<64x64xf32>
    %c0_168 = arith.constant 0 : index
    %c1_169 = arith.constant 1 : index
    %c8_170 = arith.constant 8 : index
    %c0_171 = arith.constant 0 : index
    %185 = vector.load %arg14[%c0_168, %c1_169, %c8_170, %c0_171] : memref<2x5x18x64xf32, #tpu.memory_space<vmem>>, vector<2x4x8x64xf32>
    %186 = vector.shape_cast %185 : vector<2x4x8x64xf32> to vector<64x64xf32>
    %187 = arith.truncf %186 : vector<64x64xf32> to vector<64x64xbf16>
    %c17 = arith.constant 17 : index
    %c0_172 = arith.constant 0 : index
    %c0_173 = arith.constant 0 : index
    %188 = vector.load %arg6[%c17, %c0_172, %c0_173] : memref<25x64x64xbf16, #tpu.memory_space<vmem>>, vector<1x64x64xbf16>
    %189 = vector.shape_cast %188 : vector<1x64x64xbf16> to vector<64x64xbf16>
    %cst_174 = arith.constant dense<0.000000e+00> : vector<64x64xf32>
    %190 = tpu.matmul %187, %189, %cst_174 {dimension_numbers = #tpu.dot_dimension_numbers<[1], [0], [0], [1], [0, 0, 1, 1], [], []>} : vector<64x64xbf16>, vector<64x64xbf16>, vector<64x64xf32> -> vector<64x64xf32>
    %191 = arith.addf %184, %190 : vector<64x64xf32>
    %c0_175 = arith.constant 0 : index
    %c1_176 = arith.constant 1 : index
    %c9_177 = arith.constant 9 : index
    %c0_178 = arith.constant 0 : index
    %192 = vector.load %arg14[%c0_175, %c1_176, %c9_177, %c0_178] : memref<2x5x18x64xf32, #tpu.memory_space<vmem>>, vector<2x4x8x64xf32>
    %193 = vector.shape_cast %192 : vector<2x4x8x64xf32> to vector<64x64xf32>
    %194 = arith.truncf %193 : vector<64x64xf32> to vector<64x64xbf16>
    %c18 = arith.constant 18 : index
    %c0_179 = arith.constant 0 : index
    %c0_180 = arith.constant 0 : index
    %195 = vector.load %arg6[%c18, %c0_179, %c0_180] : memref<25x64x64xbf16, #tpu.memory_space<vmem>>, vector<1x64x64xbf16>
    %196 = vector.shape_cast %195 : vector<1x64x64xbf16> to vector<64x64xbf16>
    %cst_181 = arith.constant dense<0.000000e+00> : vector<64x64xf32>
    %197 = tpu.matmul %194, %196, %cst_181 {dimension_numbers = #tpu.dot_dimension_numbers<[1], [0], [0], [1], [0, 0, 1, 1], [], []>} : vector<64x64xbf16>, vector<64x64xbf16>, vector<64x64xf32> -> vector<64x64xf32>
    %198 = arith.addf %191, %197 : vector<64x64xf32>
    %c0_182 = arith.constant 0 : index
    %c1_183 = arith.constant 1 : index
    %c10_184 = arith.constant 10 : index
    %c0_185 = arith.constant 0 : index
    %199 = vector.load %arg14[%c0_182, %c1_183, %c10_184, %c0_185] : memref<2x5x18x64xf32, #tpu.memory_space<vmem>>, vector<2x4x8x64xf32>
    %200 = vector.shape_cast %199 : vector<2x4x8x64xf32> to vector<64x64xf32>
    %201 = arith.truncf %200 : vector<64x64xf32> to vector<64x64xbf16>
    %c19 = arith.constant 19 : index
    %c0_186 = arith.constant 0 : index
    %c0_187 = arith.constant 0 : index
    %202 = vector.load %arg6[%c19, %c0_186, %c0_187] : memref<25x64x64xbf16, #tpu.memory_space<vmem>>, vector<1x64x64xbf16>
    %203 = vector.shape_cast %202 : vector<1x64x64xbf16> to vector<64x64xbf16>
    %cst_188 = arith.constant dense<0.000000e+00> : vector<64x64xf32>
    %204 = tpu.matmul %201, %203, %cst_188 {dimension_numbers = #tpu.dot_dimension_numbers<[1], [0], [0], [1], [0, 0, 1, 1], [], []>} : vector<64x64xbf16>, vector<64x64xbf16>, vector<64x64xf32> -> vector<64x64xf32>
    %205 = arith.addf %198, %204 : vector<64x64xf32>
    %c0_189 = arith.constant 0 : index
    %c2_190 = arith.constant 2 : index
    %c6_191 = arith.constant 6 : index
    %c0_192 = arith.constant 0 : index
    %206 = vector.load %arg13[%c0_189, %c2_190, %c6_191, %c0_192] : memref<2x6x18x64xf32, #tpu.memory_space<vmem>>, vector<2x4x8x64xf32>
    %207 = vector.shape_cast %206 : vector<2x4x8x64xf32> to vector<64x64xf32>
    %208 = arith.truncf %207 : vector<64x64xf32> to vector<64x64xbf16>
    %c20 = arith.constant 20 : index
    %c0_193 = arith.constant 0 : index
    %c0_194 = arith.constant 0 : index
    %209 = vector.load %arg6[%c20, %c0_193, %c0_194] : memref<25x64x64xbf16, #tpu.memory_space<vmem>>, vector<1x64x64xbf16>
    %210 = vector.shape_cast %209 : vector<1x64x64xbf16> to vector<64x64xbf16>
    %cst_195 = arith.constant dense<0.000000e+00> : vector<64x64xf32>
    %211 = tpu.matmul %208, %210, %cst_195 {dimension_numbers = #tpu.dot_dimension_numbers<[1], [0], [0], [1], [0, 0, 1, 1], [], []>} : vector<64x64xbf16>, vector<64x64xbf16>, vector<64x64xf32> -> vector<64x64xf32>
    %212 = arith.addf %205, %211 : vector<64x64xf32>
    %c0_196 = arith.constant 0 : index
    %c2_197 = arith.constant 2 : index
    %c7_198 = arith.constant 7 : index
    %c0_199 = arith.constant 0 : index
    %213 = vector.load %arg13[%c0_196, %c2_197, %c7_198, %c0_199] : memref<2x6x18x64xf32, #tpu.memory_space<vmem>>, vector<2x4x8x64xf32>
    %214 = vector.shape_cast %213 : vector<2x4x8x64xf32> to vector<64x64xf32>
    %215 = arith.truncf %214 : vector<64x64xf32> to vector<64x64xbf16>
    %c21 = arith.constant 21 : index
    %c0_200 = arith.constant 0 : index
    %c0_201 = arith.constant 0 : index
    %216 = vector.load %arg6[%c21, %c0_200, %c0_201] : memref<25x64x64xbf16, #tpu.memory_space<vmem>>, vector<1x64x64xbf16>
    %217 = vector.shape_cast %216 : vector<1x64x64xbf16> to vector<64x64xbf16>
    %cst_202 = arith.constant dense<0.000000e+00> : vector<64x64xf32>
    %218 = tpu.matmul %215, %217, %cst_202 {dimension_numbers = #tpu.dot_dimension_numbers<[1], [0], [0], [1], [0, 0, 1, 1], [], []>} : vector<64x64xbf16>, vector<64x64xbf16>, vector<64x64xf32> -> vector<64x64xf32>
    %219 = arith.addf %212, %218 : vector<64x64xf32>
    %c0_203 = arith.constant 0 : index
    %c2_204 = arith.constant 2 : index
    %c8_205 = arith.constant 8 : index
    %c0_206 = arith.constant 0 : index
    %220 = vector.load %arg13[%c0_203, %c2_204, %c8_205, %c0_206] : memref<2x6x18x64xf32, #tpu.memory_space<vmem>>, vector<2x4x8x64xf32>
    %221 = vector.shape_cast %220 : vector<2x4x8x64xf32> to vector<64x64xf32>
    %222 = arith.truncf %221 : vector<64x64xf32> to vector<64x64xbf16>
    %c22 = arith.constant 22 : index
    %c0_207 = arith.constant 0 : index
    %c0_208 = arith.constant 0 : index
    %223 = vector.load %arg6[%c22, %c0_207, %c0_208] : memref<25x64x64xbf16, #tpu.memory_space<vmem>>, vector<1x64x64xbf16>
    %224 = vector.shape_cast %223 : vector<1x64x64xbf16> to vector<64x64xbf16>
    %cst_209 = arith.constant dense<0.000000e+00> : vector<64x64xf32>
    %225 = tpu.matmul %222, %224, %cst_209 {dimension_numbers = #tpu.dot_dimension_numbers<[1], [0], [0], [1], [0, 0, 1, 1], [], []>} : vector<64x64xbf16>, vector<64x64xbf16>, vector<64x64xf32> -> vector<64x64xf32>
    %226 = arith.addf %219, %225 : vector<64x64xf32>
    %c0_210 = arith.constant 0 : index
    %c2_211 = arith.constant 2 : index
    %c9_212 = arith.constant 9 : index
    %c0_213 = arith.constant 0 : index
    %227 = vector.load %arg13[%c0_210, %c2_211, %c9_212, %c0_213] : memref<2x6x18x64xf32, #tpu.memory_space<vmem>>, vector<2x4x8x64xf32>
    %228 = vector.shape_cast %227 : vector<2x4x8x64xf32> to vector<64x64xf32>
    %229 = arith.truncf %228 : vector<64x64xf32> to vector<64x64xbf16>
    %c23 = arith.constant 23 : index
    %c0_214 = arith.constant 0 : index
    %c0_215 = arith.constant 0 : index
    %230 = vector.load %arg6[%c23, %c0_214, %c0_215] : memref<25x64x64xbf16, #tpu.memory_space<vmem>>, vector<1x64x64xbf16>
    %231 = vector.shape_cast %230 : vector<1x64x64xbf16> to vector<64x64xbf16>
    %cst_216 = arith.constant dense<0.000000e+00> : vector<64x64xf32>
    %232 = tpu.matmul %229, %231, %cst_216 {dimension_numbers = #tpu.dot_dimension_numbers<[1], [0], [0], [1], [0, 0, 1, 1], [], []>} : vector<64x64xbf16>, vector<64x64xbf16>, vector<64x64xf32> -> vector<64x64xf32>
    %233 = arith.addf %226, %232 : vector<64x64xf32>
    %c0_217 = arith.constant 0 : index
    %c2_218 = arith.constant 2 : index
    %c10_219 = arith.constant 10 : index
    %c0_220 = arith.constant 0 : index
    %234 = vector.load %arg13[%c0_217, %c2_218, %c10_219, %c0_220] : memref<2x6x18x64xf32, #tpu.memory_space<vmem>>, vector<2x4x8x64xf32>
    %235 = vector.shape_cast %234 : vector<2x4x8x64xf32> to vector<64x64xf32>
    %236 = arith.truncf %235 : vector<64x64xf32> to vector<64x64xbf16>
    %c24 = arith.constant 24 : index
    %c0_221 = arith.constant 0 : index
    %c0_222 = arith.constant 0 : index
    %237 = vector.load %arg6[%c24, %c0_221, %c0_222] : memref<25x64x64xbf16, #tpu.memory_space<vmem>>, vector<1x64x64xbf16>
    %238 = vector.shape_cast %237 : vector<1x64x64xbf16> to vector<64x64xbf16>
    %cst_223 = arith.constant dense<0.000000e+00> : vector<64x64xf32>
    %239 = tpu.matmul %236, %238, %cst_223 {dimension_numbers = #tpu.dot_dimension_numbers<[1], [0], [0], [1], [0, 0, 1, 1], [], []>} : vector<64x64xbf16>, vector<64x64xbf16>, vector<64x64xf32> -> vector<64x64xf32>
    %240 = arith.addf %233, %239 : vector<64x64xf32>
    %c0_224 = arith.constant 0 : index
    %c0_225 = arith.constant 0 : index
    %241 = vector.load %arg7[%c0_224, %c0_225] : memref<1x64xf32, #tpu.memory_space<vmem>>, vector<1x64xf32>
    %242 = vector.broadcast %241 : vector<1x64xf32> to vector<64x64xf32>
    %243 = arith.addf %240, %242 : vector<64x64xf32>
    %cst_226 = arith.constant dense<0.000000e+00> : vector<64xf32>
    %244 = vector.multi_reduction <add>, %243, %cst_226 [0] : vector<64x64xf32> to vector<64xf32>
    %245 = vector.shape_cast %244 : vector<64xf32> to vector<1x64xf32>
    %cst_227 = arith.constant 6.400000e+01 : f32
    %246 = vector.broadcast %cst_227 : f32 to vector<1x64xf32>
    %247 = arith.divf %245, %246 : vector<1x64xf32>
    %248 = vector.broadcast %247 : vector<1x64xf32> to vector<64x64xf32>
    %249 = arith.subf %243, %248 : vector<64x64xf32>
    %250 = arith.mulf %249, %249 : vector<64x64xf32>
    %cst_228 = arith.constant dense<0.000000e+00> : vector<64xf32>
    %251 = vector.multi_reduction <add>, %250, %cst_228 [0] : vector<64x64xf32> to vector<64xf32>
    %252 = vector.shape_cast %251 : vector<64xf32> to vector<1x64xf32>
    %cst_229 = arith.constant 6.400000e+01 : f32
    %253 = vector.broadcast %cst_229 : f32 to vector<1x64xf32>
    %254 = arith.divf %252, %253 : vector<1x64xf32>
    %c0_230 = arith.constant 0 : index
    %c0_231 = arith.constant 0 : index
    %255 = vector.load %arg8[%c0_230, %c0_231] : memref<1x64xf32, #tpu.memory_space<vmem>>, vector<1x64xf32>
    %cst_232 = arith.constant 9.99999974E-6 : f32
    %256 = vector.broadcast %cst_232 : f32 to vector<1x64xf32>
    %257 = arith.addf %254, %256 : vector<1x64xf32>
    %258 = math.rsqrt %257 : vector<1x64xf32>
    %259 = arith.mulf %255, %258 : vector<1x64xf32>
    %260 = vector.broadcast %259 : vector<1x64xf32> to vector<64x64xf32>
    %261 = arith.mulf %249, %260 : vector<64x64xf32>
    %c0_233 = arith.constant 0 : index
    %c0_234 = arith.constant 0 : index
    %262 = vector.load %arg9[%c0_233, %c0_234] : memref<1x64xf32, #tpu.memory_space<vmem>>, vector<1x64xf32>
    %263 = vector.broadcast %262 : vector<1x64xf32> to vector<64x64xf32>
    %264 = arith.addf %261, %263 : vector<64x64xf32>
    %cst_235 = arith.constant 0.000000e+00 : f32
    %265 = vector.broadcast %cst_235 : f32 to vector<64x64xf32>
    %266 = arith.cmpf ogt, %264, %265 : vector<64x64xf32>
    %cst_236 = arith.constant 2.000000e-01 : f32
    %267 = vector.broadcast %cst_236 : f32 to vector<64x64xf32>
    %268 = arith.mulf %267, %264 : vector<64x64xf32>
    %269 = arith.select %266, %264, %268 : vector<64x64xi1>, vector<64x64xf32>
    %270 = vector.shape_cast %269 : vector<64x64xf32> to vector<2x32x64xf32>
    %c0_237 = arith.constant 0 : index
    %c0_238 = arith.constant 0 : index
    %271 = vector.load %arg10[%c0_237, %c0_238] : memref<32x64xf32, #tpu.memory_space<vmem>>, vector<32x64xf32>
    %272 = vector.shape_cast %271 : vector<32x64xf32> to vector<1x32x64xf32>
    %273 = vector.broadcast %272 : vector<1x32x64xf32> to vector<2x32x64xf32>
    %274 = arith.mulf %270, %273 : vector<2x32x64xf32>
    %cst_239 = arith.constant dense<0.000000e+00> : vector<2x64xf32>
    %275 = vector.multi_reduction <add>, %274, %cst_239 [1] : vector<2x32x64xf32> to vector<2x64xf32>
    %cst_240 = arith.constant dense<0.000000e+00> : vector<2xf32>
    %276 = vector.multi_reduction <add>, %275, %cst_240 [1] : vector<2x64xf32> to vector<2xf32>
    %277 = vector.shape_cast %276 : vector<2xf32> to vector<2x1xf32>
    %c0_241 = arith.constant 0 : index
    %c0_242 = arith.constant 0 : index
    %278 = vector.load %arg11[%c0_241, %c0_242] : memref<1x1xf32, #tpu.memory_space<vmem>>, vector<1x1xf32>
    %279 = vector.broadcast %278 : vector<1x1xf32> to vector<2x1xf32>
    %280 = arith.addf %277, %279 : vector<2x1xf32>
    %281 = arith.negf %280 : vector<2x1xf32>
    %282 = math.exp %281 : vector<2x1xf32>
    %cst_243 = arith.constant 1.000000e+00 : f32
    %283 = vector.broadcast %cst_243 : f32 to vector<2x1xf32>
    %284 = arith.addf %283, %282 : vector<2x1xf32>
    %285 = arith.divf %283, %284 : vector<2x1xf32>
    %c0_244 = arith.constant 0 : index
    %c0_245 = arith.constant 0 : index
    %286 = vector.load %arg12[%c0_244, %c0_245] : memref<2x1xf32, #tpu.memory_space<vmem>>, vector<2x1xf32>
    tpu.vector_store %arg12[%c0_244, %c0_245], %285 {strides = array<i32>} : memref<2x1xf32, #tpu.memory_space<vmem>>, vector<2x1xf32>,
    return
  }
}

</mosaic_0001>

<bundles_post_ra>
// kernel: discriminator_forward.1
= control target key start
LH: loop header
LB: loop body
LE: loop exit
PB: predicated region body
PF: predicated region fallthrough
CT: control target
= control target key end

     0   :  { %vm104_vm0 = vcmask 1043456   ;;  %vm105_vm1 = vcmask 1044480   ;;  %v3947_v2 = vmov 65535   ;;  %vm91_vm2 = vcmask 203776   ;;  %s5542_s2 = inlined_call_operand.vmem [shape: bf16[25,64], index: 2, kind: input, shape index: {}]   ;;  %s5543_s3 = inlined_call_operand.vmem [shape: f32[1,64], index: 3, kind: input, shape index: {}]   ;;  %s5544_s0 = inlined_call_operand.vmem [shape: bf16[64,25], index: 0, kind: input, shape index: {}]   ;;  %s5545_s1 = inlined_call_operand.vmem [shape: bf16[64,25], index: 1, kind: input, shape index: {}]   ;;  %s5546_s5 = inlined_call_operand.vmem [shape: f32[1,64], index: 5, kind: input, shape index: {}]   ;;  %s5547_s4 = inlined_call_operand.vmem [shape: f32[1,64], index: 4, kind: input, shape index: {}]   ;;  %s5548_s6 = inlined_call_operand.vmem [shape: bf16[25,64,64], index: 6, kind: input, shape index: {}]   ;;  %s5549_s7 = inlined_call_operand.vmem [shape: f32[1,64], index: 7, kind: input, shape index: {}]   ;;  %s5550_s9 = inlined_call_operand.vmem [shape: f32[1,64], index: 9, kind: input, shape index: {}]   ;;  %s5551_s8 = inlined_call_operand.vmem [shape: f32[1,64], index: 8, kind: input, shape index: {}]   ;;  %s5552_s10 = inlined_call_operand.vmem [shape: f32[32,64], index: 10, kind: input, shape index: {}]   ;;  %s5553_s11 = inlined_call_operand.<no memory space> [shape: f32[1,1], index: 11, kind: input, shape index: {}]   ;;  %s5554_s12 = inlined_call_operand.vmem [shape: f32[2,1], index: 12, kind: output, shape index: {}]  }
   0x1   :  { %v3093_v0 = vld [vmem:[%s5542_s2 + $0x8] sm:$0xf]  ;;  %v3817_v1 = vld [vmem:[%s5542_s2 + $0x8] sm:$0x10]  ;;  %v106_v3 = vsel %vm104_vm0, 4294967295, %v3947_v2  ;;  %v3816_v7 = vld [vmem:[%s5542_s2] sm:$0xff] }
   0x2   :  { %v3094_v4 = vor.u32 %v3817_v1, %v3093_v0  ;;  %v107_v5 = vsel %vm105_vm1, %v106_v3, 0  ;;  %v3812_v8 = vld [vmem:[%s5544_s0] sm:$0xff]  ;;  %v3813_v10 = vld [vmem:[%s5544_s0 + $0x8] sm:$0xff]  ;;  %v3814_v12 = vld [vmem:[%s5544_s0 + $0x10] sm:$0xff]  ;;  %vm209_vm3 = vcmask 523264   ;;  %v3948_v49 = vmov 128.0  }
   0x3   :  { %v3818_v9 = vld [vmem:[%s5545_s1] sm:$0xff]  ;;  %v3819_v11 = vld [vmem:[%s5545_s1 + $0x8] sm:$0xff]  ;;  %v3820_v13 = vld [vmem:[%s5545_s1 + $0x10] sm:$0xff]  ;;  %3935 = vrcp.f32 %v3948_v49 }
   0x4   :  { %v109_v6 = vand.u32 %v3094_v4, %v107_v5  ;;  %v3815_v14 = vld [vmem:[%s5544_s0 + $0x18] sm:$0xff]  ;;  %v3930_v26 = vld [vmem:[%s5543_s3] ss:$0 sm:$0xff] }
   0x5   :  { %v3821_v15 = vld [vmem:[%s5545_s1 + $0x18] sm:$0xff] }
   0x6   :  { %117 = vmatpush.bf16.msra.mxu0 %v109_v6  ;;  %186 = vmatpush.bf16.msra.mxu1 %v109_v6 }
   0x9   :  { %v3936_v0 = vpop.eup %3935 }
   0xa   :  { %118 = vmatpush.bf16.msra.mxu0 %v3816_v7  ;;  %187 = vmatpush.bf16.msra.mxu1 %v3816_v7  ;;  %vm258_vm4 = vweird.f32 %v3936_v0 }
   0xd   :  { %3095 = vmatmul.msk.bf16.vlgmr.msra.gmra.mxu0 %vm91_vm2, %v3812_v8  ;;  %3115 = vmatmul.msk.bf16.vlgmr.msra.gmra.mxu1 %vm91_vm2, %v3818_v9 }
  0x1d   :  { %3096 = vmatmul.msk.bf16.gmra.mxu0 %vm91_vm2, %v3813_v10  ;;  %3116 = vmatmul.msk.bf16.gmra.mxu1 %vm91_vm2, %v3819_v11  ;;  %v254_v11 = vmul.f32 128.0, %v3936_v0 }
  0x2d   :  { %3097 = vmatmul.msk.bf16.gmra.mxu0 %vm91_vm2, %v3814_v12  ;;  %3117 = vmatmul.msk.bf16.gmra.mxu1 %vm91_vm2, %v3820_v13 }
  0x3d   :  { %3098 = vmatmul.msk.bf16.gmra.mxu0 %vm91_vm2, %v3815_v14  ;;  %3118 = vmatmul.msk.bf16.gmra.mxu1 %vm91_vm2, %v3821_v15 }
  0x8a   :  { %v120_v16 = vpop.f32.mrf.mxu0  ;;  %v189_v17 = vpop.f32.mrf.mxu1 }
  0x8b   :  { %v4056_v31 = vadd.f32 %v3930_v26, %v120_v16  ;;  %v4058_v32 = vadd.f32 %v3930_v26, %v189_v17 }
  0x8d   :  { %v210_v39 = vsel %vm209_vm3, %v4056_v31, 0.0  ;;  %v231_v40 = vsel %vm209_vm3, %v4058_v32, 0.0 }
  0x92   :  { %v122_v18 = vpop.f32.mrf.mxu0  ;;  %v191_v19 = vpop.f32.mrf.mxu1 }
  0x93   :  { %v4052_v27 = vadd.f32 %v3930_v26, %v122_v18  ;;  %v4054_v30 = vadd.f32 %v3930_v26, %v191_v19  ;;  %v255_v18 = vsub.f32 1.0, %v254_v11 }
  0x95   :  { %v211_v35 = vsel %vm209_vm3, %v4052_v27, 0.0  ;;  %v232_v36 = vsel %vm209_vm3, %v4054_v30, 0.0 }
  0x96   :  { %v212_v45 = vadd.f32 %v211_v35, %v210_v39  ;;  %v233_v46 = vadd.f32 %v232_v36, %v231_v40 }
  0x9a   :  { %v125_v20 = vpop.f32.mrf.mxu0  ;;  %v194_v21 = vpop.f32.mrf.mxu1 }
  0x9b   :  { %v4060_v33 = vadd.f32 %v3930_v26, %v125_v20  ;;  %v4062_v34 = vadd.f32 %v3930_v26, %v194_v21 }
  0x9d   :  { %v213_v41 = vsel %vm209_vm3, %v4060_v33, 0.0  ;;  %v234_v42 = vsel %vm209_vm3, %v4062_v34, 0.0 }
  0x9e   :  { %v214_v54 = vadd.f32 %v213_v41, %v212_v45  ;;  %v235_v55 = vadd.f32 %v234_v42, %v233_v46 }
  0xa2   :  { %v127_v22 = vpop.f32.mrf.mxu0  ;;  %v196_v23 = vpop.f32.mrf.mxu1 }
  0xa3   :  { %v4068_v37 = vadd.f32 %v3930_v26, %v127_v22  ;;  %v4070_v38 = vadd.f32 %v3930_v26, %v196_v23  ;;  %v256_v23 = vmul.f32 %v3936_v0, %v255_v18 }
  0xa5   :  { %v215_v50 = vsel %vm209_vm3, %v4068_v37, 0.0  ;;  %v236_v51 = vsel %vm209_vm3, %v4070_v38, 0.0 }
  0xa6   :  { %v216_v60 = vadd.f32 %v215_v50, %v214_v54  ;;  %v237_v61 = vadd.f32 %v236_v51, %v235_v55 }
  0xaa   :  { %v130_v24 = vpop.f32.mrf.mxu0  ;;  %v199_v25 = vpop.f32.mrf.mxu1 }
  0xab   :  { %v4080_v43 = vadd.f32 %v3930_v26, %v130_v24  ;;  %v4082_v44 = vadd.f32 %v3930_v26, %v199_v25 }
  0xad   :  { %v217_v56 = vsel %vm209_vm3, %v4080_v43, 0.0  ;;  %v238_v57 = vsel %vm209_vm3, %v4082_v44, 0.0 }
  0xae   :  { %v218_v1 = vadd.f32 %v217_v56, %v216_v60  ;;  %v239_v2 = vadd.f32 %v238_v57, %v237_v61 }
  0xb2   :  { %v132_v28 = vpop.f32.mrf.mxu0  ;;  %v201_v29 = vpop.f32.mrf.mxu1 }
  0xb3   :  { %v133_v52 = vadd.f32 %v3930_v26, %v132_v28  ;;  %v4088_v53 = vadd.f32 %v3930_v26, %v201_v29  ;;  %v257_v29 = vadd.f32 %v3936_v0, %v256_v23 }
  0xb5   :  { %v219_v62 = vsel %vm209_vm3, %v133_v52, 0.0  ;;  %v240_v63 = vsel %vm209_vm3, %v4088_v53, 0.0  ;;  %v4107_v41 = vsel %vm258_vm4, %v3936_v0, %v257_v29 }
  0xb6   :  { %v220_v5 = vadd.f32 %v219_v62, %v218_v1  ;;  %v241_v6 = vadd.f32 %v240_v63, %v239_v2 }
  0xba   :  { %v135_v47 = vpop.f32.mrf.mxu0  ;;  %v204_v48 = vpop.f32.mrf.mxu1 }
  0xbb   :  { %v136_v58 = vadd.f32 %v3930_v26, %v135_v47  ;;  %v4094_v59 = vadd.f32 %v3930_v26, %v204_v48 }
  0xbd   :  { %v221_v3 = vsel %vm209_vm3, %v136_v58, 0.0  ;;  %v242_v4 = vsel %vm209_vm3, %v4094_v59, 0.0 }
  0xbe   :  { %v222_v12 = vadd.f32 %v221_v3, %v220_v5  ;;  %v243_v13 = vadd.f32 %v242_v4, %v241_v6 }
  0xc2   :  { %v137_v7 = vpop.f32.mrf.mxu0  ;;  %v206_v8 = vpop.f32.mrf.mxu1 }
  0xc3   :  { %v138_v9 = vadd.f32 %v3930_v26, %v137_v7  ;;  %v4102_v10 = vadd.f32 %v3930_v26, %v206_v8 }
  0xc5   :  { %v223_v14 = vsel %vm209_vm3, %v138_v9, 0.0  ;;  %v244_v15 = vsel %vm209_vm3, %v4102_v10, 0.0 }
  0xc6   :  { %v224_v16 = vadd.f32 %v223_v14, %v222_v12  ;;  %v245_v17 = vadd.f32 %v244_v15, %v243_v13 }
  0xc8   :  { %v225_v19 = vrot.slane %v224_v16, 4  ;;  %v246_v20 = vrot.slane %v245_v17, 4 }
  0xca   :  { %v226_v21 = vadd.f32 %v225_v19, %v224_v16  ;;  %v247_v22 = vadd.f32 %v246_v20, %v245_v17 }
  0xcc   :  { %v227_v24 = vrot.slane %v226_v21, 2  ;;  %v248_v25 = vrot.slane %v247_v22, 2 }
  0xce   :  { %v228_v26 = vadd.f32 %v227_v24, %v226_v21  ;;  %v249_v28 = vadd.f32 %v248_v25, %v247_v22 }
  0xd0   :  { %v229_v35 = vrot.slane %v228_v26, 1  ;;  %v250_v36 = vrot.slane %v249_v28, 1 }
  0xd2   :  { %v230_v39 = vadd.f32 %v229_v35, %v228_v26  ;;  %v251_v40 = vadd.f32 %v250_v36, %v249_v28 }
  0xd4   :  { %v252_v42 = vadd.f32 %v251_v40, %v230_v39 }
  0xd6   :  { %v260_v45 = vmul.f32 %v4107_v41, %v252_v42 }
  0xd8   :  { %v4111_v46 = vsub.f32 %v4056_v31, %v260_v45  ;;  %v4114_v47 = vsub.f32 %v4052_v27, %v260_v45  ;;  %v4117_v48 = vsub.f32 %v4060_v33, %v260_v45  ;;  %v4120_v49 = vsub.f32 %v4068_v37, %v260_v45 }
  0xd9   :  { %v4123_v50 = vsub.f32 %v4080_v43, %v260_v45  ;;  %v4126_v51 = vsub.f32 %v4058_v32, %v260_v45  ;;  %v4129_v54 = vsub.f32 %v4054_v30, %v260_v45  ;;  %v4132_v31 = vsub.f32 %v4062_v34, %v260_v45 }
  0xda   :  { %v277_v27 = vmul.f32 %v4111_v46, %v4111_v46  ;;  %v278_v33 = vmul.f32 %v4114_v47, %v4114_v47  ;;  %v279_v37 = vmul.f32 %v4117_v48, %v4117_v48  ;;  %v4140_v43 = vsub.f32 %v133_v52, %v260_v45 }
  0xdb   :  { %v4143_v32 = vsub.f32 %v4070_v38, %v260_v45  ;;  %v280_v30 = vmul.f32 %v4120_v49, %v4120_v49  ;;  %v4149_v56 = vsub.f32 %v136_v58, %v260_v45  ;;  %v4152_v57 = vsub.f32 %v4082_v44, %v260_v45 }
  0xdc   :  { %v285_v34 = vsel %vm209_vm3, %v277_v27, 0.0  ;;  %v286_v55 = vsel %vm209_vm3, %v278_v33, 0.0  ;;  %v281_v60 = vmul.f32 %v4123_v50, %v4123_v50  ;;  %v288_v61 = vsel %vm209_vm3, %v279_v37, 0.0 }
  0xdd   :  { %v287_v52 = vadd.f32 %v286_v55, %v285_v34  ;;  %v306_v38 = vmul.f32 %v4126_v51, %v4126_v51  ;;  %v307_v62 = vmul.f32 %v4129_v54, %v4129_v54  ;;  %v308_v63 = vmul.f32 %v4132_v31, %v4132_v31 }
  0xde   :  { %v4163_v58 = vsub.f32 %v138_v9, %v260_v45  ;;  %v4166_v44 = vsub.f32 %v4088_v53, %v260_v45  ;;  %v282_v0 = vmul.f32 %v4140_v43, %v4140_v43  ;;  %v290_v2 = vsel %vm209_vm3, %v280_v30, 0.0 }
  0xdf   :  { %v289_v1 = vadd.f32 %v288_v61, %v287_v52  ;;  %v309_v3 = vmul.f32 %v4143_v32, %v4143_v32  ;;  %v314_v4 = vsel %vm209_vm3, %v306_v38, 0.0  ;;  %v315_v5 = vsel %vm209_vm3, %v307_v62, 0.0 }
  0xe0   :  { %v4176_v6 = vsub.f32 %v4094_v59, %v260_v45  ;;  %v316_v8 = vadd.f32 %v315_v5, %v314_v4  ;;  %v283_v53 = vmul.f32 %v4149_v56, %v4149_v56  ;;  %v292_v9 = vsel %vm209_vm3, %v281_v60, 0.0 }
  0xe1   :  { %v291_v7 = vadd.f32 %v290_v2, %v289_v1  ;;  %v310_v11 = vmul.f32 %v4152_v57, %v4152_v57  ;;  %v317_v12 = vsel %vm209_vm3, %v308_v63, 0.0  ;;  %v4185_v13 = vsub.f32 %v4102_v10, %v260_v45 }
  0xe2   :  { %v318_v15 = vadd.f32 %v317_v12, %v316_v8  ;;  %v284_v59 = vmul.f32 %v4163_v58, %v4163_v58  ;;  %v294_v16 = vsel %vm209_vm3, %v282_v0, 0.0  ;;  %v311_v17 = vmul.f32 %v4166_v44, %v4166_v44  ;;  %v337_v8 = vld [vmem:[%s5547_s4] sm:$0x1] }
  0xe3   :  { %v293_v14 = vadd.f32 %v292_v9, %v291_v7  ;;  %v319_v18 = vsel %vm209_vm3, %v309_v3, 0.0  ;;  %v296_v21 = vsel %vm209_vm3, %v283_v53, 0.0  ;;  %v312_v10 = vmul.f32 %v4176_v6, %v4176_v6 }
  0xe4   :  { %v320_v20 = vadd.f32 %v319_v18, %v318_v15  ;;  %v321_v22 = vsel %vm209_vm3, %v310_v11, 0.0  ;;  %v298_v25 = vsel %vm209_vm3, %v284_v59, 0.0  ;;  %v313_v26 = vmul.f32 %v4185_v13, %v4185_v13 }
  0xe5   :  { %v295_v19 = vadd.f32 %v294_v16, %v293_v14  ;;  %v323_v28 = vsel %vm209_vm3, %v311_v17, 0.0  ;;  %v325_v36 = vsel %vm209_vm3, %v312_v10, 0.0  ;;  %v3949_v2 = vmov 0.0  }
  0xe6   :  { %v322_v24 = vadd.f32 %v321_v22, %v320_v20  ;;  %v327_v42 = vsel %vm209_vm3, %v313_v26, 0.0  ;;  %478 = vst.msk [vmem:[#allocation3 + $0x20] sm:$0xff] %vm209_vm3, %v3949_v2 }
  0xe7   :  { %v297_v23 = vadd.f32 %v296_v21, %v295_v19  ;;  %481 = vst.msk [vmem:[#allocation3 + $0x38] sm:$0xff] %vm209_vm3, %v3949_v2 }
  0xe8   :  { %v324_v35 = vadd.f32 %v323_v28, %v322_v24  ;;  %484 = vst.msk [vmem:[#allocation3 + $0x50] sm:$0xff] %vm209_vm3, %v3949_v2  ;;  %v3836_v24 = vld [vmem:[%s5548_s6 + $0x70] sm:$0xff]  ;;  %v3827_v28 = vld [vmem:[%s5548_s6 + $0x28] sm:$0xff] }
  0xe9   :  { %v299_v29 = vadd.f32 %v298_v25, %v297_v23  ;;  %487 = vst.msk [vmem:[#allocation3 + $0x68] sm:$0xff] %vm209_vm3, %v3949_v2  ;;  %v3832_v23 = vld [vmem:[%s5548_s6 + $0x50] sm:$0xff] }
  0xea   :  { %v326_v40 = vadd.f32 %v325_v36, %v324_v35  ;;  %493 = vst.msk [vmem:[#allocation3 + $0x98] sm:$0xff] %vm209_vm3, %v3949_v2  ;;  %v3835_v35 = vld [vmem:[%s5548_s6 + $0x68] sm:$0xff] }
  0xeb   :  { %v300_v39 = vrot.slane %v299_v29, 4  ;;  %496 = vst.msk [vmem:[#allocation3 + $0xb0] sm:$0xff] %vm209_vm3, %v3949_v2 }
  0xec   :  { %v328_v27 = vadd.f32 %v327_v42, %v326_v40  ;;  %499 = vst.msk [vmem:[#allocation3 + $0xc8] sm:$0xff] %vm209_vm3, %v3949_v2 }
  0xed   :  { %v301_v45 = vadd.f32 %v300_v39, %v299_v29  ;;  %502 = vst.msk [vmem:[#allocation3 + $0xe0] sm:$0xff] %vm209_vm3, %v3949_v2  ;;  %v3831_v29 = vld [vmem:[%s5548_s6 + $0x48] sm:$0xff] }
  0xee   :  { %v329_v37 = vrot.slane %v328_v27, 4  ;;  %437 = vst.msk [vmem:[#allocation2] sm:$0xff] %vm209_vm3, %v3949_v2 }
  0xef   :  { %v302_v33 = vrot.slane %v301_v45, 2  ;;  %438 = vst.msk [vmem:[#allocation2 + $0x8] sm:$0xff] %vm209_vm3, %v3949_v2 }
  0xf0   :  { %v330_v34 = vadd.f32 %v329_v37, %v328_v27  ;;  %441 = vst.msk [vmem:[#allocation2 + $0x18] sm:$0xff] %vm209_vm3, %v3949_v2 }
  0xf1   :  { %v303_v30 = vadd.f32 %v302_v33, %v301_v45  ;;  %442 = vst.msk [vmem:[#allocation2 + $0x20] sm:$0xff] %vm209_vm3, %v3949_v2 }
  0xf2   :  { %v331_v60 = vrot.slane %v330_v34, 2  ;;  %444 = vst.msk [vmem:[#allocation2 + $0x30] sm:$0xff] %vm209_vm3, %v3949_v2 }
  0xf3   :  { %v304_v55 = vrot.slane %v303_v30, 1  ;;  %445 = vst.msk [vmem:[#allocation2 + $0x38] sm:$0xff] %vm209_vm3, %v3949_v2 }
  0xf4   :  { %v332_v52 = vadd.f32 %v331_v60, %v330_v34  ;;  %447 = vst.msk [vmem:[#allocation2 + $0x48] sm:$0xff] %vm209_vm3, %v3949_v2 }
  0xf5   :  { %v305_v61 = vadd.f32 %v304_v55, %v303_v30  ;;  %448 = vst.msk [vmem:[#allocation2 + $0x50] sm:$0xff] %vm209_vm3, %v3949_v2 }
  0xf6   :  { %v333_v38 = vrot.slane %v332_v52, 1  ;;  %450 = vst.msk [vmem:[#allocation2 + $0x60] sm:$0xff] %vm209_vm3, %v3949_v2 }
  0xf7   :  { %451 = vst.msk [vmem:[#allocation2 + $0x68] sm:$0xff] %vm209_vm3, %v3949_v2 }
  0xf8   :  { %v334_v62 = vadd.f32 %v333_v38, %v332_v52  ;;  %453 = vst.msk [vmem:[#allocation2 + $0x78] sm:$0xff] %vm209_vm3, %v3949_v2 }
  0xf9   :  { %454 = vst.msk [vmem:[#allocation2 + $0x80] sm:$0xff] %vm209_vm3, %v3949_v2 }
  0xfa   :  { %v335_v63 = vadd.f32 %v334_v62, %v305_v61  ;;  %456 = vst.msk [vmem:[#allocation2 + $0x90] sm:$0xff] %vm209_vm3, %v3949_v2  ;;  %v3826_v61 = vld [vmem:[%s5548_s6 + $0x20] sm:$0xff] }
  0xfb   :  { %457 = vst.msk [vmem:[#allocation2 + $0x98] sm:$0xff] %vm209_vm3, %v3949_v2  ;;  %v3830_v62 = vld [vmem:[%s5548_s6 + $0x40] sm:$0xff] }
  0xfc   :  { %v336_v0 = vmul.f32 %v335_v63, %v4107_v41  ;;  %459 = vst.msk [vmem:[#allocation2 + $0xa8] sm:$0xff] %vm209_vm3, %v3949_v2  ;;  %v3834_v63 = vld [vmem:[%s5548_s6 + $0x60] sm:$0xff] }
  0xfd   :  { %460 = vst.msk [vmem:[#allocation2 + $0xb0] sm:$0xff] %vm209_vm3, %v3949_v2 }
  0xfe   :  { %v338_v1 = vadd.f32 1e-05, %v336_v0  ;;  %462 = vst.msk [vmem:[#allocation2 + $0xc0] sm:$0xff] %vm209_vm3, %v3949_v2 }
  0xff   :  { %463 = vst.msk [vmem:[#allocation2 + $0xc8] sm:$0xff] %vm209_vm3, %v3949_v2 }
 0x100   :  { %3937 = vrsqrt.f32 %v338_v1  ;;  %vm345_vm6 = vweird.f32 %v338_v1  ;;  %465 = vst.msk [vmem:[#allocation2 + $0xd8] sm:$0xff] %vm209_vm3, %v3949_v2 }
 0x101   :  { %466 = vst.msk [vmem:[#allocation2 + $0xe0] sm:$0xff] %vm209_vm3, %v3949_v2 }
 0x102   :  { %468 = vst.msk [vmem:[#allocation2 + $0xf0] sm:$0xff] %vm209_vm3, %v3949_v2 }
 0x103   :  { %469 = vst.msk [vmem:[#allocation2 + $0xf8] sm:$0xff] %vm209_vm3, %v3949_v2 }
 0x104   :  { %471 = vst.msk [vmem:[#allocation2 + $0x108] sm:$0xff] %vm209_vm3, %v3949_v2 }
 0x105   :  { %472 = vst.msk [vmem:[#allocation2 + $0x110] sm:$0xff] %vm209_vm3, %v3949_v2 }
 0x106   :  { %v3938_v3 = vpop.eup %3937  ;;  %474 = vst.msk [vmem:[#allocation3] sm:$0xff] %vm209_vm3, %v3949_v2 }
 0x107   :  { %v340_v4 = vmul.f32 %v3938_v3, %v338_v1  ;;  %vm346_vm5 = vweird.f32 %v3938_v3  ;;  %475 = vst.msk [vmem:[#allocation3 + $0x8] sm:$0xff] %vm209_vm3, %v3949_v2 }
 0x108   :  { %vm347_vm7 = vmor %vm345_vm6, %vm346_vm5  ;;  %477 = vst.msk [vmem:[#allocation3 + $0x18] sm:$0xff] %vm209_vm3, %v3949_v2  ;;  %vm439_vm5 = vcmask 517120  }
 0x109   :  { %v341_v5 = vmul.f32 %v3938_v3, %v340_v4  ;;  %480 = vst.msk [vmem:[#allocation3 + $0x30] sm:$0xff] %vm209_vm3, %v3949_v2 }
 0x10a   :  { %483 = vst.msk [vmem:[#allocation3 + $0x48] sm:$0xff] %vm209_vm3, %v3949_v2 }
 0x10b   :  { %v342_v41 = vmul.f32 0.5, %v341_v5  ;;  %486 = vst.msk [vmem:[#allocation3 + $0x60] sm:$0xff] %vm209_vm3, %v3949_v2 }
 0x10c   :  { %489 = vst.msk [vmem:[#allocation3 + $0x78] sm:$0xff] %vm209_vm3, %v3949_v2 }
 0x10d   :  { %v343_v7 = vsub.f32 1.5, %v342_v41  ;;  %490 = vst.msk [vmem:[#allocation3 + $0x80] sm:$0xff] %vm209_vm3, %v3949_v2 }
 0x10e   :  { %492 = vst.msk [vmem:[#allocation3 + $0x90] sm:$0xff] %vm209_vm3, %v3949_v2 }
 0x10f   :  { %v344_v53 = vmul.f32 %v3938_v3, %v343_v7  ;;  %495 = vst.msk [vmem:[#allocation3 + $0xa8] sm:$0xff] %vm209_vm3, %v3949_v2 }
 0x110   :  { %498 = vst.msk [vmem:[#allocation3 + $0xc0] sm:$0xff] %vm209_vm3, %v3949_v2 }
 0x111   :  { %v348_v9 = vsel %vm347_vm7, %v3938_v3, %v344_v53  ;;  %v3825_v3 = vld [vmem:[%s5548_s6 + $0x18] sm:$0xff]  ;;  %501 = vst.msk [vmem:[#allocation3 + $0xd8] sm:$0xff] %vm209_vm3, %v3949_v2 }
 0x112   :  { %v349_v11 = vmul.f32 %v348_v9, %v337_v8  ;;  %v3841_v53 = vld [vmem:[%s5548_s6 + $0x98] sm:$0xff]  ;;  %440 = vst.msk [vmem:[#allocation2 + $0x10] sm:$0x3] %vm439_vm5, %v3949_v2 }
 0x113   :  { %443 = vst.msk [vmem:[#allocation2 + $0x28] sm:$0x3] %vm439_vm5, %v3949_v2 }
 0x114   :  { %v351_v12 = vperm.slane %v349_v11, 0  ;;  %v3824_v11 = vld [vmem:[%s5548_s6 + $0x10] sm:$0xff]  ;;  %446 = vst.msk [vmem:[#allocation2 + $0x40] sm:$0x3] %vm439_vm5, %v3949_v2 }
 0x115   :  { %449 = vst.msk [vmem:[#allocation2 + $0x58] sm:$0x3] %vm439_vm5, %v3949_v2 }
 0x116   :  { %v4242_v14 = vmul.f32 %v351_v12, %v4111_v46  ;;  %v4245_v15 = vmul.f32 %v351_v12, %v4114_v47  ;;  %v4248_v59 = vmul.f32 %v351_v12, %v4117_v48  ;;  %v4251_v16 = vmul.f32 %v351_v12, %v4120_v49  ;;  %v4270_v48 = vld [vmem:[%s5546_s5] ss:$0 sm:$0xff]  ;;  %452 = vst.msk [vmem:[#allocation2 + $0x70] sm:$0x3] %vm439_vm5, %v3949_v2 }
 0x117   :  { %v4256_v17 = vmul.f32 %v351_v12, %v4123_v50  ;;  %v4259_v18 = vmul.f32 %v351_v12, %v4140_v43  ;;  %v4262_v46 = vmul.f32 %v351_v12, %v4149_v56  ;;  %v4265_v47 = vmul.f32 %v351_v12, %v4163_v58  ;;  %v3829_v56 = vld [vmem:[%s5548_s6 + $0x38] sm:$0xff]  ;;  %455 = vst.msk [vmem:[#allocation2 + $0x88] sm:$0x3] %vm439_vm5, %v3949_v2 }
 0x118   :  { %v373_v49 = vmul.f32 %v351_v12, %v4126_v51  ;;  %v374_v50 = vmul.f32 %v351_v12, %v4129_v54  ;;  %v375_v43 = vmul.f32 %v351_v12, %v4132_v31  ;;  %v376_v58 = vmul.f32 %v351_v12, %v4143_v32  ;;  %v3833_v54 = vld [vmem:[%s5548_s6 + $0x58] sm:$0xff]  ;;  %603 = vmatpush.bf16.msra.mxu2 %v3829_v56 }
 0x119   :  { %v377_v19 = vmul.f32 %v351_v12, %v4152_v57  ;;  %v378_v51 = vmul.f32 %v351_v12, %v4166_v44  ;;  %v3837_v31 = vld [vmem:[%s5548_s6 + $0x78] sm:$0xff]  ;;  %v379_v20 = vmul.f32 %v351_v12, %v4176_v6  ;;  %v380_v21 = vmul.f32 %v351_v12, %v4185_v13  ;;  %3922 = vmatpush.bf16.msra.mxu3 %v3829_v56  ;;  %v3828_v13 = vld [vmem:[%s5548_s6 + $0x30] sm:$0xff]  ;;  %v3838_v56 = vld [vmem:[%s5548_s6 + $0x80] sm:$0xff] }
 0x11a   :  { %v381_v32 = vadd.f32 %v4270_v48, %v373_v49  ;;  %v382_v57 = vadd.f32 %v4270_v48, %v374_v50  ;;  %v383_v44 = vadd.f32 %v4270_v48, %v375_v43  ;;  %v384_v10 = vadd.f32 %v4270_v48, %v376_v58  ;;  %754 = vmatpush.bf16.msrb.mxu0 %v3833_v54  ;;  %v3839_v50 = vld [vmem:[%s5548_s6 + $0x88] sm:$0xff] }
 0x11b   :  { %v385_v22 = vadd.f32 %v4270_v48, %v377_v19  ;;  %v386_v6 = vadd.f32 %v4270_v48, %v378_v51  ;;  %848 = vmatpush.bf16.msrb.mxu1 %v3837_v31  ;;  %v387_v25 = vadd.f32 %v4270_v48, %v379_v20  ;;  %v388_v26 = vadd.f32 %v4270_v48, %v380_v21  ;;  %v3823_v58 = vld [vmem:[%s5548_s6 + $0x8] sm:$0xff] }
 0x11c   :  { %vm413_vm8 = vcmp.gt.f32.partialorder %v381_v32, 0.0  ;;  %vm414_vm9 = vcmp.gt.f32.partialorder %v382_v57, 0.0  ;;  %vm415_vm10 = vcmp.gt.f32.partialorder %v383_v44, 0.0  ;;  %vm416_vm11 = vcmp.gt.f32.partialorder %v384_v10, 0.0  ;;  %604 = vmatpush.bf16.msra.mxu2 %v3828_v13  ;;  %v542_v19 = vld [vmem:[#allocation2 + $0x7] sm:$0xff] }
 0x11d   :  { %vm417_vm12 = vcmp.gt.f32.partialorder %v385_v22, 0.0  ;;  %vm418_vm13 = vcmp.gt.f32.partialorder %v386_v6, 0.0  ;;  %v421_v36 = vmul.f32 0.2, %v381_v32  ;;  %v422_v39 = vmul.f32 0.2, %v382_v57  ;;  %3923 = vmatpush.bf16.msra.mxu3 %v3828_v13 }
 0x11e   :  { %v423_v40 = vmul.f32 0.2, %v383_v44  ;;  %v424_v42 = vmul.f32 0.2, %v384_v10  ;;  %v425_v45 = vmul.f32 0.2, %v385_v22  ;;  %755 = vmatpush.bf16.msrb.mxu0 %v3832_v23  ;;  %v372_v4 = vadd.f32 %v4270_v48, %v4265_v47 }
 0x11f   :  { %849 = vmatpush.bf16.msrb.mxu1 %v3836_v24  ;;  %vm419_vm14 = vcmp.gt.f32.partialorder %v387_v25, 0.0  ;;  %v426_v27 = vmul.f32 0.2, %v386_v6  ;;  %v427_v33 = vmul.f32 0.2, %v387_v25  ;;  %v429_v37 = vsel %vm413_vm8, %v381_v32, %v421_v36  ;;  %v693_v51 = vld [vmem:[#allocation2 + $0x8] sm:$0xff] }
 0x120   :  { %v428_v30 = vmul.f32 0.2, %v388_v26  ;;  %v430_v34 = vsel %vm414_vm9, %v382_v57, %v422_v39  ;;  %v431_v55 = vsel %vm415_vm10, %v383_v44, %v423_v40  ;;  %v432_v60 = vsel %vm416_vm11, %v384_v10, %v424_v42  ;;  %514 = vst.msk [vmem:[#allocation3 + $0x20] sm:$0xff] %vm209_vm3, %v429_v37  ;;  %605 = vmatpush.bf16.msra.mxu2 %v3827_v28  ;;  %v787_v13 = vld [vmem:[#allocation2 + $0x9] sm:$0xff] }
 0x121   :  { %vm420_vm15 = vcmp.gt.f32.partialorder %v388_v26, 0.0  ;;  %v433_v52 = vsel %vm417_vm12, %v385_v22, %v425_v45  ;;  %515 = vst.msk [vmem:[#allocation3 + $0x38] sm:$0xff] %vm209_vm3, %v430_v34  ;;  %3924 = vmatpush.bf16.msra.mxu3 %v3827_v28  ;;  %v434_v38 = vsel %vm418_vm13, %v386_v6, %v426_v27  ;;  %v435_v0 = vsel %vm419_vm14, %v387_v25, %v427_v33  ;;  %v881_v34 = vld [vmem:[#allocation2 + $0xa] sm:$0xff] }
 0x122   :  { %516 = vst.msk [vmem:[#allocation3 + $0x50] sm:$0xff] %vm209_vm3, %v431_v55  ;;  %756 = vmatpush.bf16.msrb.mxu0 %v3831_v29  ;;  %v436_v1 = vsel %vm420_vm15, %v388_v26, %v428_v30  ;;  %v365_v5 = vadd.f32 %v4270_v48, %v4242_v14  ;;  %v366_v41 = vadd.f32 %v4270_v48, %v4245_v15  ;;  %v404_v8 = vmul.f32 0.2, %v372_v4  ;;  %v3840_v14 = vld [vmem:[%s5548_s6 + $0x90] sm:$0xff] }
 0x123   :  { %850 = vmatpush.bf16.msrb.mxu1 %v3835_v35  ;;  %517 = vst.msk [vmem:[#allocation3 + $0x68] sm:$0xff] %vm209_vm3, %v432_v60  ;;  %v367_v7 = vadd.f32 %v4270_v48, %v4248_v59  ;;  %vm396_vm0 = vcmp.gt.f32.partialorder %v372_v4, 0.0  ;;  %v369_v35 = vadd.f32 %v4270_v48, %v4256_v17  ;;  %v370_v39 = vadd.f32 %v4270_v48, %v4259_v18 }
 0x124   :  { %518 = vst.msk [vmem:[#allocation3 + $0x98] sm:$0xff] %vm209_vm3, %v433_v52  ;;  %606 = vmatpush.bf16.msra.mxu2 %v3826_v61  ;;  %v397_v9 = vmul.f32 0.2, %v365_v5  ;;  %vm389_vm1 = vcmp.gt.f32.partialorder %v365_v5, 0.0  ;;  %v398_v12 = vmul.f32 0.2, %v366_v41  ;;  %v412_v59 = vsel %vm396_vm0, %v372_v4, %v404_v8 }
 0x125   :  { %519 = vst.msk [vmem:[#allocation3 + $0xb0] sm:$0xff] %vm209_vm3, %v434_v38  ;;  %3925 = vmatpush.bf16.msra.mxu3 %v3826_v61  ;;  %vm390_vm2 = vcmp.gt.f32.partialorder %v366_v41, 0.0  ;;  %v399_v15 = vmul.f32 0.2, %v367_v7  ;;  %vm391_vm4 = vcmp.gt.f32.partialorder %v367_v7, 0.0  ;;  %v371_v42 = vadd.f32 %v4270_v48, %v4262_v46  ;;  %v3822_v46 = vld [vmem:[%s5548_s6] sm:$0xff] }
 0x126   :  { %520 = vst.msk [vmem:[#allocation3 + $0xc8] sm:$0xff] %vm209_vm3, %v435_v0  ;;  %757 = vmatpush.bf16.msrb.mxu0 %v3830_v62  ;;  %v405_v47 = vsel %vm389_vm1, %v365_v5, %v397_v9  ;;  %v406_v49 = vsel %vm390_vm2, %v366_v41, %v398_v12  ;;  %v368_v45 = vadd.f32 %v4270_v48, %v4251_v16  ;;  %v401_v18 = vmul.f32 0.2, %v369_v35  ;;  %v3880_v8 = vld [vmem:[%s5548_s6 + $0x1d0] sm:$0xff]  ;;  %v3882_v16 = vld [vmem:[%s5548_s6 + $0x1e0] sm:$0xff] }
 0x127   :  { %851 = vmatpush.bf16.msrb.mxu1 %v3834_v63  ;;  %521 = vst.msk [vmem:[#allocation3 + $0xe0] sm:$0xff] %vm209_vm3, %v436_v1  ;;  %v407_v43 = vsel %vm391_vm4, %v367_v7, %v399_v15  ;;  %v4469_v28 = vld [vmem:[#allocation3 + $0x1f] sm:$0xff]  ;;  %v402_v33 = vmul.f32 0.2, %v370_v39  ;;  %vm393_vm6 = vcmp.gt.f32.partialorder %v369_v35, 0.0  ;;  %vm395_vm7 = vcmp.gt.f32.partialorder %v371_v42, 0.0 }
 0x128   :  { %942 = vmatpush.bf16.msrb.mxu2 %v3841_v53  ;;  %512 = vst.msk [vmem:[#allocation2 + $0xf8] sm:$0xff] %vm209_vm3, %v412_v59  ;;  %v4480_v36 = vld [vmem:[#allocation3 + $0x37] sm:$0xff]  ;;  %v403_v48 = vmul.f32 0.2, %v371_v42  ;;  %vm394_vm8 = vcmp.gt.f32.partialorder %v370_v39, 0.0  ;;  %v409_v55 = vsel %vm393_vm6, %v369_v35, %v401_v18  ;;  %vm392_vm9 = vcmp.gt.f32.partialorder %v368_v45, 0.0 }
 0x129   :  { %668 = vmatpush.bf16.msrb.mxu3 %v3825_v3  ;;  %505 = vst.msk [vmem:[#allocation2 + $0x20] sm:$0xff] %vm209_vm3, %v405_v47  ;;  %v400_v37 = vmul.f32 0.2, %v368_v45  ;;  %v410_v60 = vsel %vm394_vm8, %v370_v39, %v402_v33  ;;  %v546_v7 = vld [vmem:[#allocation2 + $0x97] sm:$0xff]  ;;  %v3847_v39 = vld [vmem:[%s5548_s6 + $0xc8] sm:$0xff]  ;;  %v3846_v18 = vld [vmem:[%s5548_s6 + $0xc0] sm:$0xff] }
 0x12a   :  { %506 = vst.msk [vmem:[#allocation2 + $0x38] sm:$0xff] %vm209_vm3, %v406_v49  ;;  %v411_v62 = vsel %vm395_vm7, %v371_v42, %v403_v48  ;;  %v3845_v47 = vld [vmem:[%s5548_s6 + $0xb8] sm:$0xff]  ;;  %v3851_v42 = vld [vmem:[%s5548_s6 + $0xe8] sm:$0xff]  ;;  %vm3035_vm8 = vcmask 1041409  }
 0x12b   :  { %507 = vst.msk [vmem:[#allocation2 + $0x50] sm:$0xff] %vm209_vm3, %v407_v43  ;;  %v4492_v17 = vld [vmem:[#allocation3 + $0x97] sm:$0xff]  ;;  %v408_v3 = vsel %vm392_vm9, %v368_v45, %v400_v37 }
 0x12c   :  { %943 = vmatpush.bf16.msrb.mxu2 %v3840_v14  ;;  %458 = vst.msk [vmem:[#allocation2 + $0xa0] sm:$0x3] %vm439_vm5, %v3949_v2  ;;  %v4500_v27 = vld [vmem:[#allocation3 + $0xaf] sm:$0xff]  ;;  %v3849_v49 = vld [vmem:[%s5548_s6 + $0xd8] sm:$0xff] }
 0x12d   :  { %669 = vmatpush.bf16.msrb.mxu3 %v3824_v11  ;;  %461 = vst.msk [vmem:[#allocation2 + $0xb8] sm:$0x3] %vm439_vm5, %v3949_v2  ;;  %1130 = vmatpush.bf16.msra.mxu0 %v3849_v49  ;;  %v3844_v37 = vld [vmem:[%s5548_s6 + $0xb0] sm:$0xff] }
 0x12e   :  { %464 = vst.msk [vmem:[#allocation2 + $0xd0] sm:$0x3] %vm439_vm5, %v3949_v2 }
 0x12f   :  { %467 = vst.msk [vmem:[#allocation2 + $0xe8] sm:$0x3] %vm439_vm5, %v3949_v2  ;;  %v1546_v40 = vld [vmem:[#allocation2 + $0xf7] sm:$0xff] }
 0x130   :  { %944 = vmatpush.bf16.msrb.mxu2 %v3839_v50  ;;  %v4432_v54 = vld [vmem:[#allocation2 + $0x1f] sm:$0xff]  ;;  %470 = vst.msk [vmem:[#allocation2 + $0x100] sm:$0x3] %vm439_vm5, %v3949_v2 }
 0x131   :  { %670 = vmatpush.bf16.msrb.mxu3 %v3823_v58  ;;  %v4434_v31 = vld [vmem:[#allocation2 + $0x20] sm:$0xff]  ;;  %v550_v20 = vpack.c.bf16 %v4432_v54, %v542_v19  ;;  %v4439_v21 = vld [vmem:[#allocation2 + $0x37] sm:$0xff]  ;;  %473 = vst.msk [vmem:[#allocation2 + $0x118] sm:$0x3] %vm439_vm5, %v3949_v2 }
 0x132   :  { %v701_v32 = vpack.c.bf16 %v4434_v31, %v693_v51  ;;  %v4444_v57 = vld [vmem:[#allocation2 + $0x38] sm:$0xff]  ;;  %v4446_v44 = vld [vmem:[#allocation2 + $0x4f] sm:$0xff]  ;;  %v1547_v10 = vpack.c.bf16 %v4439_v21, %v4432_v54  ;;  %v788_v23 = vld [vmem:[#allocation2 + $0x21] sm:$0xff]  ;;  %476 = vst.msk [vmem:[#allocation3 + $0x10] sm:$0x3] %vm439_vm5, %v3949_v2 }
 0x133   :  { %v1641_v22 = vpack.c.bf16 %v4444_v57, %v4434_v31  ;;  %3143 = vmatmul.msk.bf16.vlgmr.msra.gmra.mxu2 %vm209_vm3, %v550_v20  ;;  %v551_v6 = vpack.c.bf16 %v4446_v44, %v4439_v21  ;;  %v4462_v24 = vld [vmem:[#allocation2 + $0x22] sm:$0xff]  ;;  %v795_v25 = vpack.c.bf16 %v788_v23, %v787_v13  ;;  %v4467_v26 = vld [vmem:[#allocation2 + $0x3a] sm:$0xff]  ;;  %479 = vst.msk [vmem:[#allocation3 + $0x28] sm:$0x3] %vm439_vm5, %v3949_v2  ;;  %v4513_v30 = vld [vmem:[#allocation2 + $0x50] sm:$0xff] }
 0x134   :  { %945 = vmatpush.bf16.msrb.mxu2 %v3838_v56  ;;  %3191 = vmatmul.msk.bf16.vlgmr.msrb.gmra.mxu0 %vm209_vm3, %v701_v32  ;;  %482 = vst.msk [vmem:[#allocation3 + $0x40] sm:$0x3] %vm439_vm5, %v3949_v2  ;;  %v702_v61 = vpack.c.bf16 %v4513_v30, %v4444_v57  ;;  %v889_v38 = vpack.c.bf16 %v4462_v24, %v881_v34  ;;  %v4530_v0 = vld [vmem:[#allocation2 + $0x39] sm:$0xff]  ;;  %v790_v1 = vld [vmem:[#allocation2 + $0x51] sm:$0xff] }
 0x135   :  { %3144 = vmatmul.msk.bf16.vlgmr.msra.gmra.mxu3 %vm209_vm3, %v551_v6  ;;  %3219 = vmatmul.msk.bf16.vlgmr.msrb.gmra.mxu1 %vm209_vm3, %v795_v25  ;;  %485 = vst.msk [vmem:[#allocation3 + $0x58] sm:$0x3] %vm439_vm5, %v3949_v2  ;;  %v697_v50 = vld [vmem:[#allocation2 + $0x98] sm:$0xff]  ;;  %v3848_v19 = vld [vmem:[%s5548_s6 + $0xd0] sm:$0xff] }
 0x136   :  { %488 = vst.msk [vmem:[#allocation3 + $0x70] sm:$0x3] %vm439_vm5, %v3949_v2  ;;  %671 = vmatpush.bf16.msrb.mxu3 %v3822_v46  ;;  %v3853_v56 = vld [vmem:[%s5548_s6 + $0xf8] sm:$0xff]  ;;  %v3852_v32 = vld [vmem:[%s5548_s6 + $0xf0] sm:$0xff]  ;;  %1131 = vmatpush.bf16.msra.mxu0 %v3848_v19  ;;  %v3850_v46 = vld [vmem:[%s5548_s6 + $0xe0] sm:$0xff] }
 0x137   :  { %491 = vst.msk [vmem:[#allocation3 + $0x88] sm:$0x3] %vm439_vm5, %v3949_v2  ;;  %v4572_v58 = vld [vmem:[#allocation2 + $0x52] sm:$0xff]  ;;  %1224 = vmatpush.bf16.msra.mxu1 %v3853_v56  ;;  %v1069_v19 = vld [vmem:[#allocation3 + $0x7] sm:$0xff] }
 0x138   :  { %494 = vst.msk [vmem:[#allocation3 + $0xa0] sm:$0x3] %vm439_vm5, %v3949_v2  ;;  %v3857_v51 = vld [vmem:[%s5548_s6 + $0x118] sm:$0xff]  ;;  %v890_v23 = vpack.c.bf16 %v4572_v58, %v4467_v26  ;;  %v3856_v34 = vld [vmem:[%s5548_s6 + $0x110] sm:$0xff] }
 0x139   :  { %497 = vst.msk [vmem:[#allocation3 + $0xb8] sm:$0x3] %vm439_vm5, %v3949_v2  ;;  %1318 = vmatpush.bf16.msra.mxu2 %v3857_v51  ;;  %v791_v25 = vld [vmem:[#allocation2 + $0x99] sm:$0xff] }
 0x13a   :  { %500 = vst.msk [vmem:[#allocation3 + $0xd0] sm:$0x3] %vm439_vm5, %v3949_v2  ;;  %v4519_v52 = vld [vmem:[#allocation3 + $0x21] sm:$0xff]  ;;  %1036 = vmatpush.bf16.msra.mxu3 %v3845_v47  ;;  %1132 = vmatpush.bf16.msra.mxu0 %v3847_v39  ;;  %v4646_v39 = vld [vmem:[#allocation2 + $0x4e] sm:$0xff]  ;;  %v3877_v57 = vld [vmem:[%s5548_s6 + $0x1b8] sm:$0xff] }
 0x13b   :  { %503 = vst.msk [vmem:[#allocation3 + $0xe8] sm:$0x3] %vm439_vm5, %v3949_v2  ;;  %v4527_v63 = vld [vmem:[#allocation3 + $0x39] sm:$0xff]  ;;  %v796_v2 = vpack.c.bf16 %v790_v1, %v4530_v0  ;;  %1225 = vmatpush.bf16.msra.mxu1 %v3852_v32  ;;  %v1077_v32 = vpack.c.bf16 %v4469_v28, %v1069_v19  ;;  %v3864_v19 = vld [vmem:[%s5548_s6 + $0x150] sm:$0xff] }
 0x13c   :  { %509 = vst.msk [vmem:[#allocation2 + $0xb0] sm:$0xff] %vm209_vm3, %v409_v55  ;;  %v4629_v47 = vld [vmem:[#allocation2 + $0x1e] sm:$0xff] }
 0x13d   :  { %510 = vst.msk [vmem:[#allocation2 + $0xc8] sm:$0xff] %vm209_vm3, %v410_v60  ;;  %v885_v60 = vld [vmem:[#allocation2 + $0x9a] sm:$0xff]  ;;  %1319 = vmatpush.bf16.msra.mxu2 %v3856_v34 }
 0x13e   :  { %511 = vst.msk [vmem:[#allocation2 + $0xe0] sm:$0xff] %vm209_vm3, %v411_v62  ;;  %1133 = vmatpush.bf16.msra.mxu0 %v3846_v18  ;;  %1037 = vmatpush.bf16.msra.mxu3 %v3844_v37  ;;  %v4655_v18 = vld [vmem:[#allocation3 + $0x4f] sm:$0xff]  ;;  %v1165_v34 = vld [vmem:[#allocation3 + $0x38] sm:$0xff] }
 0x13f   :  { %v4539_v5 = vld [vmem:[#allocation3 + $0x99] sm:$0xff]  ;;  %508 = vst.msk [vmem:[#allocation2 + $0x68] sm:$0xff] %vm209_vm3, %v408_v3  ;;  %1226 = vmatpush.bf16.msra.mxu1 %v3851_v42 }
 0x140   :  { %5561 = vst [vmem:[#allocation5_spill] sm:$0xff] %v4539_v5  ;;  %v4542_v41 = vld [vmem:[#allocation3 + $0xb1] sm:$0xff] }
 0x141   :  { %5562 = vst [vmem:[#allocation6_spill] sm:$0xff] %v4542_v41 }
 0x143   :  { %3247 = vmatmul.msk.bf16.vlgmr.msrb.gmra.mxu2 %vm209_vm3, %v889_v38  ;;  %v4547_v53 = vld [vmem:[#allocation2 + $0xaf] sm:$0xff]  ;;  %1227 = vmatpush.bf16.msra.mxu1 %v3850_v46 }
 0x144   :  { %3192 = vmatmul.msk.bf16.gmra.mxu0 %vm209_vm3, %v702_v61  ;;  %v4549_v9 = vld [vmem:[#allocation2 + $0xb0] sm:$0xff]  ;;  %v552_v11 = vpack.c.bf16 %v4547_v53, %v546_v7  ;;  %v4552_v12 = vld [vmem:[#allocation2 + $0xc7] sm:$0xff] }
 0x145   :  { %3220 = vmatmul.msk.bf16.gmra.mxu1 %vm209_vm3, %v796_v2  ;;  %v4554_v14 = vld [vmem:[#allocation2 + $0xc8] sm:$0xff]  ;;  %v1549_v15 = vpack.c.bf16 %v4552_v12, %v4547_v53  ;;  %v4567_v43 = vld [vmem:[#allocation2 + $0xb2] sm:$0xff]  ;;  %v703_v13 = vpack.c.bf16 %v4549_v9, %v697_v50  ;;  %v4601_v33 = vld [vmem:[#allocation2 + $0xdf] sm:$0xff] }
 0x146   :  { %v1643_v59 = vpack.c.bf16 %v4554_v14, %v4549_v9  ;;  %3145 = vmatmul.msk.bf16.gmra.mxu3 %vm209_vm3, %v552_v11  ;;  %v4580_v20 = vld [vmem:[#allocation2 + $0xca] sm:$0xff]  ;;  %v553_v48 = vpack.c.bf16 %v4601_v33, %v4552_v12  ;;  %v4616_v55 = vld [vmem:[#allocation2 + $0xe0] sm:$0xff]  ;;  %v891_v62 = vpack.c.bf16 %v4567_v43, %v885_v60 }
 0x147   :  { %v792_v35 = vld [vmem:[#allocation2 + $0xb1] sm:$0xff]  ;;  %v3855_v61 = vld [vmem:[%s5548_s6 + $0x108] sm:$0xff]  ;;  %v704_v38 = vpack.c.bf16 %v4616_v55, %v4554_v14  ;;  %v3854_v2 = vld [vmem:[%s5548_s6 + $0x100] sm:$0xff] }
 0x148   :  { %v797_v45 = vpack.c.bf16 %v792_v35, %v791_v25  ;;  %v793_v1 = vld [vmem:[#allocation2 + $0xc9] sm:$0xff]  ;;  %v794_v3 = vld [vmem:[#allocation2 + $0xe1] sm:$0xff]  ;;  %1320 = vmatpush.bf16.msra.mxu2 %v3855_v61  ;;  %v4644_v35 = vld [vmem:[#allocation2 + $0x36] sm:$0xff] }
 0x149   :  { %v798_v7 = vpack.c.bf16 %v794_v3, %v793_v1  ;;  %v522_v11 = vld [vmem:[#allocation2 + $0x6] sm:$0xff]  ;;  %v531_v42 = vpack.c.bf16 %v4646_v39, %v4644_v35  ;;  %v1166_v60 = vld [vmem:[#allocation3 + $0x50] sm:$0xff]  ;;  %v3861_v3 = vld [vmem:[%s5548_s6 + $0x138] sm:$0xff] }
 0x14a   :  { %v530_v49 = vpack.c.bf16 %v4629_v47, %v522_v11  ;;  %v3843_v50 = vld [vmem:[%s5548_s6 + $0xa8] sm:$0xff]  ;;  %v1172_v61 = vpack.c.bf16 %v1166_v60, %v1165_v34  ;;  %v3873_v11 = vld [vmem:[%s5548_s6 + $0x198] sm:$0xff]  ;;  %v3866_v60 = vld [vmem:[%s5548_s6 + $0x160] sm:$0xff] }
 0x14b   :  { %v4637_v56 = vld [vmem:[#allocation2 + $0xe2] sm:$0xff]  ;;  %1038 = vmatpush.bf16.msra.mxu3 %v3843_v50  ;;  %v4679_v50 = vld [vmem:[#allocation3 + $0x51] sm:$0xff] }
 0x14c   :  { %1321 = vmatpush.bf16.msra.mxu2 %v3854_v2  ;;  %v892_v51 = vpack.c.bf16 %v4637_v56, %v4580_v20  ;;  %v1257_v46 = vld [vmem:[#allocation3 + $0x9] sm:$0xff]  ;;  %v3865_v2 = vld [vmem:[%s5548_s6 + $0x158] sm:$0xff] }
 0x14d   :  { %v1265_v37 = vpack.c.bf16 %v4519_v52, %v1257_v46  ;;  %1506 = vmatpush.bf16.msrb.mxu0 %v3865_v2  ;;  %v4703_v34 = vld [vmem:[#allocation2 + $0xde] sm:$0xff]  ;;  %v4775_v54 = vld [vmem:[#allocation2 + $0x66] sm:$0xff]  ;;  %v3876_v12 = vld [vmem:[%s5548_s6 + $0x1b0] sm:$0xff] }
 0x14e   :  { %v1261_v2 = vld [vmem:[#allocation3 + $0x81] sm:$0xff] }
 0x150   :  { %1694 = vmatpush.bf16.msrb.mxu2 %v3873_v11 }
 0x151   :  { %1507 = vmatpush.bf16.msrb.mxu0 %v3864_v19  ;;  %v1169_v19 = vld [vmem:[#allocation3 + $0xb0] sm:$0xff] }
 0x153   :  { %3248 = vmatmul.msk.bf16.gmra.mxu2 %vm209_vm3, %v890_v23  ;;  %v1164_v23 = vld [vmem:[#allocation3 + $0x20] sm:$0xff] }
 0x154   :  { %3193 = vmatmul.msk.bf16.gmra.mxu0 %vm209_vm3, %v703_v13  ;;  %v1163_v13 = vld [vmem:[#allocation3 + $0x8] sm:$0xff] }
 0x155   :  { %3221 = vmatmul.msk.bf16.gmra.mxu1 %vm209_vm3, %v797_v45  ;;  %v1171_v25 = vpack.c.bf16 %v1164_v23, %v1163_v13  ;;  %v3842_v45 = vld [vmem:[%s5548_s6 + $0xa0] sm:$0xff]  ;;  %v1266_v13 = vpack.c.bf16 %v4679_v50, %v4527_v63 }
 0x156   :  { %3146 = vmatmul.msk.bf16.gmra.mxu3 %vm209_vm3, %v553_v48  ;;  %v1078_v48 = vpack.c.bf16 %v4655_v18, %v4480_v36  ;;  %v1167_v23 = vld [vmem:[#allocation3 + $0x80] sm:$0xff] }
 0x157   :  { %1039 = vmatpush.bf16.msra.mxu3 %v3842_v45  ;;  %v3867_v45 = vld [vmem:[%s5548_s6 + $0x168] sm:$0xff] }
 0x163   :  { %3249 = vmatmul.msk.bf16.gmra.mxu2 %vm209_vm3, %v891_v62  ;;  %v4662_v62 = vld [vmem:[#allocation2 + $0xae] sm:$0xff] }
 0x164   :  { %3194 = vmatmul.msk.bf16.gmra.mxu0 %vm209_vm3, %v704_v38  ;;  %v526_v38 = vld [vmem:[#allocation2 + $0x96] sm:$0xff] }
 0x165   :  { %3222 = vmatmul.msk.bf16.gmra.mxu1 %vm209_vm3, %v798_v7  ;;  %v532_v1 = vpack.c.bf16 %v4662_v62, %v526_v38  ;;  %v3869_v7 = vld [vmem:[%s5548_s6 + $0x178] sm:$0xff]  ;;  %v3860_v38 = vld [vmem:[%s5548_s6 + $0x130] sm:$0xff] }
 0x166   :  { %3163 = vmatmul.msk.bf16.vlgmr.msrb.gmra.mxu3 %vm209_vm3, %v530_v49  ;;  %v1073_v49 = vld [vmem:[#allocation3 + $0x7f] sm:$0xff]  ;;  %1600 = vmatpush.bf16.msrb.mxu1 %v3869_v7  ;;  %v3871_v7 = vld [vmem:[%s5548_s6 + $0x188] sm:$0xff] }
 0x167   :  { %1412 = vmatpush.bf16.msrb.mxu3 %v3861_v3  ;;  %v4718_v3 = vld [vmem:[#allocation3 + $0xc7] sm:$0xff] }
 0x168   :  { %v1080_v11 = vpack.c.bf16 %v4718_v3, %v4500_v27 }
 0x16b   :  { %1413 = vmatpush.bf16.msrb.mxu3 %v3860_v38 }
 0x173   :  { %3250 = vmatmul.msk.bf16.gmra.mxu2 %vm209_vm3, %v892_v51  ;;  %v3868_v51 = vld [vmem:[%s5548_s6 + $0x170] sm:$0xff] }
 0x174   :  { %3303 = vmatmul.msk.bf16.vlgmr.msra.gmra.mxu0 %vm209_vm3, %v1077_v32  ;;  %v1079_v32 = vpack.c.bf16 %v4492_v17, %v1073_v49  ;;  %1601 = vmatpush.bf16.msrb.mxu1 %v3868_v51  ;;  %v1267_v49 = vpack.c.bf16 %v4539_v5, %v1261_v2  ;;  %v1170_v51 = vld [vmem:[#allocation3 + $0xc8] sm:$0xff]  ;;  %v4753_v2 = vld [vmem:[#allocation3 + $0x36] sm:$0xff] }
 0x175   :  { %3331 = vmatmul.msk.bf16.vlgmr.msra.gmra.mxu1 %vm209_vm3, %v1171_v25  ;;  %v1168_v25 = vld [vmem:[#allocation3 + $0x98] sm:$0xff] }
 0x176   :  { %3164 = vmatmul.msk.bf16.gmra.mxu3 %vm209_vm3, %v531_v42  ;;  %v3863_v42 = vld [vmem:[%s5548_s6 + $0x148] sm:$0xff]  ;;  %v1173_v46 = vpack.c.bf16 %v1168_v25, %v1167_v23  ;;  %v4731_v25 = vld [vmem:[#allocation3 + $0x1e] sm:$0xff] }
 0x177   :  { %1508 = vmatpush.bf16.msrb.mxu0 %v3863_v42  ;;  %v975_v23 = vld [vmem:[#allocation3 + $0x6] sm:$0xff] }
 0x178   :  { %1602 = vmatpush.bf16.msrb.mxu1 %v3867_v45  ;;  %v983_v42 = vpack.c.bf16 %v4731_v25, %v975_v23  ;;  %v3859_v45 = vld [vmem:[%s5548_s6 + $0x128] sm:$0xff] }
 0x179   :  { %1414 = vmatpush.bf16.msrb.mxu3 %v3859_v45 }
 0x17c   :  { %1603 = vmatpush.bf16.msrb.mxu1 %v3866_v60 }
 0x183   :  { %3359 = vmatmul.msk.bf16.vlgmr.msra.gmra.mxu2 %vm209_vm3, %v1265_v37  ;;  %v4701_v37 = vld [vmem:[#allocation2 + $0xc6] sm:$0xff] }
 0x184   :  { %3304 = vmatmul.msk.bf16.gmra.mxu0 %vm209_vm3, %v1078_v48  ;;  %v3862_v48 = vld [vmem:[%s5548_s6 + $0x140] sm:$0xff] }
 0x185   :  { %3332 = vmatmul.msk.bf16.gmra.mxu1 %vm209_vm3, %v1172_v61  ;;  %v533_v61 = vpack.c.bf16 %v4703_v34, %v4701_v37  ;;  %1509 = vmatpush.bf16.msrb.mxu0 %v3862_v48 }
 0x186   :  { %3165 = vmatmul.msk.bf16.gmra.mxu3 %vm209_vm3, %v532_v1  ;;  %v3872_v1 = vld [vmem:[%s5548_s6 + $0x190] sm:$0xff] }
 0x187   :  { %1695 = vmatpush.bf16.msrb.mxu2 %v3872_v1 }
 0x18b   :  { %1696 = vmatpush.bf16.msrb.mxu2 %v3871_v7  ;;  %v4755_v7 = vld [vmem:[#allocation3 + $0x4e] sm:$0xff] }
 0x193   :  { %3360 = vmatmul.msk.bf16.gmra.mxu2 %vm209_vm3, %v1266_v13  ;;  %v1174_v13 = vpack.c.bf16 %v1170_v51, %v1169_v19  ;;  %v3858_v19 = vld [vmem:[%s5548_s6 + $0x120] sm:$0xff] }
 0x194   :  { %3305 = vmatmul.msk.bf16.gmra.mxu0 %vm209_vm3, %v1079_v32  ;;  %v3870_v32 = vld [vmem:[%s5548_s6 + $0x180] sm:$0xff]  ;;  %1415 = vmatpush.bf16.msrb.mxu3 %v3858_v19 }
 0x195   :  { %3333 = vmatmul.msk.bf16.gmra.mxu1 %vm209_vm3, %v1173_v46  ;;  %1697 = vmatpush.bf16.msrb.mxu2 %v3870_v32  ;;  %v4739_v46 = vld [vmem:[#allocation3 + $0xc9] sm:$0xff] }
 0x196   :  { %3166 = vmatmul.msk.bf16.gmra.mxu3 %vm209_vm3, %v533_v61  ;;  %5563 = vst [vmem:[#allocation7_spill] sm:$0xff] %v4739_v46  ;;  %v1268_v60 = vpack.c.bf16 %v4739_v46, %v4542_v41  ;;  %v1453_v61 = vpack.c.bf16 %v4644_v35, %v4629_v47  ;;  %v984_v47 = vpack.c.bf16 %v4755_v7, %v4753_v2  ;;  %v1542_v32 = vld [vmem:[#allocation2 + $0x67] sm:$0xff] }
 0x1a3   :  { %3361 = vmatmul.msk.bf16.gmra.mxu2 %vm209_vm3, %v1267_v49 }
 0x1a4   :  { %3306 = vmatmul.msk.bf16.gmra.mxu0 %vm209_vm3, %v1080_v11 }
 0x1a5   :  { %3334 = vmatmul.msk.bf16.gmra.mxu1 %vm209_vm3, %v1174_v13 }
 0x1a6   :  { %3275 = vmatmul.msk.bf16.vlgmr.msra.gmra.mxu3 %vm209_vm3, %v983_v42  ;;  %v1548_v42 = vpack.c.bf16 %v1542_v32, %v4446_v44  ;;  %v3881_v44 = vld [vmem:[%s5548_s6 + $0x1d8] sm:$0xff] }
 0x1a7   :  { %1788 = vmatpush.bf16.msra.mxu3 %v3877_v57  ;;  %1882 = vmatpush.bf16.msra.mxu0 %v3881_v44  ;;  %v3884_v57 = vld [vmem:[%s5548_s6 + $0x1f0] sm:$0xff]  ;;  %v3889_v44 = vld [vmem:[%s5548_s6 + $0x218] sm:$0xff] }
 0x1a8   :  { %2070 = vmatpush.bf16.msra.mxu2 %v3889_v44  ;;  %v3878_v44 = vld [vmem:[%s5548_s6 + $0x1c0] sm:$0xff] }
 0x1ab   :  { %1883 = vmatpush.bf16.msra.mxu0 %v3880_v8  ;;  %1789 = vmatpush.bf16.msra.mxu3 %v3876_v12  ;;  %v3887_v12 = vld [vmem:[%s5548_s6 + $0x208] sm:$0xff] }
 0x1b1   :  { %v4741_v48 = vpop.f32.mrf.mxu0 }
 0x1b2   :  { %v4749_v38 = vpop.f32.mrf.mxu1 }
 0x1b3   :  { %3362 = vmatmul.msk.bf16.gmra.mxu2 %vm209_vm3, %v1268_v60  ;;  %v979_v60 = vld [vmem:[#allocation3 + $0x7e] sm:$0xff] }
 0x1b4   :  { %3415 = vmatmul.msk.bf16.vlgmr.msrb.gmra.mxu0 %vm209_vm3, %v1453_v61  ;;  %v4793_v61 = vld [vmem:[#allocation3 + $0x96] sm:$0xff] }
 0x1b5   :  { %3443 = vmatmul.msk.bf16.vlgmr.msrb.gmra.mxu1 %vm209_vm3, %v1547_v10  ;;  %v1454_v10 = vpack.c.bf16 %v4775_v54, %v4646_v39 }
 0x1b6   :  { %v4751_v1 = vpop.f32.mrf.mxu2  ;;  %3276 = vmatmul.msk.bf16.gmra.mxu3 %vm209_vm3, %v984_v47  ;;  %v985_v47 = vpack.c.bf16 %v4793_v61, %v979_v60  ;;  %v1455_v60 = vpack.c.bf16 %v4701_v37, %v4662_v62  ;;  %v3883_v37 = vld [vmem:[%s5548_s6 + $0x1e8] sm:$0xff] }
 0x1b8   :  { %v4765_v35 = vpop.f32.mrf.mxu3 }
 0x1b9   :  { %v4761_v11 = vpop.f32.mrf.mxu0 }
 0x1ba   :  { %v4768_v49 = vpop.f32.mrf.mxu1 }
 0x1be   :  { %v4773_v51 = vpop.f32.mrf.mxu2 }
 0x1c0   :  { %v4788_v23 = vpop.f32.mrf.mxu3 }
 0x1c1   :  { %v4777_v21 = vpop.f32.mrf.mxu0 }
 0x1c2   :  { %v4786_v13 = vpop.f32.mrf.mxu1 }
 0x1c3   :  { %3471 = vmatmul.msk.bf16.vlgmr.msrb.gmra.mxu2 %vm209_vm3, %v1641_v22  ;;  %v3885_v22 = vld [vmem:[%s5548_s6 + $0x1f8] sm:$0xff] }
 0x1c4   :  { %3416 = vmatmul.msk.bf16.gmra.mxu0 %vm209_vm3, %v1454_v10  ;;  %v4813_v10 = vld [vmem:[#allocation2 + $0x68] sm:$0xff]  ;;  %1976 = vmatpush.bf16.msra.mxu1 %v3885_v22 }
 0x1c5   :  { %3444 = vmatmul.msk.bf16.gmra.mxu1 %vm209_vm3, %v1548_v42  ;;  %5564 = vst [vmem:[#allocation8_spill] sm:$0xff] %v4813_v10 }
 0x1c6   :  { %v4791_v45 = vpop.f32.mrf.mxu2  ;;  %3277 = vmatmul.msk.bf16.gmra.mxu3 %vm209_vm3, %v985_v47  ;;  %v1642_v47 = vpack.c.bf16 %v4813_v10, %v4513_v30  ;;  %v3879_v30 = vld [vmem:[%s5548_s6 + $0x1c8] sm:$0xff] }
 0x1c7   :  { %1884 = vmatpush.bf16.msra.mxu0 %v3879_v30  ;;  %v4872_v30 = vld [vmem:[#allocation2 + $0xf6] sm:$0xff] }
 0x1c8   :  { %1977 = vmatpush.bf16.msra.mxu1 %v3884_v57  ;;  %5565 = vst [vmem:[#allocation9_spill] sm:$0xff] %v4872_v30 }
 0x1c9   :  { %v4796_v39 = vpop.f32.mrf.mxu0  ;;  %v4815_v32 = vpop.f32.mrf.mxu3 }
 0x1ca   :  { %v4800_v31 = vpop.f32.mrf.mxu1 }
 0x1cb   :  { %1885 = vmatpush.bf16.msra.mxu0 %v3878_v44  ;;  %v3888_v44 = vld [vmem:[%s5548_s6 + $0x210] sm:$0xff] }
 0x1cc   :  { %1978 = vmatpush.bf16.msra.mxu1 %v3883_v37  ;;  %2071 = vmatpush.bf16.msra.mxu2 %v3888_v44 }
 0x1ce   :  { %v4811_v19 = vpop.f32.mrf.mxu2 }
 0x1d0   :  { %1979 = vmatpush.bf16.msra.mxu1 %v3882_v16  ;;  %2072 = vmatpush.bf16.msra.mxu2 %v3887_v12 }
 0x1d1   :  { %v4817_v42 = vpop.f32.mrf.mxu0  ;;  %v4844_v4 = vpop.f32.mrf.mxu3 }
 0x1d2   :  { %v4834_v62 = vpop.f32.mrf.mxu1 }
 0x1d3   :  { %3472 = vmatmul.msk.bf16.gmra.mxu2 %vm209_vm3, %v1642_v47  ;;  %v4848_v47 = vld [vmem:[#allocation3 + $0xc6] sm:$0xff] }
 0x1d4   :  { %3417 = vmatmul.msk.bf16.gmra.mxu0 %vm209_vm3, %v1455_v60  ;;  %v4846_v60 = vld [vmem:[#allocation3 + $0xae] sm:$0xff] }
 0x1d5   :  { %3445 = vmatmul.msk.bf16.gmra.mxu1 %vm209_vm3, %v1549_v15  ;;  %v986_v57 = vpack.c.bf16 %v4848_v47, %v4846_v60 }
 0x1d6   :  { %v4842_v22 = vpop.f32.mrf.mxu2 }
 0x1d7   :  { %3278 = vmatmul.msk.bf16.gmra.mxu3 %vm209_vm3, %v986_v57  ;;  %v1456_v57 = vpack.c.bf16 %v4872_v30, %v4703_v34  ;;  %v1550_v34 = vpack.c.bf16 %v1546_v40, %v4601_v33  ;;  %v1351_v30 = vld [vmem:[#allocation3 + $0xa] sm:$0xff] }
 0x1d8   :  { %v3875_v33 = vld [vmem:[%s5548_s6 + $0x1a8] sm:$0xff] }
 0x1d9   :  { %v4854_v8 = vpop.f32.mrf.mxu0  ;;  %v4874_v37 = vpop.f32.mrf.mxu3  ;;  %1790 = vmatpush.bf16.msra.mxu3 %v3875_v33 }
 0x1da   :  { %v4865_v53 = vpop.f32.mrf.mxu1 }
 0x1de   :  { %v4870_v15 = vpop.f32.mrf.mxu2 }
 0x1e1   :  { %v4876_v6 = vpop.f32.mrf.mxu0  ;;  %v4896_v10 = vpop.f32.mrf.mxu3 }
 0x1e2   :  { %v4888_v16 = vpop.f32.mrf.mxu1 }
 0x1e3   :  { %3473 = vmatmul.msk.bf16.gmra.mxu2 %vm209_vm3, %v1643_v59  ;;  %v3886_v59 = vld [vmem:[%s5548_s6 + $0x200] sm:$0xff] }
 0x1e4   :  { %3418 = vmatmul.msk.bf16.gmra.mxu0 %vm209_vm3, %v1456_v57  ;;  %v4898_v57 = vld [vmem:[#allocation3 + $0x22] sm:$0xff]  ;;  %2073 = vmatpush.bf16.msra.mxu2 %v3886_v59  ;;  %v5567_v59 = vpack.c.bf16 %v4467_v26, %v4462_v24 }
 0x1e5   :  { %3446 = vmatmul.msk.bf16.gmra.mxu1 %vm209_vm3, %v1550_v34  ;;  %v1359_v14 = vpack.c.bf16 %v4898_v57, %v1351_v30  ;;  %v4915_v34 = vld [vmem:[#allocation2 + $0xf8] sm:$0xff] }
 0x1e6   :  { %v4894_v29 = vpop.f32.mrf.mxu2  ;;  %5566 = vst [vmem:[#allocation10_spill] sm:$0xff] %v4915_v34 }
 0x1e7   :  { %3387 = vmatmul.msk.bf16.vlgmr.msrb.gmra.mxu3 %vm209_vm3, %v1359_v14  ;;  %v1644_v14 = vpack.c.bf16 %v4915_v34, %v4616_v55  ;;  %v1918_v34 = vld [vmem:[#allocation3 + $0x66] sm:$0xff] }
 0x1e9   :  { %v4901_v9 = vpop.f32.mrf.mxu0  ;;  %v673_v12 = vpop.f32.mrf.mxu3 }
 0x1ea   :  { %v4908_v40 = vpop.f32.mrf.mxu1  ;;  %v674_v30 = vadd.f32 %v673_v12, %v4751_v1  ;;  %v1923_v1 = vpack.c.bf16 %v4753_v2, %v4731_v25  ;;  %v3874_v2 = vld [vmem:[%s5548_s6 + $0x1a0] sm:$0xff] }
 0x1eb   :  { %1791 = vmatpush.bf16.msra.mxu3 %v3874_v2 }
 0x1ec   :  { %v779_v5 = vadd.f32 %v4741_v48, %v674_v30  ;;  %v4938_v30 = vld [vmem:[#allocation3 + $0x3a] sm:$0xff] }
 0x1ee   :  { %v4913_v44 = vpop.f32.mrf.mxu2  ;;  %v873_v33 = vadd.f32 %v4749_v38, %v779_v5 }
 0x1f0   :  { %v4936_v55 = vadd.f32 %v4791_v45, %v873_v33 }
 0x1f1   :  { %v4918_v46 = vpop.f32.mrf.mxu0  ;;  %v675_v48 = vpop.f32.mrf.mxu3 }
 0x1f2   :  { %v4928_v41 = vpop.f32.mrf.mxu1  ;;  %v676_v24 = vadd.f32 %v675_v48, %v4773_v51  ;;  %v4958_v51 = vld [vmem:[#allocation2 + $0x6a] sm:$0xff] }
 0x1f3   :  { %3474 = vmatmul.msk.bf16.gmra.mxu2 %vm209_vm3, %v1644_v14  ;;  %v4940_v14 = vld [vmem:[#allocation3 + $0x52] sm:$0xff] }
 0x1f4   :  { %3527 = vmatmul.msk.bf16.vlgmr.msra.gmra.mxu0 %vm209_vm3, %v5567_v59  ;;  %v780_v5 = vadd.f32 %v4761_v11, %v676_v24  ;;  %v1360_v25 = vpack.c.bf16 %v4940_v14, %v4938_v30  ;;  %v1830_v24 = vpack.c.bf16 %v4958_v51, %v4572_v58 }
 0x1f5   :  { %3555 = vmatmul.msk.bf16.vlgmr.msra.gmra.mxu1 %vm209_vm3, %v1923_v1 }
 0x1f6   :  { %v4933_v12 = vpop.f32.mrf.mxu2  ;;  %v874_v45 = vadd.f32 %v4768_v49, %v780_v5  ;;  %v5568_v49 = vpack.c.bf16 %v4480_v36, %v4469_v28 }
 0x1f7   :  { %3388 = vmatmul.msk.bf16.gmra.mxu3 %vm209_vm3, %v1360_v25 }
 0x1f8   :  { %v4961_v11 = vadd.f32 %v4811_v19, %v874_v45  ;;  %v1355_v45 = vld [vmem:[#allocation3 + $0x82] sm:$0xff] }
 0x1f9   :  { %v4944_v26 = vpop.f32.mrf.mxu0  ;;  %v678_v33 = vpop.f32.mrf.mxu3 }
 0x1fa   :  { %v4950_v38 = vpop.f32.mrf.mxu1  ;;  %v679_v1 = vadd.f32 %v678_v33, %v4765_v35  ;;  %v1924_v35 = vpack.c.bf16 %v1918_v34, %v4755_v7  ;;  %v4983_v33 = vld [vmem:[#allocation3 + $0x9a] sm:$0xff] }
 0x1fb   :  { %v3897_v34 = vld [vmem:[%s5548_s6 + $0x258] sm:$0xff] }
 0x1fc   :  { %v781_v25 = vadd.f32 %v4777_v21, %v679_v1  ;;  %2258 = vmatpush.bf16.msrb.mxu0 %v3897_v34 }
 0x1fe   :  { %v4956_v59 = vpop.f32.mrf.mxu2  ;;  %v875_v5 = vadd.f32 %v4786_v13, %v781_v25  ;;  %v1361_v13 = vpack.c.bf16 %v4983_v33, %v1355_v45  ;;  %v2012_v25 = vld [vmem:[#allocation3 + $0x67] sm:$0xff] }
 0x1ff   :  { %v2018_v45 = vpack.c.bf16 %v2012_v25, %v4655_v18  ;;  %v5046_v25 = vld [vmem:[#allocation3 + $0xca] sm:$0xff] }
 0x200   :  { %v4981_v58 = vadd.f32 %v4842_v22, %v875_v5  ;;  %v3893_v22 = vld [vmem:[%s5548_s6 + $0x238] sm:$0xff] }
 0x201   :  { %v4964_v48 = vpop.f32.mrf.mxu0  ;;  %v680_v21 = vpop.f32.mrf.mxu3  ;;  %2164 = vmatpush.bf16.msrb.mxu3 %v3893_v22 }
 0x202   :  { %v4974_v19 = vpop.f32.mrf.mxu1  ;;  %v681_v28 = vadd.f32 %v680_v21, %v4788_v23  ;;  %v3901_v23 = vld [vmem:[%s5548_s6 + $0x278] sm:$0xff] }
 0x203   :  { %3583 = vmatmul.msk.bf16.vlgmr.msra.gmra.mxu2 %vm209_vm3, %v5568_v49  ;;  %2352 = vmatpush.bf16.msrb.mxu1 %v3901_v23 }
 0x204   :  { %3528 = vmatmul.msk.bf16.gmra.mxu0 %vm209_vm3, %v1830_v24  ;;  %v782_v1 = vadd.f32 %v4796_v39, %v681_v28 }
 0x205   :  { %3556 = vmatmul.msk.bf16.gmra.mxu1 %vm209_vm3, %v1924_v35 }
 0x206   :  { %v4978_v2 = vpop.f32.mrf.mxu2  ;;  %v876_v39 = vadd.f32 %v4800_v31, %v782_v1  ;;  %v3896_v31 = vld [vmem:[%s5548_s6 + $0x250] sm:$0xff] }
 0x207   :  { %3389 = vmatmul.msk.bf16.gmra.mxu3 %vm209_vm3, %v1361_v13  ;;  %v3900_v1 = vld [vmem:[%s5548_s6 + $0x270] sm:$0xff]  ;;  %2259 = vmatpush.bf16.msrb.mxu0 %v3896_v31  ;;  %v3899_v13 = vld [vmem:[%s5548_s6 + $0x268] sm:$0xff]  ;;  %v5070_v31 = vld [vmem:[#allocation2 + $0xfa] sm:$0xff] }
 0x208   :  { %v5007_v49 = vadd.f32 %v4870_v15, %v876_v39  ;;  %v3905_v15 = vld [vmem:[%s5548_s6 + $0x298] sm:$0xff]  ;;  %2353 = vmatpush.bf16.msrb.mxu1 %v3900_v1 }
 0x209   :  { %v4987_v36 = vpop.f32.mrf.mxu0  ;;  %v683_v5 = vpop.f32.mrf.mxu3  ;;  %2447 = vmatpush.bf16.msrb.mxu2 %v3905_v15  ;;  %v5044_v39 = vld [vmem:[#allocation3 + $0xb2] sm:$0xff] }
 0x20a   :  { %v4992_v7 = vpop.f32.mrf.mxu1  ;;  %v684_v35 = vadd.f32 %v683_v5, %v4815_v32  ;;  %v5569_v32 = vpack.c.bf16 %v4580_v20, %v4567_v43  ;;  %v1925_v43 = vpack.c.bf16 %v4846_v60, %v4793_v61  ;;  %v3898_v60 = vld [vmem:[%s5548_s6 + $0x260] sm:$0xff] }
 0x20c   :  { %v783_v28 = vadd.f32 %v4817_v42, %v684_v35  ;;  %v3895_v42 = vld [vmem:[%s5548_s6 + $0x248] sm:$0xff]  ;;  %2354 = vmatpush.bf16.msrb.mxu1 %v3899_v13  ;;  %v1832_v13 = vpack.c.bf16 %v5070_v31, %v4637_v56 }
 0x20d   :  { %2260 = vmatpush.bf16.msrb.mxu0 %v3895_v42  ;;  %v3903_v56 = vld [vmem:[%s5548_s6 + $0x288] sm:$0xff] }
 0x20e   :  { %v5004_v24 = vpop.f32.mrf.mxu2  ;;  %v877_v22 = vadd.f32 %v4834_v62, %v783_v28  ;;  %v1362_v62 = vpack.c.bf16 %v5046_v25, %v5044_v39 }
 0x210   :  { %v5042_v34 = vadd.f32 %v4894_v29, %v877_v22  ;;  %v3894_v29 = vld [vmem:[%s5548_s6 + $0x240] sm:$0xff]  ;;  %2355 = vmatpush.bf16.msrb.mxu1 %v3898_v60 }
 0x211   :  { %v5010_v21 = vpop.f32.mrf.mxu0  ;;  %v685_v23 = vpop.f32.mrf.mxu3  ;;  %2261 = vmatpush.bf16.msrb.mxu0 %v3894_v29 }
 0x212   :  { %v5028_v18 = vpop.f32.mrf.mxu1  ;;  %v686_v5 = vadd.f32 %v685_v23, %v4844_v4 }
 0x213   :  { %3584 = vmatmul.msk.bf16.gmra.mxu2 %vm209_vm3, %v2018_v45 }
 0x214   :  { %3529 = vmatmul.msk.bf16.gmra.mxu0 %vm209_vm3, %v5569_v32  ;;  %v784_v61 = vadd.f32 %v4854_v8, %v686_v5  ;;  %v3892_v8 = vld [vmem:[%s5548_s6 + $0x230] sm:$0xff] }
 0x215   :  { %3557 = vmatmul.msk.bf16.gmra.mxu1 %vm209_vm3, %v1925_v43  ;;  %2165 = vmatpush.bf16.msrb.mxu3 %v3892_v8  ;;  %v3904_v43 = vld [vmem:[%s5548_s6 + $0x290] sm:$0xff] }
 0x216   :  { %v5039_v20 = vpop.f32.mrf.mxu2  ;;  %v878_v45 = vadd.f32 %v4865_v53, %v784_v61  ;;  %v1922_v53 = vld [vmem:[#allocation3 + $0xde] sm:$0xff]  ;;  %2448 = vmatpush.bf16.msrb.mxu2 %v3904_v43 }
 0x217   :  { %3390 = vmatmul.msk.bf16.gmra.mxu3 %vm209_vm3, %v1362_v62  ;;  %v1926_v23 = vpack.c.bf16 %v1922_v53, %v4848_v47  ;;  %v3902_v47 = vld [vmem:[%s5548_s6 + $0x280] sm:$0xff] }
 0x218   :  { %v5073_v1 = vadd.f32 %v4913_v44, %v878_v45  ;;  %v5570_v44 = vpack.c.bf16 %v4500_v27, %v4492_v17  ;;  %v1727_v17 = vld [vmem:[#allocation2 + $0x21] sm:$0xff] }
 0x219   :  { %v5050_v35 = vpop.f32.mrf.mxu0  ;;  %v688_v15 = vpop.f32.mrf.mxu3 }
 0x21a   :  { %v5062_v4 = vpop.f32.mrf.mxu1  ;;  %v689_v32 = vadd.f32 %v688_v15, %v4874_v37  ;;  %2449 = vmatpush.bf16.msrb.mxu2 %v3903_v56  ;;  %v5142_v56 = vld [vmem:[#allocation2 + $0x51] sm:$0xff] }
 0x21c   :  { %v785_v22 = vadd.f32 %v4876_v6, %v689_v32 }
 0x21e   :  { %v5068_v28 = vpop.f32.mrf.mxu2  ;;  %v879_v6 = vadd.f32 %v4888_v16, %v785_v22  ;;  %v1735_v16 = vpack.c.bf16 %v4530_v0, %v1727_v17  ;;  %2450 = vmatpush.bf16.msrb.mxu2 %v3902_v47  ;;  %v2386_v17 = vld [vmem:[#allocation2 + $0x36] sm:$0xff] }
 0x220   :  { %v5099_v61 = vadd.f32 %v4933_v12, %v879_v6  ;;  %v5144_v6 = vld [vmem:[#allocation2 + $0x69] sm:$0xff] }
 0x221   :  { %v5076_v42 = vpop.f32.mrf.mxu0  ;;  %v690_v62 = vpop.f32.mrf.mxu3 }
 0x222   :  { %v5089_v37 = vpop.f32.mrf.mxu1  ;;  %v691_v27 = vadd.f32 %v690_v62, %v4896_v10  ;;  %v3891_v10 = vld [vmem:[%s5548_s6 + $0x228] sm:$0xff] }
 0x223   :  { %3585 = vmatmul.msk.bf16.gmra.mxu2 %vm209_vm3, %v5570_v44  ;;  %2166 = vmatpush.bf16.msrb.mxu3 %v3891_v10  ;;  %v2200_v62 = vld [vmem:[#allocation3 + $0x69] sm:$0xff] }
 0x224   :  { %3530 = vmatmul.msk.bf16.gmra.mxu0 %vm209_vm3, %v1832_v13  ;;  %v786_v60 = vadd.f32 %v4901_v9, %v691_v27  ;;  %v2016_v9 = vld [vmem:[#allocation3 + $0xdf] sm:$0xff]  ;;  %v2206_v47 = vpack.c.bf16 %v2200_v62, %v4679_v50  ;;  %v1731_v50 = vld [vmem:[#allocation2 + $0xb1] sm:$0xff] }
 0x225   :  { %3558 = vmatmul.msk.bf16.gmra.mxu1 %vm209_vm3, %v1926_v23  ;;  %v2020_v13 = vpack.c.bf16 %v2016_v9, %v4718_v3 }
 0x226   :  { %v5096_v5 = vpop.f32.mrf.mxu2  ;;  %v880_v8 = vadd.f32 %v4908_v40, %v786_v60  ;;  %v5571_v40 = vpack.c.bf16 %v4527_v63, %v4519_v52 }
 0x227   :  { %3499 = vmatmul.msk.bf16.vlgmr.msra.gmra.mxu3 %vm209_vm3, %v1735_v16 }
 0x228   :  { %v5120_v0 = vadd.f32 %v4956_v59, %v880_v8  ;;  %v2294_v8 = vld [vmem:[#allocation3 + $0x6a] sm:$0xff] }
 0x229   :  { %v5103_v29 = vpop.f32.mrf.mxu0  ;;  %v1041_v15 = vpop.f32.mrf.mxu3 }
 0x22a   :  { %v5111_v12 = vpop.f32.mrf.mxu1  ;;  %v1061_v32 = vadd.f32 %v1041_v15, %v4936_v55  ;;  %v2299_v55 = vpack.c.bf16 %v4938_v30, %v4898_v57  ;;  %v3890_v57 = vld [vmem:[%s5548_s6 + $0x220] sm:$0xff] }
 0x22b   :  { %2167 = vmatpush.bf16.msrb.mxu3 %v3890_v57 }
 0x22c   :  { %v1155_v22 = vadd.f32 %v4918_v46, %v1061_v32 }
 0x22e   :  { %v5117_v45 = vpop.f32.mrf.mxu2  ;;  %v1249_v43 = vadd.f32 %v4928_v41, %v1155_v22  ;;  %v1736_v41 = vpack.c.bf16 %v5144_v6, %v5142_v56  ;;  %v5179_v22 = vld [vmem:[#allocation2 + $0xc9] sm:$0xff] }
 0x230   :  { %v5140_v3 = vadd.f32 %v4978_v2, %v1249_v43  ;;  %v3913_v43 = vld [vmem:[%s5548_s6 + $0x2d8] sm:$0xff] }
 0x231   :  { %v5125_v53 = vpop.f32.mrf.mxu0  ;;  %v1043_v46 = vpop.f32.mrf.mxu3  ;;  %2635 = vmatpush.bf16.msra.mxu0 %v3913_v43  ;;  %v2390_v43 = vld [vmem:[#allocation2 + $0xc6] sm:$0xff] }
 0x232   :  { %v5133_v59 = vpop.f32.mrf.mxu1  ;;  %v1062_v52 = vadd.f32 %v1043_v46, %v4961_v11  ;;  %v2387_v11 = vld [vmem:[#allocation2 + $0x4e] sm:$0xff] }
 0x233   :  { %3586 = vmatmul.msk.bf16.gmra.mxu2 %vm209_vm3, %v2020_v13  ;;  %v2394_v10 = vpack.c.bf16 %v2387_v11, %v2386_v17  ;;  %v3916_v17 = vld [vmem:[%s5548_s6 + $0x2f0] sm:$0xff] }
 0x234   :  { %3639 = vmatmul.msk.bf16.vlgmr.msrb.gmra.mxu0 %vm209_vm3, %v5571_v40  ;;  %v1156_v63 = vadd.f32 %v4944_v26, %v1062_v52 }
 0x235   :  { %3667 = vmatmul.msk.bf16.vlgmr.msrb.gmra.mxu1 %vm209_vm3, %v2299_v55 }
 0x236   :  { %v5137_v44 = vpop.f32.mrf.mxu2  ;;  %v1250_v30 = vadd.f32 %v4950_v38, %v1156_v63 }
 0x237   :  { %3500 = vmatmul.msk.bf16.gmra.mxu3 %vm209_vm3, %v1736_v41 }
 0x238   :  { %v5161_v26 = vadd.f32 %v5004_v24, %v1250_v30  ;;  %v2300_v24 = vpack.c.bf16 %v2294_v8, %v4940_v14  ;;  %v1737_v14 = vpack.c.bf16 %v5179_v22, %v1731_v50 }
 0x239   :  { %v5156_v2 = vpop.f32.mrf.mxu0  ;;  %v1046_v27 = vpop.f32.mrf.mxu3 }
 0x23a   :  { %v5163_v60 = vpop.f32.mrf.mxu1  ;;  %v1063_v16 = vadd.f32 %v1046_v27, %v4981_v58  ;;  %v5573_v27 = vld [vmem:[#allocation5_spill] sm:$0xff] }
 0x23c   :  { %v1157_v38 = vadd.f32 %v4964_v48, %v1063_v16 }
 0x23e   :  { %v5158_v23 = vpop.f32.mrf.mxu2  ;;  %v1251_v9 = vadd.f32 %v4974_v19, %v1157_v38 }
 0x240   :  { %v5175_v32 = vadd.f32 %v5039_v20, %v1251_v9  ;;  %v3909_v20 = vld [vmem:[%s5548_s6 + $0x2b8] sm:$0xff]  ;;  %v5235_v9 = vld [vmem:[#allocation2 + $0xe1] sm:$0xff] }
 0x241   :  { %v1048_v58 = vpop.f32.mrf.mxu3  ;;  %v5177_v13 = vpop.f32.mrf.mxu0  ;;  %2541 = vmatpush.bf16.msra.mxu3 %v3909_v20  ;;  %v2204_v20 = vld [vmem:[#allocation3 + $0xe1] sm:$0xff] }
 0x242   :  { %v1064_v48 = vadd.f32 %v1048_v58, %v5007_v49  ;;  %v5183_v40 = vpop.f32.mrf.mxu1  ;;  %v3917_v49 = vld [vmem:[%s5548_s6 + $0x2f8] sm:$0xff] }
 0x243   :  { %3695 = vmatmul.msk.bf16.vlgmr.msrb.gmra.mxu2 %vm209_vm3, %v2394_v10  ;;  %2729 = vmatpush.bf16.msra.mxu1 %v3917_v49  ;;  %v2391_v49 = vld [vmem:[#allocation2 + $0xde] sm:$0xff] }
 0x244   :  { %3640 = vmatmul.msk.bf16.gmra.mxu0 %vm209_vm3, %v2206_v47  ;;  %v1158_v19 = vadd.f32 %v4987_v36, %v1064_v48  ;;  %v2389_v36 = vld [vmem:[#allocation2 + $0x7e] sm:$0xff]  ;;  %v2301_v47 = vpack.c.bf16 %v5044_v39, %v4983_v33 }
 0x245   :  { %3668 = vmatmul.msk.bf16.gmra.mxu1 %vm209_vm3, %v2300_v24  ;;  %v2395_v30 = vpack.c.bf16 %v2389_v36, %v4775_v54  ;;  %v3911_v54 = vld [vmem:[%s5548_s6 + $0x2c8] sm:$0xff]  ;;  %v5237_v24 = vld [vmem:[#allocation2 + $0xf9] sm:$0xff] }
 0x246   :  { %v5172_v15 = vpop.f32.mrf.mxu2  ;;  %v1252_v55 = vadd.f32 %v4992_v7, %v1158_v19  ;;  %v3912_v7 = vld [vmem:[%s5548_s6 + $0x2d0] sm:$0xff]  ;;  %v3910_v39 = vld [vmem:[%s5548_s6 + $0x2c0] sm:$0xff] }
 0x247   :  { %3501 = vmatmul.msk.bf16.gmra.mxu3 %vm209_vm3, %v1737_v14  ;;  %2636 = vmatpush.bf16.msra.mxu0 %v3912_v7  ;;  %v3914_v48 = vld [vmem:[%s5548_s6 + $0x2e0] sm:$0xff] }
 0x248   :  { %v5201_v52 = vadd.f32 %v5068_v28, %v1252_v55  ;;  %v3921_v28 = vld [vmem:[%s5548_s6 + $0x318] sm:$0xff]  ;;  %2730 = vmatpush.bf16.msra.mxu1 %v3916_v17  ;;  %v2298_v17 = vld [vmem:[#allocation3 + $0xe2] sm:$0xff] }
 0x249   :  { %v1051_v63 = vpop.f32.mrf.mxu3  ;;  %v5204_v57 = vpop.f32.mrf.mxu0  ;;  %2823 = vmatpush.bf16.msra.mxu2 %v3921_v28  ;;  %v2302_v28 = vpack.c.bf16 %v2298_v17, %v5046_v25  ;;  %v3918_v25 = vld [vmem:[%s5548_s6 + $0x300] sm:$0xff] }
 0x24a   :  { %v1065_v41 = vadd.f32 %v1051_v63, %v5042_v34  ;;  %v5217_v11 = vpop.f32.mrf.mxu1  ;;  %v5572_v34 = vld [vmem:[#allocation6_spill] sm:$0xff] }
 0x24b   :  { %v5574_v16 = vpack.c.bf16 %v5572_v34, %v5573_v27  ;;  %2637 = vmatpush.bf16.msra.mxu0 %v3911_v54  ;;  %v2104_v54 = vld [vmem:[#allocation3 + $0x38] sm:$0xff] }
 0x24c   :  { %v1159_v62 = vadd.f32 %v5010_v21, %v1065_v41  ;;  %v3915_v21 = vld [vmem:[%s5548_s6 + $0x2e8] sm:$0xff] }
 0x24d   :  { %2731 = vmatpush.bf16.msra.mxu1 %v3915_v21  ;;  %v5575_v41 = vld [vmem:[#allocation7_spill] sm:$0xff] }
 0x24e   :  { %v5198_v46 = vpop.f32.mrf.mxu2  ;;  %v1253_v10 = vadd.f32 %v5028_v18, %v1159_v62  ;;  %v1738_v18 = vpack.c.bf16 %v5237_v24, %v5235_v9  ;;  %v2396_v62 = vpack.c.bf16 %v2391_v49, %v2390_v43 }
 0x24f   :  { %2638 = vmatpush.bf16.msra.mxu0 %v3910_v39 }
 0x250   :  { %v5241_v58 = vadd.f32 %v5096_v5, %v1253_v10 }
 0x251   :  { %v1053_v8 = vpop.f32.mrf.mxu3  ;;  %v5253_v19 = vpop.f32.mrf.mxu0  ;;  %2732 = vmatpush.bf16.msra.mxu1 %v3914_v48 }
 0x252   :  { %v1066_v50 = vadd.f32 %v1053_v8, %v5073_v1  ;;  %v5259_v1 = vpop.f32.mrf.mxu1 }
 0x253   :  { %3696 = vmatmul.msk.bf16.gmra.mxu2 %vm209_vm3, %v2395_v30  ;;  %v2208_v30 = vpack.c.bf16 %v2204_v20, %v5575_v41  ;;  %v5576_v20 = vld [vmem:[#allocation9_spill] sm:$0xff] }
 0x254   :  { %3641 = vmatmul.msk.bf16.gmra.mxu0 %vm209_vm3, %v5574_v16  ;;  %v1160_v33 = vadd.f32 %v5050_v35, %v1066_v50  ;;  %v3908_v35 = vld [vmem:[%s5548_s6 + $0x2b0] sm:$0xff]  ;;  %v2103_v16 = vld [vmem:[#allocation3 + $0x20] sm:$0xff] }
 0x255   :  { %3669 = vmatmul.msk.bf16.gmra.mxu1 %vm209_vm3, %v2301_v47  ;;  %2542 = vmatpush.bf16.msra.mxu3 %v3908_v35  ;;  %v2111_v8 = vpack.c.bf16 %v2104_v54, %v2103_v16  ;;  %v2762_v54 = vld [vmem:[#allocation2 + $0x3a] sm:$0xff] }
 0x256   :  { %v5233_v38 = vpop.f32.mrf.mxu2  ;;  %v1254_v5 = vadd.f32 %v5062_v4, %v1160_v33  ;;  %v3920_v4 = vld [vmem:[%s5548_s6 + $0x310] sm:$0xff] }
 0x257   :  { %3502 = vmatmul.msk.bf16.gmra.mxu3 %vm209_vm3, %v1738_v18  ;;  %2824 = vmatpush.bf16.msra.mxu2 %v3920_v4  ;;  %v2574_v18 = vld [vmem:[#allocation2 + $0x38] sm:$0xff] }
 0x258   :  { %v5265_v36 = vadd.f32 %v5117_v45, %v1254_v5  ;;  %v3919_v45 = vld [vmem:[%s5548_s6 + $0x308] sm:$0xff] }
 0x25a   :  { %v1056_v55 = vpop.f32.mrf.mxu3 }
 0x25b   :  { %v1067_v63 = vadd.f32 %v1056_v55, %v5099_v61  ;;  %v5278_v61 = vpop.f32.mrf.mxu0  ;;  %2825 = vmatpush.bf16.msra.mxu2 %v3919_v45 }
 0x25d   :  { %v1161_v7 = vadd.f32 %v5076_v42, %v1067_v63  ;;  %v5283_v42 = vpop.f32.mrf.mxu1  ;;  %v2668_v63 = vld [vmem:[#allocation2 + $0x39] sm:$0xff] }
 0x25e   :  { %v5262_v14 = vpop.f32.mrf.mxu2 }
 0x25f   :  { %v1255_v47 = vadd.f32 %v5089_v37, %v1161_v7  ;;  %2826 = vmatpush.bf16.msra.mxu2 %v3918_v25  ;;  %v2393_v37 = vld [vmem:[#allocation2 + $0x10e] sm:$0xff] }
 0x260   :  { %v2397_v43 = vpack.c.bf16 %v2393_v37, %v5576_v20  ;;  %v2106_v7 = vld [vmem:[#allocation3 + $0x68] sm:$0xff] }
 0x261   :  { %v5293_v50 = vadd.f32 %v5137_v44, %v1255_v47  ;;  %v5577_v47 = vld [vmem:[#allocation8_spill] sm:$0xff] }
 0x262   :  { %v1058_v27 = vpop.f32.mrf.mxu3 }
 0x263   :  { %3697 = vmatmul.msk.bf16.gmra.mxu2 %vm209_vm3, %v2396_v62  ;;  %v1068_v21 = vadd.f32 %v1058_v27, %v5120_v0  ;;  %v3907_v0 = vld [vmem:[%s5548_s6 + $0x2a8] sm:$0xff]  ;;  %v5301_v39 = vpop.f32.mrf.mxu0  ;;  %v2105_v62 = vld [vmem:[#allocation3 + $0x50] sm:$0xff] }
 0x264   :  { %3642 = vmatmul.msk.bf16.gmra.mxu0 %vm209_vm3, %v2208_v30  ;;  %2543 = vmatpush.bf16.msra.mxu3 %v3907_v0  ;;  %v2676_v30 = vpack.c.bf16 %v5142_v56, %v2668_v63  ;;  %v2112_v4 = vpack.c.bf16 %v2106_v7, %v2105_v62  ;;  %v3906_v56 = vld [vmem:[%s5548_s6 + $0x2a0] sm:$0xff] }
 0x265   :  { %3670 = vmatmul.msk.bf16.gmra.mxu1 %vm209_vm3, %v2302_v28  ;;  %v1162_v10 = vadd.f32 %v5103_v29, %v1068_v21  ;;  %v2575_v29 = vld [vmem:[#allocation2 + $0x50] sm:$0xff]  ;;  %v5305_v5 = vpop.f32.mrf.mxu1  ;;  %v2671_v0 = vld [vmem:[#allocation2 + $0x81] sm:$0xff] }
 0x266   :  { %v5281_v34 = vpop.f32.mrf.mxu2  ;;  %v2582_v49 = vpack.c.bf16 %v2575_v29, %v2574_v18  ;;  %v2763_v21 = vld [vmem:[#allocation2 + $0x52] sm:$0xff]  ;;  %v2579_v63 = vld [vmem:[#allocation2 + $0xe0] sm:$0xff] }
 0x267   :  { %3611 = vmatmul.msk.bf16.vlgmr.msrb.gmra.mxu3 %vm209_vm3, %v2111_v8  ;;  %v1256_v44 = vadd.f32 %v5111_v12, %v1162_v10  ;;  %v2770_v8 = vpack.c.bf16 %v2763_v21, %v2762_v54 }
 0x268   :  { %2544 = vmatpush.bf16.msra.mxu3 %v3906_v56  ;;  %v2109_v56 = vld [vmem:[#allocation3 + $0xc8] sm:$0xff] }
 0x269   :  { %v5310_v41 = vadd.f32 %v5158_v23, %v1256_v44  ;;  %v2108_v44 = vld [vmem:[#allocation3 + $0xb0] sm:$0xff] }
 0x26a   :  { %v1417_v48 = vpop.f32.mrf.mxu3 }
 0x26b   :  { %v1437_v35 = vadd.f32 %v1417_v48, %v5140_v3 }
 0x26d   :  { %v1531_v55 = vadd.f32 %v5125_v53, %v1437_v35  ;;  %v5319_v53 = vpop.f32.mrf.mxu0  ;;  %v5323_v28 = vpop.f32.mrf.mxu1  ;;  %v2107_v35 = vld [vmem:[#allocation3 + $0x98] sm:$0xff] }
 0x26e   :  { %v5299_v33 = vpop.f32.mrf.mxu2 }
 0x26f   :  { %v1625_v45 = vadd.f32 %v5133_v59, %v1531_v55  ;;  %v2578_v55 = vld [vmem:[#allocation2 + $0xc8] sm:$0xff] }
 0x271   :  { %v5330_v27 = vadd.f32 %v5172_v15, %v1625_v45 }
 0x272   :  { %v1419_v12 = vpop.f32.mrf.mxu3 }
 0x273   :  { %3698 = vmatmul.msk.bf16.gmra.mxu2 %vm209_vm3, %v2397_v43  ;;  %v1438_v17 = vadd.f32 %v1419_v12, %v5161_v26  ;;  %v2577_v26 = vld [vmem:[#allocation2 + $0x80] sm:$0xff]  ;;  %v2113_v43 = vpack.c.bf16 %v2108_v44, %v2107_v35  ;;  %v2480_v44 = vld [vmem:[#allocation2 + $0x37] sm:$0xff] }
 0x274   :  { %3751 = vmatmul.msk.bf16.vlgmr.msra.gmra.mxu0 %vm209_vm3, %v2582_v49  ;;  %v2583_v10 = vpack.c.bf16 %v2577_v26, %v5577_v47  ;;  %v2110_v26 = vld [vmem:[#allocation3 + $0xe0] sm:$0xff] }
 0x275   :  { %3779 = vmatmul.msk.bf16.vlgmr.msra.gmra.mxu1 %vm209_vm3, %v2676_v30  ;;  %v1532_v23 = vadd.f32 %v5156_v2, %v1438_v17  ;;  %v5338_v18 = vpop.f32.mrf.mxu0  ;;  %v5345_v29 = vpop.f32.mrf.mxu1  ;;  %v2765_v30 = vld [vmem:[#allocation2 + $0x82] sm:$0xff] }
 0x276   :  { %v5315_v3 = vpop.f32.mrf.mxu2 }
 0x277   :  { %3612 = vmatmul.msk.bf16.gmra.mxu3 %vm209_vm3, %v2112_v4  ;;  %v1626_v37 = vadd.f32 %v5163_v60, %v1532_v23  ;;  %v2678_v23 = vpack.c.bf16 %v5235_v9, %v5179_v22  ;;  %v2581_v9 = vld [vmem:[#allocation2 + $0x110] sm:$0xff] }
 0x279   :  { %v5343_v15 = vadd.f32 %v5198_v46, %v1626_v37  ;;  %v2675_v37 = vld [vmem:[#allocation2 + $0x111] sm:$0xff] }
 0x27a   :  { %v1422_v2 = vpop.f32.mrf.mxu3 }
 0x27b   :  { %v1439_v59 = vadd.f32 %v1422_v2, %v5175_v32  ;;  %v2677_v32 = vpack.c.bf16 %v2671_v0, %v5144_v6  ;;  %v2767_v2 = vld [vmem:[#allocation2 + $0xe2] sm:$0xff] }
 0x27d   :  { %v1533_v25 = vadd.f32 %v5177_v13, %v1439_v59  ;;  %v5355_v46 = vpop.f32.mrf.mxu0  ;;  %v5360_v12 = vpop.f32.mrf.mxu1 }
 0x27e   :  { %v5332_v16 = vpop.f32.mrf.mxu2 }
 0x27f   :  { %v1627_v49 = vadd.f32 %v5183_v40, %v1533_v25  ;;  %v2771_v40 = vpack.c.bf16 %v2765_v30, %v4958_v51 }
 0x281   :  { %v5358_v6 = vadd.f32 %v5233_v38, %v1627_v49 }
 0x282   :  { %v1424_v48 = vpop.f32.mrf.mxu3 }
 0x283   :  { %3807 = vmatmul.msk.bf16.vlgmr.msra.gmra.mxu2 %vm209_vm3, %v2770_v8  ;;  %v1440_v60 = vadd.f32 %v1424_v48, %v5201_v52  ;;  %v5578_v8 = vld [vmem:[#allocation10_spill] sm:$0xff]  ;;  %v2679_v48 = vpack.c.bf16 %v2675_v37, %v5237_v24 }
 0x284   :  { %3752 = vmatmul.msk.bf16.gmra.mxu0 %vm209_vm3, %v2583_v10  ;;  %v2585_v25 = vpack.c.bf16 %v2581_v9, %v5578_v8  ;;  %v2769_v24 = vld [vmem:[#allocation2 + $0x112] sm:$0xff]  ;;  %v2484_v9 = vld [vmem:[#allocation2 + $0xc7] sm:$0xff] }
 0x285   :  { %3780 = vmatmul.msk.bf16.gmra.mxu1 %vm209_vm3, %v2677_v32  ;;  %v1534_v20 = vadd.f32 %v5204_v57, %v1440_v60  ;;  %v2584_v57 = vpack.c.bf16 %v2579_v63, %v2578_v55  ;;  %v2481_v60 = vld [vmem:[#allocation2 + $0x4f] sm:$0xff] }
 0x286   :  { %v5349_v13 = vpop.f32.mrf.mxu2 }
 0x287   :  { %3613 = vmatmul.msk.bf16.gmra.mxu3 %vm209_vm3, %v2113_v43  ;;  %v1628_v38 = vadd.f32 %v5217_v11, %v1534_v20  ;;  %v2114_v11 = vpack.c.bf16 %v2110_v26, %v2109_v56  ;;  %v2488_v43 = vpack.c.bf16 %v2481_v60, %v2480_v44 }
 0x289   :  { %v5373_v4 = vadd.f32 %v5262_v14, %v1628_v38  ;;  %v2766_v14 = vld [vmem:[#allocation2 + $0xca] sm:$0xff] }
 0x28a   :  { %v1427_v62 = vpop.f32.mrf.mxu3  ;;  %v2482_v38 = vld [vmem:[#allocation2 + $0x67] sm:$0xff] }
 0x28b   :  { %v1441_v52 = vadd.f32 %v1427_v62, %v5241_v58  ;;  %v5375_v58 = vpop.f32.mrf.mxu0 }
 0x28d   :  { %v1535_v17 = vadd.f32 %v5253_v19, %v1441_v52  ;;  %v5379_v19 = vpop.f32.mrf.mxu1  ;;  %v2773_v52 = vpack.c.bf16 %v2769_v24, %v5070_v31 }
 0x28e   :  { %v5363_v7 = vpop.f32.mrf.mxu2 }
 0x28f   :  { %v1629_v22 = vadd.f32 %v5259_v1, %v1535_v17 }
 0x291   :  { %v5387_v59 = vadd.f32 %v5281_v34, %v1629_v22 }
 0x292   :  { %v1429_v45 = vpop.f32.mrf.mxu3 }
 0x293   :  { %3808 = vmatmul.msk.bf16.gmra.mxu2 %vm209_vm3, %v2771_v40  ;;  %v1442_v51 = vadd.f32 %v1429_v45, %v5265_v36  ;;  %v1894_v10 = vpop.f32.mrf.mxu0 }
 0x294   :  { %3753 = vmatmul.msk.bf16.gmra.mxu0 %vm209_vm3, %v2584_v57 }
 0x295   :  { %3781 = vmatmul.msk.bf16.gmra.mxu1 %vm209_vm3, %v2678_v23  ;;  %v1536_v54 = vadd.f32 %v5278_v61, %v1442_v51  ;;  %v2772_v61 = vpack.c.bf16 %v2767_v2, %v2766_v14  ;;  %v5392_v32 = vpop.f32.mrf.mxu1  ;;  %v2483_v23 = vld [vmem:[#allocation2 + $0x7f] sm:$0xff] }
 0x296   :  { %v5382_v21 = vpop.f32.mrf.mxu2  ;;  %v2489_v56 = vpack.c.bf16 %v2483_v23, %v2482_v38  ;;  %v2485_v14 = vld [vmem:[#allocation2 + $0xdf] sm:$0xff] }
 0x297   :  { %3614 = vmatmul.msk.bf16.gmra.mxu3 %vm209_vm3, %v2114_v11  ;;  %v1630_v1 = vadd.f32 %v5283_v42, %v1536_v54 }
 0x29a   :  { %v1432_v47 = vpop.f32.mrf.mxu3 }
 0x29b   :  { %v1443_v36 = vadd.f32 %v1432_v47, %v5293_v50  ;;  %v5401_v50 = vadd.f32 %v5299_v33, %v1630_v1  ;;  %v1897_v49 = vpop.f32.mrf.mxu0 }
 0x29d   :  { %v1537_v0 = vadd.f32 %v5301_v39, %v1443_v36  ;;  %v1991_v55 = vpop.f32.mrf.mxu1 }
 0x29e   :  { %v5397_v34 = vpop.f32.mrf.mxu2 }
 0x29f   :  { %v1631_v42 = vadd.f32 %v5305_v5, %v1537_v0 }
 0x2a1   :  { %v1725_v33 = vadd.f32 %v5315_v3, %v1631_v42 }
 0x2a2   :  { %v1434_v35 = vpop.f32.mrf.mxu3 }
 0x2a3   :  { %3809 = vmatmul.msk.bf16.gmra.mxu2 %vm209_vm3, %v2772_v61  ;;  %v1444_v39 = vadd.f32 %v1434_v35, %v5310_v41  ;;  %v1899_v57 = vpop.f32.mrf.mxu0  ;;  %v2487_v35 = vld [vmem:[#allocation2 + $0x10f] sm:$0xff] }
 0x2a4   :  { %3754 = vmatmul.msk.bf16.gmra.mxu0 %vm209_vm3, %v2585_v25 }
 0x2a5   :  { %3782 = vmatmul.msk.bf16.gmra.mxu1 %vm209_vm3, %v2679_v48  ;;  %v1538_v20 = vadd.f32 %v5319_v53, %v1444_v39  ;;  %v1993_v5 = vpop.f32.mrf.mxu1  ;;  %v2486_v48 = vld [vmem:[#allocation2 + $0xf7] sm:$0xff] }
 0x2a6   :  { %v2085_v30 = vpop.f32.mrf.mxu2  ;;  %v2491_v60 = vpack.c.bf16 %v2487_v35, %v2486_v48 }
 0x2a7   :  { %3723 = vmatmul.msk.bf16.vlgmr.msra.gmra.mxu3 %vm209_vm3, %v2488_v43  ;;  %v1632_v53 = vadd.f32 %v5323_v28, %v1538_v20 }
 0x2a9   :  { %v1726_v40 = vadd.f32 %v5332_v16, %v1632_v53 }
 0x2aa   :  { %v1793_v63 = vpop.f32.mrf.mxu3 }
 0x2ab   :  { %v1813_v62 = vadd.f32 %v1793_v63, %v5330_v27  ;;  %v1902_v28 = vpop.f32.mrf.mxu0 }
 0x2ad   :  { %v1907_v41 = vadd.f32 %v5338_v18, %v1813_v62  ;;  %v1996_v51 = vpop.f32.mrf.mxu1 }
 0x2ae   :  { %v2087_v45 = vpop.f32.mrf.mxu2 }
 0x2af   :  { %v2001_v31 = vadd.f32 %v5345_v29, %v1907_v41 }
 0x2b1   :  { %v2095_v18 = vadd.f32 %v5349_v13, %v2001_v31  ;;  %v2490_v13 = vpack.c.bf16 %v2485_v14, %v2484_v9 }
 0x2b2   :  { %v1795_v17 = vpop.f32.mrf.mxu3 }
 0x2b3   :  { %3810 = vmatmul.msk.bf16.gmra.mxu2 %vm209_vm3, %v2773_v52  ;;  %v1814_v3 = vadd.f32 %v1795_v17, %v5343_v15  ;;  %v1904_v29 = vpop.f32.mrf.mxu0 }
 0x2b5   :  { %v1908_v27 = vadd.f32 %v5355_v46, %v1814_v3  ;;  %v1998_v36 = vpop.f32.mrf.mxu1 }
 0x2b6   :  { %v2090_v11 = vpop.f32.mrf.mxu2 }
 0x2b7   :  { %3724 = vmatmul.msk.bf16.gmra.mxu3 %vm209_vm3, %v2489_v56  ;;  %v2002_v15 = vadd.f32 %v5360_v12, %v1908_v27 }
 0x2b9   :  { %v2096_v22 = vadd.f32 %v5363_v7, %v2002_v15 }
 0x2ba   :  { %v1798_v26 = vpop.f32.mrf.mxu3 }
 0x2bb   :  { %v1815_v16 = vadd.f32 %v1798_v26, %v5358_v6  ;;  %v2263_v61 = vpop.f32.mrf.mxu0 }
 0x2bd   :  { %v1909_v54 = vadd.f32 %v5375_v58, %v1815_v16  ;;  %v2357_v37 = vpop.f32.mrf.mxu1 }
 0x2be   :  { %v2092_v8 = vpop.f32.mrf.mxu2 }
 0x2bf   :  { %v2003_v6 = vadd.f32 %v5379_v19, %v1909_v54 }
 0x2c1   :  { %v2097_v58 = vadd.f32 %v5382_v21, %v2003_v6 }
 0x2c2   :  { %v1800_v46 = vpop.f32.mrf.mxu3 }
 0x2c3   :  { %v1816_v2 = vadd.f32 %v1800_v46, %v5373_v4  ;;  %v2265_v39 = vpop.f32.mrf.mxu0 }
 0x2c5   :  { %v1910_v47 = vadd.f32 %v1894_v10, %v1816_v2  ;;  %v2359_v20 = vpop.f32.mrf.mxu1 }
 0x2c6   :  { %v2452_v10 = vpop.f32.mrf.mxu2 }
 0x2c7   :  { %3725 = vmatmul.msk.bf16.gmra.mxu3 %vm209_vm3, %v2490_v13  ;;  %v2004_v0 = vadd.f32 %v5392_v32, %v1910_v47 }
 0x2c9   :  { %v2098_v4 = vadd.f32 %v5397_v34, %v2004_v0 }
 0x2ca   :  { %v1803_v25 = vpop.f32.mrf.mxu3 }
 0x2cb   :  { %v1817_v12 = vadd.f32 %v1803_v25, %v5387_v59  ;;  %v2268_v63 = vpop.f32.mrf.mxu0 }
 0x2cd   :  { %v1911_v7 = vadd.f32 %v1897_v49, %v1817_v12  ;;  %v2362_v41 = vpop.f32.mrf.mxu1 }
 0x2ce   :  { %v2454_v32 = vpop.f32.mrf.mxu2 }
 0x2cf   :  { %v2005_v21 = vadd.f32 %v1991_v55, %v1911_v7 }
 0x2d1   :  { %v2099_v59 = vadd.f32 %v2085_v30, %v2005_v21 }
 0x2d2   :  { %v1805_v1 = vpop.f32.mrf.mxu3 }
 0x2d3   :  { %v1818_v44 = vadd.f32 %v1805_v1, %v5401_v50  ;;  %v2270_v23 = vpop.f32.mrf.mxu0 }
 0x2d5   :  { %v1912_v19 = vadd.f32 %v1899_v57, %v1818_v44  ;;  %v2364_v3 = vpop.f32.mrf.mxu1 }
 0x2d6   :  { %v2457_v50 = vpop.f32.mrf.mxu2 }
 0x2d7   :  { %3726 = vmatmul.msk.bf16.gmra.mxu3 %vm209_vm3, %v2491_v60  ;;  %v2006_v24 = vadd.f32 %v1993_v5, %v1912_v19 }
 0x2d9   :  { %v2100_v34 = vadd.f32 %v2087_v45, %v2006_v24 }
 0x2da   :  { %v1808_v43 = vpop.f32.mrf.mxu3 }
 0x2db   :  { %v1819_v49 = vadd.f32 %v1808_v43, %v1725_v33 }
 0x2dd   :  { %v1913_v42 = vadd.f32 %v1902_v28, %v1819_v49  ;;  %v2273_v28 = vpop.f32.mrf.mxu0  ;;  %v2367_v26 = vpop.f32.mrf.mxu1 }
 0x2de   :  { %v2459_v33 = vpop.f32.mrf.mxu2 }
 0x2df   :  { %v2007_v57 = vadd.f32 %v1996_v51, %v1913_v42 }
 0x2e1   :  { %v5433_v17 = vadd.f32 %v2090_v11, %v2007_v57 }
 0x2e2   :  { %v1810_v62 = vpop.f32.mrf.mxu3 }
 0x2e3   :  { %v1820_v52 = vadd.f32 %v1810_v62, %v1726_v40 }
 0x2e5   :  { %v1914_v53 = vadd.f32 %v1904_v29, %v1820_v52  ;;  %v2369_v14 = vpop.f32.mrf.mxu1 }
 0x2e6   :  { %v2462_v54 = vpop.f32.mrf.mxu2 }
 0x2e7   :  { %v2008_v27 = vadd.f32 %v1998_v36, %v1914_v53 }
 0x2e9   :  { %v5435_v56 = vadd.f32 %v2092_v8, %v2008_v27 }
 0x2ea   :  { %v2169_v38 = vpop.f32.mrf.mxu3 }
 0x2eb   :  { %v2189_v55 = vadd.f32 %v2169_v38, %v2095_v18  ;;  %v2275_v18 = vpop.f32.mrf.mxu0 }
 0x2ed   :  { %v2283_v30 = vadd.f32 %v2263_v61, %v2189_v55  ;;  %v5439_v12 = vpop.f32.mrf.mxu1  ;;  %v5452_v55 = vld [vmem:[%s5549_s7] ss:$0 sm:$0xff] }
 0x2ee   :  { %v2464_v47 = vpop.f32.mrf.mxu2 }
 0x2ef   :  { %v2377_v40 = vadd.f32 %v2357_v37, %v2283_v30 }
 0x2f1   :  { %v2472_v16 = vadd.f32 %v2452_v10, %v2377_v40 }
 0x2f2   :  { %v2171_v5 = vpop.f32.mrf.mxu3 }
 0x2f3   :  { %v2190_v45 = vadd.f32 %v2171_v5, %v2096_v22  ;;  %v5437_v22 = vpop.f32.mrf.mxu0 }
 0x2f5   :  { %v2284_v31 = vadd.f32 %v2265_v39, %v2190_v45  ;;  %v5445_v48 = vpop.f32.mrf.mxu1 }
 0x2f6   :  { %v5441_v61 = vpop.f32.mrf.mxu2 }
 0x2f7   :  { %v2378_v46 = vadd.f32 %v2359_v20, %v2284_v31 }
 0x2f9   :  { %v2473_v9 = vadd.f32 %v2454_v32, %v2378_v46 }
 0x2fa   :  { %v2174_v51 = vpop.f32.mrf.mxu3 }
 0x2fb   :  { %v2191_v11 = vadd.f32 %v2174_v51, %v2097_v58  ;;  %v5443_v1 = vpop.f32.mrf.mxu0 }
 0x2fd   :  { %v2285_v15 = vadd.f32 %v2268_v63, %v2191_v11 }
 0x2fe   :  { %v5447_v44 = vpop.f32.mrf.mxu2 }
 0x2ff   :  { %v2379_v36 = vadd.f32 %v2362_v41, %v2285_v15 }
 0x301   :  { %v2474_v6 = vadd.f32 %v2457_v50, %v2379_v36 }
 0x302   :  { %v2176_v2 = vpop.f32.mrf.mxu3 }
 0x303   :  { %v2192_v29 = vadd.f32 %v2176_v2, %v2098_v4  ;;  %v2640_v21 = vpop.f32.mrf.mxu0 }
 0x305   :  { %v2286_v13 = vadd.f32 %v2270_v23, %v2192_v29 }
 0x306   :  { %v2828_v43 = vpop.f32.mrf.mxu2 }
 0x307   :  { %v2380_v58 = vadd.f32 %v2364_v3, %v2286_v13 }
 0x309   :  { %v2475_v0 = vadd.f32 %v2459_v33, %v2380_v58 }
 0x30a   :  { %v2179_v8 = vpop.f32.mrf.mxu3 }
 0x30b   :  { %v2193_v25 = vadd.f32 %v2179_v8, %v2099_v59  ;;  %v2734_v59 = vpop.f32.mrf.mxu1  ;;  %v2642_v32 = vpop.f32.mrf.mxu0 }
 0x30d   :  { %v2287_v7 = vadd.f32 %v2273_v28, %v2193_v25 }
 0x30e   :  { %v2830_v63 = vpop.f32.mrf.mxu2 }
 0x30f   :  { %v2381_v35 = vadd.f32 %v2367_v26, %v2287_v7 }
 0x311   :  { %v2476_v19 = vadd.f32 %v2462_v54, %v2381_v35 }
 0x312   :  { %v2181_v37 = vpop.f32.mrf.mxu3 }
 0x313   :  { %v2194_v10 = vadd.f32 %v2181_v37, %v2100_v34  ;;  %v2736_v42 = vpop.f32.mrf.mxu1  ;;  %v2645_v41 = vpop.f32.mrf.mxu0 }
 0x315   :  { %v2288_v4 = vadd.f32 %v2275_v18, %v2194_v10 }
 0x316   :  { %v2833_v30 = vpop.f32.mrf.mxu2 }
 0x317   :  { %v2382_v39 = vadd.f32 %v2369_v14, %v2288_v4 }
 0x319   :  { %v2477_v20 = vadd.f32 %v2464_v47, %v2382_v39 }
 0x31a   :  { %v2184_v60 = vpop.f32.mrf.mxu3 }
 0x31b   :  { %v2739_v57 = vpop.f32.mrf.mxu1  ;;  %v2647_v28 = vpop.f32.mrf.mxu0  ;;  %v2195_v10 = vadd.f32 %v2184_v60, %v5433_v17 }
 0x31e   :  { %v2835_v15 = vpop.f32.mrf.mxu2 }
 0x322   :  { %v2186_v49 = vpop.f32.mrf.mxu3 }
 0x323   :  { %v2741_v54 = vpop.f32.mrf.mxu1  ;;  %v2650_v47 = vpop.f32.mrf.mxu0 }
 0x326   :  { %v2838_v25 = vpop.f32.mrf.mxu2 }
 0x32a   :  { %v2546_v24 = vpop.f32.mrf.mxu3 }
 0x32b   :  { %v2566_v34 = vadd.f32 %v2546_v24, %v2472_v16  ;;  %v2652_v39 = vpop.f32.mrf.mxu0 }
 0x32d   :  { %v2660_v62 = vadd.f32 %v2640_v21, %v2566_v34 }
 0x32f   :  { %v2754_v52 = vadd.f32 %v2734_v59, %v2660_v62  ;;  %v2289_v59 = vadd.f32 %v5437_v22, %v2195_v10 }
 0x331   :  { %v2848_v38 = vadd.f32 %v2828_v43, %v2754_v52  ;;  %v2383_v62 = vadd.f32 %v5439_v12, %v2289_v59 }
 0x332   :  { %v2548_v53 = vpop.f32.mrf.mxu3 }
 0x333   :  { %v2567_v50 = vadd.f32 %v2548_v53, %v2473_v9  ;;  %v5455_v27 = vadd.f32 %v5452_v55, %v2848_v38  ;;  %v2478_v22 = vadd.f32 %v5441_v61, %v2383_v62 }
 0x335   :  { %v2661_v23 = vadd.f32 %v2642_v32, %v2567_v50  ;;  %v2868_v40 = vsel %vm209_vm3, %v5455_v27, 0.0 }
 0x337   :  { %v2755_v3 = vadd.f32 %v2736_v42, %v2661_v23 }
 0x339   :  { %v2849_v33 = vadd.f32 %v2830_v63, %v2755_v3  ;;  %v2840_v63 = vpop.f32.mrf.mxu2 }
 0x33a   :  { %v2551_v5 = vpop.f32.mrf.mxu3 }
 0x33b   :  { %v5458_v45 = vadd.f32 %v5452_v55, %v2849_v33  ;;  %v2568_v31 = vadd.f32 %v2551_v5, %v2474_v6  ;;  %v2744_v6 = vpop.f32.mrf.mxu1 }
 0x33d   :  { %v2869_v26 = vsel %vm209_vm3, %v5458_v45, 0.0  ;;  %v2662_v16 = vadd.f32 %v2645_v41, %v2568_v31  ;;  %v3950_v31 = vmov 64.0  }
 0x33e   :  { %v2870_v51 = vadd.f32 %v2869_v26, %v2868_v40  ;;  %3939 = vrcp.f32 %v3950_v31 }
 0x33f   :  { %v2756_v11 = vadd.f32 %v2739_v57, %v2662_v16  ;;  %v2655_v57 = vpop.f32.mrf.mxu0 }
 0x341   :  { %v2850_v46 = vadd.f32 %v2833_v30, %v2756_v11  ;;  %v2843_v33 = vpop.f32.mrf.mxu2 }
 0x342   :  { %v2553_v18 = vpop.f32.mrf.mxu3 }
 0x343   :  { %v5465_v9 = vadd.f32 %v5452_v55, %v2850_v46  ;;  %v2569_v14 = vadd.f32 %v2553_v18, %v2475_v0  ;;  %v2746_v32 = vpop.f32.mrf.mxu1 }
 0x344   :  { %v3940_v11 = vpop.eup %3939 }
 0x345   :  { %v2871_v2 = vsel %vm209_vm3, %v5465_v9, 0.0  ;;  %v2663_v29 = vadd.f32 %v2647_v28, %v2569_v14  ;;  %vm2894_vm10 = vweird.f32 %v3940_v11 }
 0x346   :  { %v2872_v13 = vadd.f32 %v2871_v2, %v2870_v51  ;;  %v2890_v2 = vmul.f32 64.0, %v3940_v11 }
 0x347   :  { %v2757_v36 = vadd.f32 %v2741_v54, %v2663_v29  ;;  %v2657_v16 = vpop.f32.mrf.mxu0 }
 0x349   :  { %v2851_v8 = vadd.f32 %v2835_v15, %v2757_v36  ;;  %v2845_v18 = vpop.f32.mrf.mxu2 }
 0x34a   :  { %v2556_v7 = vpop.f32.mrf.mxu3 }
 0x34b   :  { %v5470_v58 = vadd.f32 %v5452_v55, %v2851_v8  ;;  %v2570_v37 = vadd.f32 %v2556_v7, %v2476_v19  ;;  %v2196_v19 = vadd.f32 %v2186_v49, %v5435_v56  ;;  %v2749_v30 = vpop.f32.mrf.mxu1 }
 0x34d   :  { %v2873_v0 = vsel %vm209_vm3, %v5470_v58, 0.0  ;;  %v2664_v4 = vadd.f32 %v2650_v47, %v2570_v37  ;;  %v2290_v53 = vadd.f32 %v5443_v1, %v2196_v19 }
 0x34e   :  { %v2874_v35 = vadd.f32 %v2873_v0, %v2872_v13 }
 0x34f   :  { %v2758_v21 = vadd.f32 %v2744_v6, %v2664_v4  ;;  %v2384_v3 = vadd.f32 %v5445_v48, %v2290_v53 }
 0x351   :  { %v2852_v43 = vadd.f32 %v2838_v25, %v2758_v21  ;;  %v2479_v28 = vadd.f32 %v5447_v44, %v2384_v3  ;;  %v2891_v44 = vsub.f32 1.0, %v2890_v2  ;;  %v3933_v2 = vld [vmem:[%s5550_s9] ss:$0 sm:$0xff] }
 0x352   :  { %v2558_v42 = vpop.f32.mrf.mxu3 }
 0x353   :  { %v2864_v24 = vadd.f32 %v5452_v55, %v2852_v43  ;;  %v2571_v34 = vadd.f32 %v2558_v42, %v2477_v20  ;;  %v2751_v15 = vpop.f32.mrf.mxu1  ;;  %v2892_v6 = vmul.f32 %v3940_v11, %v2891_v44 }
 0x355   :  { %v2875_v17 = vsel %vm209_vm3, %v2864_v24, 0.0  ;;  %v2665_v60 = vadd.f32 %v2652_v39, %v2571_v34  ;;  %v2893_v7 = vadd.f32 %v3940_v11, %v2892_v6 }
 0x356   :  { %v2876_v52 = vadd.f32 %v2875_v17, %v2874_v35 }
 0x357   :  { %v2759_v41 = vadd.f32 %v2746_v32, %v2665_v60  ;;  %v2895_v0 = vsel %vm2894_vm10, %v3940_v11, %v2893_v7 }
 0x359   :  { %v2853_v50 = vadd.f32 %v2840_v63, %v2759_v41 }
 0x35a   :  { %v2561_v38 = vpop.f32.mrf.mxu3 }
 0x35b   :  { %v2865_v23 = vadd.f32 %v5452_v55, %v2853_v50  ;;  %v2572_v20 = vadd.f32 %v2561_v38, %v2478_v22 }
 0x35d   :  { %v2877_v56 = vsel %vm209_vm3, %v2865_v23, 0.0  ;;  %v2666_v49 = vadd.f32 %v2655_v57, %v2572_v20 }
 0x35e   :  { %v2878_v12 = vadd.f32 %v2877_v56, %v2876_v52 }
 0x35f   :  { %v2760_v5 = vadd.f32 %v2749_v30, %v2666_v49 }
 0x361   :  { %v2854_v1 = vadd.f32 %v2843_v33, %v2760_v5 }
 0x362   :  { %v2563_v61 = vpop.f32.mrf.mxu3 }
 0x363   :  { %v2866_v40 = vadd.f32 %v5452_v55, %v2854_v1  ;;  %v2573_v26 = vadd.f32 %v2563_v61, %v2479_v28 }
 0x365   :  { %v2879_v54 = vsel %vm209_vm3, %v2866_v40, 0.0  ;;  %v2667_v51 = vadd.f32 %v2657_v16, %v2573_v26 }
 0x366   :  { %v2880_v46 = vadd.f32 %v2879_v54, %v2878_v12 }
 0x367   :  { %v2761_v48 = vadd.f32 %v2751_v15, %v2667_v51  ;;  %v2935_v15 = vld [vmem:[%s5551_s8] sm:$0x1] }
 0x369   :  { %v2855_v14 = vadd.f32 %v2845_v18, %v2761_v48 }
 0x36b   :  { %v2867_v29 = vadd.f32 %v5452_v55, %v2855_v14 }
 0x36d   :  { %v2881_v47 = vsel %vm209_vm3, %v2867_v29, 0.0 }
 0x36e   :  { %v2882_v13 = vadd.f32 %v2881_v47, %v2880_v46 }
 0x370   :  { %v2883_v36 = vrot.slane %v2882_v13, 4 }
 0x372   :  { %v2884_v8 = vadd.f32 %v2883_v36, %v2882_v13 }
 0x374   :  { %v2885_v25 = vrot.slane %v2884_v8, 2 }
 0x376   :  { %v2886_v37 = vadd.f32 %v2885_v25, %v2884_v8 }
 0x378   :  { %v2887_v10 = vrot.slane %v2886_v37, 1 }
 0x37a   :  { %v2888_v4 = vadd.f32 %v2887_v10, %v2886_v37 }
 0x37c   :  { %v2896_v35 = vmul.f32 %v2895_v0, %v2888_v4 }
 0x37e   :  { %v2897_v21 = vsub.f32 %v5455_v27, %v2896_v35  ;;  %v2898_v39 = vsub.f32 %v5458_v45, %v2896_v35  ;;  %v2899_v55 = vsub.f32 %v5465_v9, %v2896_v35  ;;  %v2900_v59 = vsub.f32 %v5470_v58, %v2896_v35 }
 0x37f   :  { %v2901_v43 = vsub.f32 %v2864_v24, %v2896_v35  ;;  %v2902_v32 = vsub.f32 %v2865_v23, %v2896_v35  ;;  %v2903_v42 = vsub.f32 %v2866_v40, %v2896_v35  ;;  %v2904_v34 = vsub.f32 %v2867_v29, %v2896_v35 }
 0x380   :  { %v2905_v63 = vmul.f32 %v2897_v21, %v2897_v21  ;;  %v2906_v19 = vmul.f32 %v2898_v39, %v2898_v39  ;;  %v2907_v17 = vmul.f32 %v2899_v55, %v2899_v55  ;;  %v2908_v60 = vmul.f32 %v2900_v59, %v2900_v59 }
 0x381   :  { %v2909_v27 = vmul.f32 %v2901_v43, %v2901_v43  ;;  %v2910_v9 = vmul.f32 %v2902_v32, %v2902_v32  ;;  %v2911_v50 = vmul.f32 %v2903_v42, %v2903_v42  ;;  %v2912_v38 = vmul.f32 %v2904_v34, %v2904_v34 }
 0x382   :  { %v2913_v62 = vsel %vm209_vm3, %v2905_v63, 0.0  ;;  %v2914_v52 = vsel %vm209_vm3, %v2906_v19, 0.0  ;;  %v2916_v45 = vsel %vm209_vm3, %v2907_v17, 0.0  ;;  %v2918_v58 = vsel %vm209_vm3, %v2908_v60, 0.0 }
 0x383   :  { %v2915_v41 = vadd.f32 %v2914_v52, %v2913_v62  ;;  %v2920_v22 = vsel %vm209_vm3, %v2909_v27, 0.0  ;;  %v2922_v23 = vsel %vm209_vm3, %v2910_v9, 0.0  ;;  %v2924_v30 = vsel %vm209_vm3, %v2911_v50, 0.0 }
 0x384   :  { %v2926_v49 = vsel %vm209_vm3, %v2912_v38, 0.0 }
 0x385   :  { %v2917_v53 = vadd.f32 %v2916_v45, %v2915_v41 }
 0x387   :  { %v2919_v24 = vadd.f32 %v2918_v58, %v2917_v53 }
 0x389   :  { %v2921_v57 = vadd.f32 %v2920_v22, %v2919_v24  ;;  %v2998_v24 = vld [vmem:[%s5552_s10 + $0x18] sm:$0xff] }
 0x38b   :  { %v2923_v20 = vadd.f32 %v2922_v23, %v2921_v57 }
 0x38d   :  { %v2925_v56 = vadd.f32 %v2924_v30, %v2923_v20 }
 0x38f   :  { %v2927_v3 = vadd.f32 %v2926_v49, %v2925_v56 }
 0x391   :  { %v2928_v33 = vrot.slane %v2927_v3, 4 }
 0x393   :  { %v2929_v12 = vadd.f32 %v2928_v33, %v2927_v3 }
 0x395   :  { %v2930_v5 = vrot.slane %v2929_v12, 2 }
 0x397   :  { %v2931_v31 = vadd.f32 %v2930_v5, %v2929_v12 }
 0x399   :  { %v2932_v1 = vrot.slane %v2931_v31, 1 }
 0x39b   :  { %v2933_v28 = vadd.f32 %v2932_v1, %v2931_v31 }
 0x39d   :  { %v2934_v61 = vmul.f32 %v2933_v28, %v2895_v0 }
 0x39f   :  { %v2936_v40 = vadd.f32 1e-05, %v2934_v61 }
 0x3a1   :  { %3941 = vrsqrt.f32 %v2936_v40  ;;  %vm2943_vm12 = vweird.f32 %v2936_v40 }
 0x3a7   :  { %v3942_v26 = vpop.eup %3941 }
 0x3a8   :  { %v2938_v16 = vmul.f32 %v3942_v26, %v2936_v40  ;;  %vm2944_vm11 = vweird.f32 %v3942_v26 }
 0x3a9   :  { %vm2945_vm13 = vmor %vm2943_vm12, %vm2944_vm11 }
 0x3aa   :  { %v2939_v54 = vmul.f32 %v3942_v26, %v2938_v16 }
 0x3ac   :  { %v2940_v51 = vmul.f32 0.5, %v2939_v54 }
 0x3ae   :  { %v2941_v11 = vsub.f32 1.5, %v2940_v51 }
 0x3b0   :  { %v2942_v46 = vmul.f32 %v3942_v26, %v2941_v11 }
 0x3b2   :  { %v2946_v48 = vsel %vm2945_vm13, %v3942_v26, %v2942_v46 }
 0x3b3   :  { %v2947_v18 = vmul.f32 %v2946_v48, %v2935_v15 }
 0x3b5   :  { %v2949_v14 = vperm.slane %v2947_v18, 0 }
 0x3b7   :  { %v2958_v29 = vmul.f32 %v2949_v14, %v2904_v34  ;;  %v2951_v47 = vmul.f32 %v2949_v14, %v2897_v21  ;;  %v2952_v44 = vmul.f32 %v2949_v14, %v2898_v39  ;;  %v2953_v13 = vmul.f32 %v2949_v14, %v2899_v55  ;;  %v2995_v21 = vld [vmem:[%s5552_s10] sm:$0xff]  ;;  %v2996_v39 = vld [vmem:[%s5552_s10 + $0x8] sm:$0xff] }
 0x3b8   :  { %v2954_v36 = vmul.f32 %v2949_v14, %v2900_v59  ;;  %v2955_v6 = vmul.f32 %v2949_v14, %v2901_v43  ;;  %v2956_v8 = vmul.f32 %v2949_v14, %v2902_v32  ;;  %v2957_v25 = vmul.f32 %v2949_v14, %v2903_v42  ;;  %v2997_v43 = vld [vmem:[%s5552_s10 + $0x10] sm:$0xff] }
 0x3b9   :  { %v2970_v7 = vadd.f32 %v3933_v2, %v2958_v29  ;;  %v2963_v37 = vadd.f32 %v3933_v2, %v2951_v47  ;;  %v2964_v10 = vadd.f32 %v3933_v2, %v2952_v44  ;;  %v2965_v0 = vadd.f32 %v3933_v2, %v2953_v13 }
 0x3ba   :  { %v2966_v4 = vadd.f32 %v3933_v2, %v2954_v36  ;;  %v2967_v35 = vadd.f32 %v3933_v2, %v2955_v6  ;;  %v2968_v63 = vadd.f32 %v3933_v2, %v2956_v8  ;;  %v2969_v19 = vadd.f32 %v3933_v2, %v2957_v25 }
 0x3bb   :  { %v2986_v17 = vmul.f32 0.2, %v2970_v7  ;;  %vm2971_vm14 = vcmp.gt.f32.partialorder %v2963_v37, 0.0  ;;  %vm2972_vm15 = vcmp.gt.f32.partialorder %v2964_v10, 0.0  ;;  %vm2973_vm0 = vcmp.gt.f32.partialorder %v2965_v0, 0.0 }
 0x3bc   :  { %vm2974_vm1 = vcmp.gt.f32.partialorder %v2966_v4, 0.0  ;;  %vm2975_vm2 = vcmp.gt.f32.partialorder %v2967_v35, 0.0  ;;  %vm2976_vm4 = vcmp.gt.f32.partialorder %v2968_v63, 0.0  ;;  %vm2977_vm6 = vcmp.gt.f32.partialorder %v2969_v19, 0.0 }
 0x3bd   :  { %vm2978_vm7 = vcmp.gt.f32.partialorder %v2970_v7, 0.0  ;;  %v2979_v55 = vmul.f32 0.2, %v2963_v37  ;;  %v2980_v59 = vmul.f32 0.2, %v2964_v10  ;;  %v17_v32 = vstv %s5553_s11 }
 0x3be   :  { %v2981_v42 = vmul.f32 0.2, %v2965_v0  ;;  %v2982_v34 = vmul.f32 0.2, %v2966_v4  ;;  %v2983_v60 = vmul.f32 0.2, %v2967_v35  ;;  %v2994_v62 = vsel %vm2978_vm7, %v2970_v7, %v2986_v17 }
 0x3bf   :  { %v2984_v52 = vmul.f32 0.2, %v2968_v63  ;;  %v2985_v41 = vmul.f32 0.2, %v2969_v19  ;;  %v2987_v27 = vsel %vm2971_vm14, %v2963_v37, %v2979_v55  ;;  %v2988_v45 = vsel %vm2972_vm15, %v2964_v10, %v2980_v59  ;;  %18 = vst [vmem:[#allocation4] sm:$0x1] %v17_v32 }
 0x3c0   :  { %v2989_v53 = vsel %vm2973_vm0, %v2965_v0, %v2981_v42  ;;  %v2990_v9 = vsel %vm2974_vm1, %v2966_v4, %v2982_v34  ;;  %v2991_v58 = vsel %vm2975_vm2, %v2967_v35, %v2983_v60  ;;  %v2999_v50 = vmul.f32 %v2995_v21, %v2987_v27 }
 0x3c1   :  { %v2992_v22 = vsel %vm2976_vm4, %v2968_v63, %v2984_v52  ;;  %v2993_v57 = vsel %vm2977_vm6, %v2969_v19, %v2985_v41  ;;  %v3000_v38 = vmul.f32 %v2996_v39, %v2988_v45  ;;  %v3001_v23 = vmul.f32 %v2997_v43, %v2989_v53 }
 0x3c2   :  { %v3003_v20 = vmul.f32 %v2995_v21, %v2991_v58  ;;  %v3004_v30 = vmul.f32 %v2996_v39, %v2992_v22  ;;  %v3005_v56 = vmul.f32 %v2997_v43, %v2993_v57  ;;  %v3002_v49 = vmul.f32 %v2998_v24, %v2990_v9 }
 0x3c3   :  { %v3007_v3 = vsel %vm209_vm3, %v2999_v50, 0.0  ;;  %v3008_v33 = vsel %vm209_vm3, %v3000_v38, 0.0  ;;  %v3006_v12 = vmul.f32 %v2998_v24, %v2994_v62  ;;  %v3010_v28 = vsel %vm209_vm3, %v3001_v23, 0.0 }
 0x3c4   :  { %v3009_v5 = vadd.f32 %v3008_v33, %v3007_v3  ;;  %v3020_v31 = vsel %vm209_vm3, %v3003_v20, 0.0  ;;  %v3021_v1 = vsel %vm209_vm3, %v3004_v30, 0.0  ;;  %v3023_v26 = vsel %vm209_vm3, %v3005_v56, 0.0 }
 0x3c5   :  { %v3022_v61 = vadd.f32 %v3021_v1, %v3020_v31  ;;  %v3012_v16 = vsel %vm209_vm3, %v3002_v49, 0.0  ;;  %v3025_v11 = vsel %vm209_vm3, %v3006_v12, 0.0 }
 0x3c6   :  { %v3011_v40 = vadd.f32 %v3010_v28, %v3009_v5  ;;  %v3934_v37 = vld [vmem:[#allocation4] ss:$0 sm:$0xff] }
 0x3c7   :  { %v3024_v54 = vadd.f32 %v3023_v26, %v3022_v61 }
 0x3c8   :  { %v3013_v51 = vadd.f32 %v3012_v16, %v3011_v40 }
 0x3c9   :  { %v3026_v15 = vadd.f32 %v3025_v11, %v3024_v54 }
 0x3ca   :  { %v3014_v46 = vrot.slane %v3013_v51, 4 }
 0x3cb   :  { %v3027_v48 = vrot.slane %v3026_v15, 4 }
 0x3cc   :  { %v3015_v18 = vadd.f32 %v3014_v46, %v3013_v51 }
 0x3cd   :  { %v3028_v14 = vadd.f32 %v3027_v48, %v3026_v15 }
 0x3ce   :  { %v3016_v2 = vrot.slane %v3015_v18, 2 }
 0x3cf   :  { %v3029_v29 = vrot.slane %v3028_v14, 2 }
 0x3d0   :  { %v3017_v47 = vadd.f32 %v3016_v2, %v3015_v18 }
 0x3d1   :  { %v3030_v44 = vadd.f32 %v3029_v29, %v3028_v14 }
 0x3d2   :  { %v3018_v13 = vrot.slane %v3017_v47, 1 }
 0x3d3   :  { %v3031_v36 = vrot.slane %v3030_v44, 1 }
 0x3d4   :  { %v3019_v6 = vadd.f32 %v3018_v13, %v3017_v47 }
 0x3d5   :  { %v3032_v8 = vadd.f32 %v3031_v36, %v3030_v44 }
 0x3d7   :  { %v3036_v25 = vsel %vm3035_vm8, %v3032_v8, %v3019_v6 }
 0x3d8   :  { %v3038_v7 = vsel %vm439_vm5, %v3036_v25, 0.0  ;;  %vm3065_vm5 = vcmask 1024  }
 0x3d9   :  { %3039 = vadd.xlane.f32.xlu0 %v3038_v7 }
 0x44c   :  { %v3040_v10 = vpop.xlane.xlu0 %3039 }
 0x44d   :  { %v3045_v0 = vadd.f32 %v3934_v37, %v3040_v10 }
 0x44f   :  { %v3811_v4 = vmul.f32 -1.442695, %v3045_v0 }
 0x451   :  { %3943 = vpow2.f32 %v3811_v4 }
 0x457   :  { %v3944_v35 = vpop.eup %3943 }
 0x458   :  { %v3049_v63 = vadd.f32 1.0, %v3944_v35 }
 0x45a   :  { %3945 = vrcp.f32 %v3049_v63  ;;  %v3061_v39 = vand.u32 2147483648, %v3049_v63  ;;  %v3059_v59 = vand.u32 2147483647, %v3049_v63  ;;  %vm3055_vm9 = vweird.f32 %v3049_v63 }
 0x45c   :  { %v3062_v32 = vor.u32 1.1754944e-38, %v3061_v39  ;;  %vm3060_vm11 = vcmp.eq.f32.partialorder %v3059_v59, 8.507059e+37 }
 0x460   :  { %v3946_v19 = vpop.eup %3945 }
 0x461   :  { %v3051_v17 = vmul.f32 %v3946_v19, %v3049_v63  ;;  %vm3056_vm3 = vweird.f32 %v3946_v19 }
 0x462   :  { %vm3057_vm10 = vmor %vm3055_vm9, %vm3056_vm3 }
 0x463   :  { %v3052_v21 = vsub.f32 1.0, %v3051_v17 }
 0x465   :  { %v3053_v55 = vmul.f32 %v3946_v19, %v3052_v21 }
 0x467   :  { %v3054_v43 = vadd.f32 %v3946_v19, %v3053_v55 }
 0x469   :  { %v3058_v42 = vsel %vm3057_vm10, %v3946_v19, %v3054_v43 }
 0x46a   :  { %v3063_v34 = vsel %vm3060_vm11, %v3062_v32, %v3058_v42 }
 0x46b   :  { %3066 = vst.msk [vmem:[%s5554_s12] sm:$0x3] %vm3065_vm5, %v3063_v34 }

</bundles_post_ra>
